<compile_context>
chip_gen: v7x
topology: tpu7x:2x2x1
jax: 0.10.0
libtpu: 0.0.40
codegen_flags: <defaults>
</compile_context>

<pallas_src>
import functools

import jax
import jax.numpy as jnp
from jax.experimental import pallas as pl
from jax.experimental.pallas import tpu as pltpu


# ----------------------------- Pallas kernel --------------------------------
def _conv_tap_kernel(x_ref, w_ref, o_ref, acc_ref, *,
                     KH, KW, OH, OW, stride, dilation):
    """One (group, batch) step: fused-im2col conv over the whole image.

    x_ref:  (Hp, Wp, C_in_g)            padded input slab (compute dtype)
    w_ref:  (KH*KW, C_in_g, C_out_g)    per-group weight taps (VMEM-resident)
    o_ref:  (OH, OW, C_out_g)           output image for this (group, batch)
    acc_ref:(OH*OW, C_out_g) f32        accumulator scratch
    """
    c_in_g = x_ref.shape[-1]
    c_out_g = o_ref.shape[-1]

    acc_ref[...] = jnp.zeros_like(acc_ref)

    # Unrolled tap loop: KH*KW shifted slabs of the VMEM-resident image,
    # each contracted against its (C_in_g, C_out_g) weight tap on the MXU.
    for kh in range(KH):
        for kw in range(KW):
            h0 = kh * dilation
            w0 = kw * dilation
            if stride == 1:
                slab = x_ref[pl.ds(h0, OH), pl.ds(w0, OW), :]
            else:
                slab = x_ref[pl.ds(h0, OH, stride=stride),
                             pl.ds(w0, OW, stride=stride), :]
            a = slab.reshape(OH * OW, c_in_g)
            acc_ref[...] += jnp.dot(a, w_ref[kh * KW + kw],
                                    preferred_element_type=jnp.float32)

    o_ref[...] = acc_ref[...].reshape(OH, OW, c_out_g).astype(o_ref.dtype)


# ------------------------------- JAX glue ------------------------------------
def generic_conv2d(x, weight, *, dilation=1, padding=0, stride=1, groups=1,
                   group_broadcasting=False, compute_dtype=jnp.bfloat16):
    """Equivalent of GenericConv2D.forward: conv(x, kernel(), ...) (F.conv2d).

    Note: the data path is bf16 with f32 MXU accumulation by default
    (compute_dtype), a deliberate TPU-friendly choice; pass
    compute_dtype=jnp.float32 for full f32 numerics.
    """
    N, C_in, H, W = x.shape
    if group_broadcasting:
        # TODO(synk): exact `group_broadcasting` semantics belong to the
        # user-supplied `conv` callable; here the single-group weight is shared
        # (tiled) across all `groups`.
        weight = jnp.concatenate([weight] * groups, axis=0)
    C_out, C_in_g, KH, KW = weight.shape
    G = groups
    assert C_in == C_in_g * G and C_out % G == 0
    C_out_g = C_out // G

    OH = (H + 2 * padding - dilation * (KH - 1) - 1) // stride + 1
    OW = (W + 2 * padding - dilation * (KW - 1) - 1) // stride + 1
    Hp, Wp = H + 2 * padding, W + 2 * padding

    cdt = compute_dtype if compute_dtype is not None else x.dtype
    out_dtype = x.dtype
    itm = jnp.dtype(cdt).itemsize
    otm = jnp.dtype(out_dtype).itemsize

    # (N, C_in, H, W) -> (G*N, Hp, Wp, C_in_g): one layout pass + spatial pad.
    xg = x.reshape(N, G, C_in_g, H, W).astype(cdt)
    xg = jnp.transpose(xg, (1, 0, 3, 4, 2))            # (G, N, H, W, C_in_g)
    xg = xg.reshape(G * N, H, W, C_in_g)
    xg = jnp.pad(xg, ((0, 0), (padding, padding), (padding, padding), (0, 0)))

    # OIHW -> (G, KH*KW, C_in_g, C_out_g); small, stays VMEM-resident per group.
    wg = weight.reshape(G, C_out_g, C_in_g, KH, KW).astype(cdt)
    wg = jnp.transpose(wg, (0, 3, 4, 2, 1))            # (G, KH, KW, C_in_g, C_out_g)
    wg = wg.reshape(G, KH * KW, C_in_g, C_out_g)

    # Per-step VMEM budget (double-buffered in/out + weight + f32 accumulator).
    in_blk = Hp * Wp * C_in_g * itm
    w_blk = KH * KW * C_in_g * C_out_g * itm
    out_blk = OH * OW * C_out_g * otm
    acc_blk = OH * OW * C_out_g * 4
    vmem_need = 2 * in_blk + 2 * out_blk + 2 * w_blk + acc_blk
    if vmem_need > 48 * 2**20:
        # TODO(synk): spatial (output-row) tiling with manual halo DMA
        # (memory_space=pl.ANY + make_async_copy) for very large images.
        raise NotImplementedError(
            "per-(group,batch) image slab exceeds the VMEM budget; "
            "spatial tiling path not implemented")
    vmem_limit = int(min(max(32 * 2**20, 2 * vmem_need), 64 * 2**20))

    flops = 2 * G * N * OH * OW * C_in_g * C_out_g * KH * KW
    bytes_accessed = int(xg.size * itm + wg.size * itm
                         + G * N * OH * OW * C_out_g * otm)

    kernel = functools.partial(_conv_tap_kernel, KH=KH, KW=KW, OH=OH, OW=OW,
                               stride=stride, dilation=dilation)

    # TODO(synk): depthwise-style layers (C_in_g == 1) would be better served by
    # a VPU-only multiply-accumulate path; the tap GEMM below is still correct.
    out = pl.pallas_call(
        kernel,
        out_shape=jax.ShapeDtypeStruct((G * N, OH, OW, C_out_g), out_dtype),
        grid_spec=pltpu.PrefetchScalarGridSpec(
            num_scalar_prefetch=0,
            grid=(G, N),
            in_specs=[
                # Whole padded image for this (group, batch): read once from HBM.
                pl.BlockSpec((None, Hp, Wp, C_in_g),
                             lambda g, n: (g * N + n, 0, 0, 0)),
                # Per-group weight: block index constant across the batch sweep
                # -> no re-DMA, weights stay resident in VMEM.
                pl.BlockSpec((None, KH * KW, C_in_g, C_out_g),
                             lambda g, n: (g, 0, 0, 0)),
            ],
            out_specs=pl.BlockSpec((None, OH, OW, C_out_g),
                                   lambda g, n: (g * N + n, 0, 0, 0)),
            scratch_shapes=[pltpu.VMEM((OH * OW, C_out_g), jnp.float32)],
        ),
        compiler_params=pltpu.CompilerParams(
            dimension_semantics=("parallel", "parallel"),
            vmem_limit_bytes=vmem_limit,
        ),
        cost_estimate=pl.CostEstimate(flops=flops, transcendentals=0,
                                      bytes_accessed=bytes_accessed),
    )(xg, wg)

    # Single final layout fix-up: (G, N, OH, OW, C_out_g) -> NCHW.
    out = out.reshape(G, N, OH, OW, C_out_g)
    out = jnp.transpose(out, (1, 0, 4, 2, 3)).reshape(N, C_out, OH, OW)
    return out


def make_kernel_weight(key, c_out, c_in_g, kh, kw):
    """Deterministic stand-in for `self.kernel()` (OIHW weight)."""
    fan_in = c_in_g * kh * kw
    return jax.random.normal(key, (c_out, c_in_g, kh, kw), jnp.float32) / jnp.sqrt(
        jnp.float32(fan_in)
    )


# --------------------------------- demo --------------------------------------
if __name__ == "__main__":
    key = jax.random.PRNGKey(0)
    kx, kw1, kw2 = jax.random.split(key, 3)

    # GenericConv2D(kernel, conv=F.conv2d, dilation=1, padding=1, stride=1)
    N, C_in, H, W = 2, 8, 16, 16
    C_out, KH, KW = 8, 3, 3
    padding, stride, dilation = 1, 1, 1

    x = jax.random.normal(kx, (N, C_in, H, W), jnp.float32)

    def ref_conv(xv, wv, g):
        # Reference with the same bf16-in / f32-accumulate numerics as the kernel.
        return jax.lax.conv_general_dilated(
            xv.astype(jnp.bfloat16), wv.astype(jnp.bfloat16),
            window_strides=(stride, stride),
            padding=[(padding, padding), (padding, padding)],
            rhs_dilation=(dilation, dilation),
            dimension_numbers=("NCHW", "OIHW", "NCHW"),
            feature_group_count=g,
            preferred_element_type=jnp.float32,
        ).astype(jnp.float32)

    # groups = 1
    w1 = make_kernel_weight(kw1, C_out, C_in, KH, KW)
    out1 = generic_conv2d(x, w1, dilation=dilation, padding=padding,
                          stride=stride, groups=1)
    out1 = jax.block_until_ready(out1)
    ref1 = ref_conv(x, w1, 1)
    assert out1.shape == ref1.shape == (N, C_out, H, W)
    assert jnp.allclose(out1, ref1, atol=1e-2, rtol=1e-2)

    # groups = 2 (exercises the group grid axis and grouped weight layout)
    g = 2
    w2 = make_kernel_weight(kw2, C_out, C_in // g, KH, KW)
    out2 = generic_conv2d(x, w2, dilation=dilation, padding=padding,
                          stride=stride, groups=g)
    out2 = jax.block_until_ready(out2)
    ref2 = ref_conv(x, w2, g)
    assert out2.shape == ref2.shape == (N, C_out, H, W)
    assert jnp.allclose(out2, ref2, atol=1e-2, rtol=1e-2)

    print("KERNEL_OK")
</pallas_src>

<mosaic_0001>
module attributes {stable_mosaic.version = 11 : i64} {
  func.func @_conv_tap_kernel(%arg0: i32, %arg1: i32, %arg2: memref<1x18x18x8xbf16, #tpu.memory_space<vmem>>, %arg3: memref<1x9x8x8xbf16, #tpu.memory_space<vmem>>, %arg4: memref<1x16x16x8xf32, #tpu.memory_space<vmem>>, %arg5: memref<256x8xf32, #tpu.memory_space<vmem>>) attributes {dimension_semantics = [#tpu.dimension_semantics<parallel>, #tpu.dimension_semantics<parallel>], iteration_bounds = array<i64: 1, 2>, scalar_prefetch = 0 : i64, scratch_operands = 1 : i64, tpu.core_type = #tpu.core_type<tc>, window_params = [{transform_indices = @transform_0, window_bounds = array<i64: 1, 18, 18, 8>}, {transform_indices = @transform_1, window_bounds = array<i64: 1, 9, 8, 8>}, {transform_indices = @transform_2, window_bounds = array<i64: 1, 16, 16, 8>}]} {
    %cst = arith.constant 0.000000e+00 : f32
    %0 = vector.broadcast %cst : f32 to vector<256x8xf32>
    %c0 = arith.constant 0 : index
    %c0_0 = arith.constant 0 : index
    %1 = vector.load %arg5[%c0, %c0_0] : memref<256x8xf32, #tpu.memory_space<vmem>>, vector<256x8xf32>
    tpu.vector_store %arg5[%c0, %c0_0], %0 {strides = array<i32>} : memref<256x8xf32, #tpu.memory_space<vmem>>, vector<256x8xf32>,
    %c0_1 = arith.constant 0 : index
    %c0_2 = arith.constant 0 : index
    %c0_3 = arith.constant 0 : index
    %c0_4 = arith.constant 0 : index
    %2 = vector.load %arg2[%c0_1, %c0_2, %c0_3, %c0_4] : memref<1x18x18x8xbf16, #tpu.memory_space<vmem>>, vector<1x16x16x8xbf16>
    %3 = vector.shape_cast %2 : vector<1x16x16x8xbf16> to vector<16x16x8xbf16>
    %4 = vector.shape_cast %3 : vector<16x16x8xbf16> to vector<256x8xbf16>
    %c0_5 = arith.constant 0 : index
    %c0_6 = arith.constant 0 : index
    %5 = vector.load %arg5[%c0_5, %c0_6] : memref<256x8xf32, #tpu.memory_space<vmem>>, vector<256x8xf32>
    %c0_7 = arith.constant 0 : index
    %c0_8 = arith.constant 0 : index
    %c0_9 = arith.constant 0 : index
    %c0_10 = arith.constant 0 : index
    %6 = vector.load %arg3[%c0_7, %c0_8, %c0_9, %c0_10] : memref<1x9x8x8xbf16, #tpu.memory_space<vmem>>, vector<1x1x8x8xbf16>
    %7 = vector.shape_cast %6 : vector<1x1x8x8xbf16> to vector<8x8xbf16>
    %cst_11 = arith.constant dense<0.000000e+00> : vector<256x8xf32>
    %8 = tpu.matmul %4, %7, %cst_11 {dimension_numbers = #tpu.dot_dimension_numbers<[1], [0], [0], [1], [0, 0, 1, 1], [], []>} : vector<256x8xbf16>, vector<8x8xbf16>, vector<256x8xf32> -> vector<256x8xf32>
    %9 = arith.addf %5, %8 : vector<256x8xf32>
    %c0_12 = arith.constant 0 : index
    %c0_13 = arith.constant 0 : index
    %10 = vector.load %arg5[%c0_12, %c0_13] : memref<256x8xf32, #tpu.memory_space<vmem>>, vector<256x8xf32>
    tpu.vector_store %arg5[%c0_12, %c0_13], %9 {strides = array<i32>} : memref<256x8xf32, #tpu.memory_space<vmem>>, vector<256x8xf32>,
    %c0_14 = arith.constant 0 : index
    %c0_15 = arith.constant 0 : index
    %c1 = arith.constant 1 : index
    %c0_16 = arith.constant 0 : index
    %11 = vector.load %arg2[%c0_14, %c0_15, %c1, %c0_16] : memref<1x18x18x8xbf16, #tpu.memory_space<vmem>>, vector<1x16x16x8xbf16>
    %12 = vector.shape_cast %11 : vector<1x16x16x8xbf16> to vector<16x16x8xbf16>
    %13 = vector.shape_cast %12 : vector<16x16x8xbf16> to vector<256x8xbf16>
    %c0_17 = arith.constant 0 : index
    %c0_18 = arith.constant 0 : index
    %14 = vector.load %arg5[%c0_17, %c0_18] : memref<256x8xf32, #tpu.memory_space<vmem>>, vector<256x8xf32>
    %c0_19 = arith.constant 0 : index
    %c1_20 = arith.constant 1 : index
    %c0_21 = arith.constant 0 : index
    %c0_22 = arith.constant 0 : index
    %15 = vector.load %arg3[%c0_19, %c1_20, %c0_21, %c0_22] : memref<1x9x8x8xbf16, #tpu.memory_space<vmem>>, vector<1x1x8x8xbf16>
    %16 = vector.shape_cast %15 : vector<1x1x8x8xbf16> to vector<8x8xbf16>
    %cst_23 = arith.constant dense<0.000000e+00> : vector<256x8xf32>
    %17 = tpu.matmul %13, %16, %cst_23 {dimension_numbers = #tpu.dot_dimension_numbers<[1], [0], [0], [1], [0, 0, 1, 1], [], []>} : vector<256x8xbf16>, vector<8x8xbf16>, vector<256x8xf32> -> vector<256x8xf32>
    %18 = arith.addf %14, %17 : vector<256x8xf32>
    %c0_24 = arith.constant 0 : index
    %c0_25 = arith.constant 0 : index
    %19 = vector.load %arg5[%c0_24, %c0_25] : memref<256x8xf32, #tpu.memory_space<vmem>>, vector<256x8xf32>
    tpu.vector_store %arg5[%c0_24, %c0_25], %18 {strides = array<i32>} : memref<256x8xf32, #tpu.memory_space<vmem>>, vector<256x8xf32>,
    %c0_26 = arith.constant 0 : index
    %c0_27 = arith.constant 0 : index
    %c2 = arith.constant 2 : index
    %c0_28 = arith.constant 0 : index
    %20 = vector.load %arg2[%c0_26, %c0_27, %c2, %c0_28] : memref<1x18x18x8xbf16, #tpu.memory_space<vmem>>, vector<1x16x16x8xbf16>
    %21 = vector.shape_cast %20 : vector<1x16x16x8xbf16> to vector<16x16x8xbf16>
    %22 = vector.shape_cast %21 : vector<16x16x8xbf16> to vector<256x8xbf16>
    %c0_29 = arith.constant 0 : index
    %c0_30 = arith.constant 0 : index
    %23 = vector.load %arg5[%c0_29, %c0_30] : memref<256x8xf32, #tpu.memory_space<vmem>>, vector<256x8xf32>
    %c0_31 = arith.constant 0 : index
    %c2_32 = arith.constant 2 : index
    %c0_33 = arith.constant 0 : index
    %c0_34 = arith.constant 0 : index
    %24 = vector.load %arg3[%c0_31, %c2_32, %c0_33, %c0_34] : memref<1x9x8x8xbf16, #tpu.memory_space<vmem>>, vector<1x1x8x8xbf16>
    %25 = vector.shape_cast %24 : vector<1x1x8x8xbf16> to vector<8x8xbf16>
    %cst_35 = arith.constant dense<0.000000e+00> : vector<256x8xf32>
    %26 = tpu.matmul %22, %25, %cst_35 {dimension_numbers = #tpu.dot_dimension_numbers<[1], [0], [0], [1], [0, 0, 1, 1], [], []>} : vector<256x8xbf16>, vector<8x8xbf16>, vector<256x8xf32> -> vector<256x8xf32>
    %27 = arith.addf %23, %26 : vector<256x8xf32>
    %c0_36 = arith.constant 0 : index
    %c0_37 = arith.constant 0 : index
    %28 = vector.load %arg5[%c0_36, %c0_37] : memref<256x8xf32, #tpu.memory_space<vmem>>, vector<256x8xf32>
    tpu.vector_store %arg5[%c0_36, %c0_37], %27 {strides = array<i32>} : memref<256x8xf32, #tpu.memory_space<vmem>>, vector<256x8xf32>,
    %c0_38 = arith.constant 0 : index
    %c1_39 = arith.constant 1 : index
    %c0_40 = arith.constant 0 : index
    %c0_41 = arith.constant 0 : index
    %29 = vector.load %arg2[%c0_38, %c1_39, %c0_40, %c0_41] : memref<1x18x18x8xbf16, #tpu.memory_space<vmem>>, vector<1x16x16x8xbf16>
    %30 = vector.shape_cast %29 : vector<1x16x16x8xbf16> to vector<16x16x8xbf16>
    %31 = vector.shape_cast %30 : vector<16x16x8xbf16> to vector<256x8xbf16>
    %c0_42 = arith.constant 0 : index
    %c0_43 = arith.constant 0 : index
    %32 = vector.load %arg5[%c0_42, %c0_43] : memref<256x8xf32, #tpu.memory_space<vmem>>, vector<256x8xf32>
    %c0_44 = arith.constant 0 : index
    %c3 = arith.constant 3 : index
    %c0_45 = arith.constant 0 : index
    %c0_46 = arith.constant 0 : index
    %33 = vector.load %arg3[%c0_44, %c3, %c0_45, %c0_46] : memref<1x9x8x8xbf16, #tpu.memory_space<vmem>>, vector<1x1x8x8xbf16>
    %34 = vector.shape_cast %33 : vector<1x1x8x8xbf16> to vector<8x8xbf16>
    %cst_47 = arith.constant dense<0.000000e+00> : vector<256x8xf32>
    %35 = tpu.matmul %31, %34, %cst_47 {dimension_numbers = #tpu.dot_dimension_numbers<[1], [0], [0], [1], [0, 0, 1, 1], [], []>} : vector<256x8xbf16>, vector<8x8xbf16>, vector<256x8xf32> -> vector<256x8xf32>
    %36 = arith.addf %32, %35 : vector<256x8xf32>
    %c0_48 = arith.constant 0 : index
    %c0_49 = arith.constant 0 : index
    %37 = vector.load %arg5[%c0_48, %c0_49] : memref<256x8xf32, #tpu.memory_space<vmem>>, vector<256x8xf32>
    tpu.vector_store %arg5[%c0_48, %c0_49], %36 {strides = array<i32>} : memref<256x8xf32, #tpu.memory_space<vmem>>, vector<256x8xf32>,
    %c0_50 = arith.constant 0 : index
    %c1_51 = arith.constant 1 : index
    %c1_52 = arith.constant 1 : index
    %c0_53 = arith.constant 0 : index
    %38 = vector.load %arg2[%c0_50, %c1_51, %c1_52, %c0_53] : memref<1x18x18x8xbf16, #tpu.memory_space<vmem>>, vector<1x16x16x8xbf16>
    %39 = vector.shape_cast %38 : vector<1x16x16x8xbf16> to vector<16x16x8xbf16>
    %40 = vector.shape_cast %39 : vector<16x16x8xbf16> to vector<256x8xbf16>
    %c0_54 = arith.constant 0 : index
    %c0_55 = arith.constant 0 : index
    %41 = vector.load %arg5[%c0_54, %c0_55] : memref<256x8xf32, #tpu.memory_space<vmem>>, vector<256x8xf32>
    %c0_56 = arith.constant 0 : index
    %c4 = arith.constant 4 : index
    %c0_57 = arith.constant 0 : index
    %c0_58 = arith.constant 0 : index
    %42 = vector.load %arg3[%c0_56, %c4, %c0_57, %c0_58] : memref<1x9x8x8xbf16, #tpu.memory_space<vmem>>, vector<1x1x8x8xbf16>
    %43 = vector.shape_cast %42 : vector<1x1x8x8xbf16> to vector<8x8xbf16>
    %cst_59 = arith.constant dense<0.000000e+00> : vector<256x8xf32>
    %44 = tpu.matmul %40, %43, %cst_59 {dimension_numbers = #tpu.dot_dimension_numbers<[1], [0], [0], [1], [0, 0, 1, 1], [], []>} : vector<256x8xbf16>, vector<8x8xbf16>, vector<256x8xf32> -> vector<256x8xf32>
    %45 = arith.addf %41, %44 : vector<256x8xf32>
    %c0_60 = arith.constant 0 : index
    %c0_61 = arith.constant 0 : index
    %46 = vector.load %arg5[%c0_60, %c0_61] : memref<256x8xf32, #tpu.memory_space<vmem>>, vector<256x8xf32>
    tpu.vector_store %arg5[%c0_60, %c0_61], %45 {strides = array<i32>} : memref<256x8xf32, #tpu.memory_space<vmem>>, vector<256x8xf32>,
    %c0_62 = arith.constant 0 : index
    %c1_63 = arith.constant 1 : index
    %c2_64 = arith.constant 2 : index
    %c0_65 = arith.constant 0 : index
    %47 = vector.load %arg2[%c0_62, %c1_63, %c2_64, %c0_65] : memref<1x18x18x8xbf16, #tpu.memory_space<vmem>>, vector<1x16x16x8xbf16>
    %48 = vector.shape_cast %47 : vector<1x16x16x8xbf16> to vector<16x16x8xbf16>
    %49 = vector.shape_cast %48 : vector<16x16x8xbf16> to vector<256x8xbf16>
    %c0_66 = arith.constant 0 : index
    %c0_67 = arith.constant 0 : index
    %50 = vector.load %arg5[%c0_66, %c0_67] : memref<256x8xf32, #tpu.memory_space<vmem>>, vector<256x8xf32>
    %c0_68 = arith.constant 0 : index
    %c5 = arith.constant 5 : index
    %c0_69 = arith.constant 0 : index
    %c0_70 = arith.constant 0 : index
    %51 = vector.load %arg3[%c0_68, %c5, %c0_69, %c0_70] : memref<1x9x8x8xbf16, #tpu.memory_space<vmem>>, vector<1x1x8x8xbf16>
    %52 = vector.shape_cast %51 : vector<1x1x8x8xbf16> to vector<8x8xbf16>
    %cst_71 = arith.constant dense<0.000000e+00> : vector<256x8xf32>
    %53 = tpu.matmul %49, %52, %cst_71 {dimension_numbers = #tpu.dot_dimension_numbers<[1], [0], [0], [1], [0, 0, 1, 1], [], []>} : vector<256x8xbf16>, vector<8x8xbf16>, vector<256x8xf32> -> vector<256x8xf32>
    %54 = arith.addf %50, %53 : vector<256x8xf32>
    %c0_72 = arith.constant 0 : index
    %c0_73 = arith.constant 0 : index
    %55 = vector.load %arg5[%c0_72, %c0_73] : memref<256x8xf32, #tpu.memory_space<vmem>>, vector<256x8xf32>
    tpu.vector_store %arg5[%c0_72, %c0_73], %54 {strides = array<i32>} : memref<256x8xf32, #tpu.memory_space<vmem>>, vector<256x8xf32>,
    %c0_74 = arith.constant 0 : index
    %c2_75 = arith.constant 2 : index
    %c0_76 = arith.constant 0 : index
    %c0_77 = arith.constant 0 : index
    %56 = vector.load %arg2[%c0_74, %c2_75, %c0_76, %c0_77] : memref<1x18x18x8xbf16, #tpu.memory_space<vmem>>, vector<1x16x16x8xbf16>
    %57 = vector.shape_cast %56 : vector<1x16x16x8xbf16> to vector<16x16x8xbf16>
    %58 = vector.shape_cast %57 : vector<16x16x8xbf16> to vector<256x8xbf16>
    %c0_78 = arith.constant 0 : index
    %c0_79 = arith.constant 0 : index
    %59 = vector.load %arg5[%c0_78, %c0_79] : memref<256x8xf32, #tpu.memory_space<vmem>>, vector<256x8xf32>
    %c0_80 = arith.constant 0 : index
    %c6 = arith.constant 6 : index
    %c0_81 = arith.constant 0 : index
    %c0_82 = arith.constant 0 : index
    %60 = vector.load %arg3[%c0_80, %c6, %c0_81, %c0_82] : memref<1x9x8x8xbf16, #tpu.memory_space<vmem>>, vector<1x1x8x8xbf16>
    %61 = vector.shape_cast %60 : vector<1x1x8x8xbf16> to vector<8x8xbf16>
    %cst_83 = arith.constant dense<0.000000e+00> : vector<256x8xf32>
    %62 = tpu.matmul %58, %61, %cst_83 {dimension_numbers = #tpu.dot_dimension_numbers<[1], [0], [0], [1], [0, 0, 1, 1], [], []>} : vector<256x8xbf16>, vector<8x8xbf16>, vector<256x8xf32> -> vector<256x8xf32>
    %63 = arith.addf %59, %62 : vector<256x8xf32>
    %c0_84 = arith.constant 0 : index
    %c0_85 = arith.constant 0 : index
    %64 = vector.load %arg5[%c0_84, %c0_85] : memref<256x8xf32, #tpu.memory_space<vmem>>, vector<256x8xf32>
    tpu.vector_store %arg5[%c0_84, %c0_85], %63 {strides = array<i32>} : memref<256x8xf32, #tpu.memory_space<vmem>>, vector<256x8xf32>,
    %c0_86 = arith.constant 0 : index
    %c2_87 = arith.constant 2 : index
    %c1_88 = arith.constant 1 : index
    %c0_89 = arith.constant 0 : index
    %65 = vector.load %arg2[%c0_86, %c2_87, %c1_88, %c0_89] : memref<1x18x18x8xbf16, #tpu.memory_space<vmem>>, vector<1x16x16x8xbf16>
    %66 = vector.shape_cast %65 : vector<1x16x16x8xbf16> to vector<16x16x8xbf16>
    %67 = vector.shape_cast %66 : vector<16x16x8xbf16> to vector<256x8xbf16>
    %c0_90 = arith.constant 0 : index
    %c0_91 = arith.constant 0 : index
    %68 = vector.load %arg5[%c0_90, %c0_91] : memref<256x8xf32, #tpu.memory_space<vmem>>, vector<256x8xf32>
    %c0_92 = arith.constant 0 : index
    %c7 = arith.constant 7 : index
    %c0_93 = arith.constant 0 : index
    %c0_94 = arith.constant 0 : index
    %69 = vector.load %arg3[%c0_92, %c7, %c0_93, %c0_94] : memref<1x9x8x8xbf16, #tpu.memory_space<vmem>>, vector<1x1x8x8xbf16>
    %70 = vector.shape_cast %69 : vector<1x1x8x8xbf16> to vector<8x8xbf16>
    %cst_95 = arith.constant dense<0.000000e+00> : vector<256x8xf32>
    %71 = tpu.matmul %67, %70, %cst_95 {dimension_numbers = #tpu.dot_dimension_numbers<[1], [0], [0], [1], [0, 0, 1, 1], [], []>} : vector<256x8xbf16>, vector<8x8xbf16>, vector<256x8xf32> -> vector<256x8xf32>
    %72 = arith.addf %68, %71 : vector<256x8xf32>
    %c0_96 = arith.constant 0 : index
    %c0_97 = arith.constant 0 : index
    %73 = vector.load %arg5[%c0_96, %c0_97] : memref<256x8xf32, #tpu.memory_space<vmem>>, vector<256x8xf32>
    tpu.vector_store %arg5[%c0_96, %c0_97], %72 {strides = array<i32>} : memref<256x8xf32, #tpu.memory_space<vmem>>, vector<256x8xf32>,
    %c0_98 = arith.constant 0 : index
    %c2_99 = arith.constant 2 : index
    %c2_100 = arith.constant 2 : index
    %c0_101 = arith.constant 0 : index
    %74 = vector.load %arg2[%c0_98, %c2_99, %c2_100, %c0_101] : memref<1x18x18x8xbf16, #tpu.memory_space<vmem>>, vector<1x16x16x8xbf16>
    %75 = vector.shape_cast %74 : vector<1x16x16x8xbf16> to vector<16x16x8xbf16>
    %76 = vector.shape_cast %75 : vector<16x16x8xbf16> to vector<256x8xbf16>
    %c0_102 = arith.constant 0 : index
    %c0_103 = arith.constant 0 : index
    %77 = vector.load %arg5[%c0_102, %c0_103] : memref<256x8xf32, #tpu.memory_space<vmem>>, vector<256x8xf32>
    %c0_104 = arith.constant 0 : index
    %c8 = arith.constant 8 : index
    %c0_105 = arith.constant 0 : index
    %c0_106 = arith.constant 0 : index
    %78 = vector.load %arg3[%c0_104, %c8, %c0_105, %c0_106] : memref<1x9x8x8xbf16, #tpu.memory_space<vmem>>, vector<1x1x8x8xbf16>
    %79 = vector.shape_cast %78 : vector<1x1x8x8xbf16> to vector<8x8xbf16>
    %cst_107 = arith.constant dense<0.000000e+00> : vector<256x8xf32>
    %80 = tpu.matmul %76, %79, %cst_107 {dimension_numbers = #tpu.dot_dimension_numbers<[1], [0], [0], [1], [0, 0, 1, 1], [], []>} : vector<256x8xbf16>, vector<8x8xbf16>, vector<256x8xf32> -> vector<256x8xf32>
    %81 = arith.addf %77, %80 : vector<256x8xf32>
    %c0_108 = arith.constant 0 : index
    %c0_109 = arith.constant 0 : index
    %82 = vector.load %arg5[%c0_108, %c0_109] : memref<256x8xf32, #tpu.memory_space<vmem>>, vector<256x8xf32>
    tpu.vector_store %arg5[%c0_108, %c0_109], %81 {strides = array<i32>} : memref<256x8xf32, #tpu.memory_space<vmem>>, vector<256x8xf32>,
    %c0_110 = arith.constant 0 : index
    %c0_111 = arith.constant 0 : index
    %83 = vector.load %arg5[%c0_110, %c0_111] : memref<256x8xf32, #tpu.memory_space<vmem>>, vector<256x8xf32>
    %84 = vector.shape_cast %83 : vector<256x8xf32> to vector<16x16x8xf32>
    %c0_112 = arith.constant 0 : index
    %c0_113 = arith.constant 0 : index
    %c0_114 = arith.constant 0 : index
    %c0_115 = arith.constant 0 : index
    %85 = vector.load %arg4[%c0_112, %c0_113, %c0_114, %c0_115] : memref<1x16x16x8xf32, #tpu.memory_space<vmem>>, vector<1x16x16x8xf32>
    %86 = vector.shape_cast %85 : vector<1x16x16x8xf32> to vector<16x16x8xf32>
    %87 = vector.shape_cast %84 : vector<16x16x8xf32> to vector<1x16x16x8xf32>
    tpu.vector_store %arg4[%c0_112, %c0_113, %c0_114, %c0_115], %87 {strides = array<i32>} : memref<1x16x16x8xf32, #tpu.memory_space<vmem>>, vector<1x16x16x8xf32>,
    return
  }
  func.func @transform_0(%arg0: i32, %arg1: i32) -> (i32, i32, i32, i32) {
    %c2_i32 = arith.constant 2 : i32
    %0 = arith.muli %arg0, %c2_i32 : i32
    %1 = arith.addi %0, %arg1 : i32
    %c0_i32 = arith.constant 0 : i32
    %c0_i32_0 = arith.constant 0 : i32
    %c0_i32_1 = arith.constant 0 : i32
    %c0_i32_2 = arith.constant 0 : i32
    return %1, %c0_i32, %c0_i32_0, %c0_i32_1 : i32, i32, i32, i32
  }
  func.func @transform_1(%arg0: i32, %arg1: i32) -> (i32, i32, i32, i32) {
    %c0_i32 = arith.constant 0 : i32
    %c0_i32_0 = arith.constant 0 : i32
    %c0_i32_1 = arith.constant 0 : i32
    %c0_i32_2 = arith.constant 0 : i32
    return %arg0, %c0_i32, %c0_i32_0, %c0_i32_1 : i32, i32, i32, i32
  }
  func.func @transform_2(%arg0: i32, %arg1: i32) -> (i32, i32, i32, i32) {
    %c2_i32 = arith.constant 2 : i32
    %0 = arith.muli %arg0, %c2_i32 : i32
    %1 = arith.addi %0, %arg1 : i32
    %c0_i32 = arith.constant 0 : i32
    %c0_i32_0 = arith.constant 0 : i32
    %c0_i32_1 = arith.constant 0 : i32
    %c0_i32_2 = arith.constant 0 : i32
    return %1, %c0_i32, %c0_i32_0, %c0_i32_1 : i32, i32, i32, i32
  }
}

</mosaic_0001>

<bundles_post_ra>
// kernel: tpu_custom_call.1
= control target key start
LH: loop header
LB: loop body
LE: loop exit
PB: predicated region body
PF: predicated region fallthrough
CT: control target
= control target key end

     0   :  { %s6922_s9 = smov 0   ;;  %s6924_s10 = smov 0   ;;  %s8676_s0 = inlined_call_operand.vmem [shape: bf16[2,18,18,8], index: 0, kind: input, shape index: {}]   ;;  %s8677_s1 = inlined_call_operand.vmem [shape: bf16[1,9,8,8], index: 1, kind: input, shape index: {}]   ;;  %s8678_s2 = inlined_call_operand.vmem [shape: f32[2,16,16,8], index: 2, kind: output, shape index: {}]  }
   0x1   :  { %s6926_s11 = smov 0  }
   0x2 LB: > { %s21_s12 = sadd.s32 1, %s6900_s10  ;;  %p5730_p0 = scmp.ge.s32.totalorder %s6904_s11, 1  ;;  %s6904_s11 = sphi %s6926_s11, %s12_s11   ;;  %s6900_s10 = sphi %s6924_s10, %s8684_s10   ;;  %s6896_s9 = sphi %s6922_s9, %s8683_s9  }
   0x3   : > { %p22_p1 = scmp.ge.s32.totalorder %s21_s12, 2  ;;  %p146_p2 = scmp.lt.s32.totalorder %s6904_s11, 3 }
   0x5   : > { %s8686_s12 = smov (%p22_p1, %s21_s12), 0  ;;  %p147_p3 = pnand %p5730_p0, %p146_p2 }
   0x6   : > { %v298_v0 = vld [vmem:[%s8677_s1] sm:$0xf] (!%p147_p3)  ;;  %vm427_vm0 = vcmask (!%p147_p3), 1043456   ;;  %p179_p4 = scmp.lt.s32.totalorder (!%p147_p3), %s6896_s9, 1  ;;  %v5766_v2 = vld [vmem:[%s8677_s1 + $0x4] sm:$0xf] (!%p147_p3) }
   0x7   : > { %150 = sbr.rel (%p147_p3) target bundleno = 579 (0x243), region = 28  ;;  %6799 = vmatprep.subr.msk.bf16.mxu1 (!%p147_p3), %vm427_vm0, %v298_v0  ;;  %v429_v1 = vsel (!%p147_p3), %vm427_vm0, %v298_v0, 0  ;;  %6798 = vmatprep.subr.msk.bf16.mxu0 (!%p147_p3), %vm427_vm0, %v298_v0  ;;  %v5815_v3 = vld [vmem:[%s8677_s1 + $0x8] sm:$0xf] (!%p147_p3)  ;;  %vm201_vm1 = vcmask (!%p147_p3), 64512   ;;  %v1222_v7 = vsel (!%p147_p3), %vm427_vm0, %v5766_v2, 0 }
   0x8   : > { %6797 = vmatpush3.bf16.msra.mxu1 (!%p147_p3), %v429_v1  ;;  %6491 = vmatpush3.bf16.msra.mxu0 (!%p147_p3), %v429_v1  ;;  %v5880_v5 = vld [vmem:[%s8677_s1 + $0xc] sm:$0xf] (!%p147_p3)  ;;  %v5961_v9 = vld [vmem:[%s8677_s1 + $0x10] sm:$0xf] (!%p147_p3)  ;;  %v1791_v11 = vsel (!%p147_p3), %vm427_vm0, %v5815_v3, 0  ;;  %vm1545_vm2 = vcmask (!%p147_p3), 1042432  }
   0x9   : > { %6800 = vmatprep.subr.msk.bf16.mxu1 (!%p147_p3), %vm427_vm0, %v5766_v2  ;;  %6801 = vmatprep.subr.msk.bf16.mxu0 (!%p147_p3), %vm427_vm0, %v5815_v3  ;;  %vm704_vm3 = vsmask.f32 (!%p147_p3), 3328  ;;  %vm705_vm4 = vsmask.f32 (!%p147_p3), 7440  ;;  %v6993_v18 = vld [vmem:[%s8677_s1 + $0x14] sm:$0xf] (!%p147_p3) }
   0xa   : > { %v6997_v19 = vsel (!%p147_p3), %vm427_vm0, %v5880_v5, 0  ;;  %vm1546_vm5 = vcmask (!%p147_p3), 1046532   ;;  %v7002_v21 = vsel (!%p147_p3), %vm427_vm0, %v5961_v9, 0  ;;  %v7008_v24 = vsel (!%p147_p3), %vm427_vm0, %v6993_v18, 0  ;;  %vm7032_vm7 = vmor (!%p147_p3), %vm704_vm3, %vm705_vm4 }
   0xb   : > { %vm7025_vm6 = vmor (!%p147_p3), %vm1545_vm2, %vm1546_vm5 }
   0xe   : > { %s8688_s9 = smov (!%p179_p4, %s6896_s9), 1 }
   0xf   : > { %s6808_s19 = smul.u32 216, %s8688_s9  ;;  %s6336_s7 = sshll.u32 %s8688_s9, 8 }
  0x10   : > { %s8549_s14 = scalar_lea.vmem %s8678_s2, %s6336_s7 }
  0x11   : > { %s6960_s22 = scalar_lea.vmem %s8676_s0, %s6808_s19 }
  0x12   : > { %v6834_v4 = vld [vmem:[%s6960_s22 + $0x60] sm:$0xff]   ;;  %v6835_v6 = vld [vmem:[%s6960_s22 + $0x6c] sm:$0xff]   ;;  %v6838_v12 = vld [vmem:[%s6960_s22 + $0x78] sm:$0xff]  }
  0x13   : > { %6508 = vmatprep.mubr.msk.bf16.mxu1 %vm201_vm1, %v6834_v4  ;;  %v6836_v8 = vld [vmem:[%s6960_s22] sm:$0xff]   ;;  %v6837_v10 = vld [vmem:[%s6960_s22 + $0xc] sm:$0xff]   ;;  %v6840_v13 = vld [vmem:[%s6960_s22 + $0x18] sm:$0xff]  }
  0x14   : > { %6509 = vmatmul.mubr.msk.bf16.vlgmr.msra.gmra.mrb[0].mxu1 %vm201_vm1, %v6835_v6  ;;  %6492 = vmatprep.mubr.msk.bf16.mxu0 %vm201_vm1, %v6836_v8  ;;  %v6839_v14 = vld [vmem:[%s6960_s22 + $0x84] sm:$0xff]   ;;  %v6842_v15 = vld [vmem:[%s6960_s22 + $0x90] sm:$0xff]   ;;  %v6843_v20 = vld [vmem:[%s6960_s22 + $0x9c] sm:$0xff]  }
  0x15   : > { %6525 = vmatpush3.bf16.msra.mxu1 %v1222_v7  ;;  %6493 = vmatmul.mubr.msk.bf16.vlgmr.msra.gmra.mrb[0].mxu0 %vm201_vm1, %v6837_v10  ;;  %v6841_v16 = vld [vmem:[%s6960_s22 + $0x24] sm:$0xff]   ;;  %v6844_v17 = vld [vmem:[%s6960_s22 + $0x30] sm:$0xff]   ;;  %v6845_v22 = vld [vmem:[%s6960_s22 + $0x3c] sm:$0xff]  }
  0x16   : > { %6802 = vmatprep.subr.msk.bf16.mxu1 %vm427_vm0, %v5880_v5  ;;  %6512 = vmatprep.mubr.msk.bf16.mxu1 %vm201_vm1, %v6838_v12  ;;  %v6846_v23 = vld [vmem:[%s6960_s22 + $0xa8] sm:$0xff]   ;;  %v656_v26 = vld [vmem:[%s6960_s22] sm:$0xf]  ;;  %v657_v27 = vld [vmem:[%s6960_s22 + $0x4] sm:$0xf] }
  0x17   : > { %6559 = vmatpush3.bf16.msra.mxu0 %v1791_v11  ;;  %6496 = vmatprep.mubr.msk.bf16.mxu0 %vm201_vm1, %v6840_v13  ;;  %v6848_v25 = vld [vmem:[%s6960_s22 + $0x48] sm:$0xff]   ;;  %v708_v29 = vshrl.u32 %v656_v26, 16  ;;  %v711_v30 = vshll.u32 %v656_v26, 16  ;;  %v717_v31 = vshll.u32 %v657_v27, 16  ;;  %v721_v32 = vshrl.u32 %v657_v27, 16  ;;  %v6847_v60 = vld [vmem:[%s6960_s22 + $0xb4] sm:$0xff]  }
  0x18   : > { %6803 = vmatprep.subr.msk.bf16.mxu0 %vm427_vm0, %v5961_v9  ;;  %v658_v28 = vld [vmem:[%s6960_s22 + $0x8] sm:$0x1]  ;;  %v659_v33 = vld [vmem:[%s6960_s22 + $0xc] sm:$0xf]  ;;  %v660_v35 = vld [vmem:[%s6960_s22 + $0x10] sm:$0xf] }
  0x19   : > { %v727_v34 = vshll.u32 %v658_v28, 16  ;;  %v661_v36 = vld [vmem:[%s6960_s22 + $0x14] sm:$0x1]  ;;  %v732_v37 = vshrl.u32 %v659_v33, 16  ;;  %v710_v38 = vrot.slane %v708_v29, 4  ;;  %v713_v39 = vrot.slane %v711_v30, 5 }
  0x1a   : > { %v719_v40 = vrot.slane %v717_v31, 5  ;;  %v723_v41 = vrot.slane %v721_v32, 4  ;;  %v1449_v42 = vld [vmem:[%s6960_s22] sm:$0xe]  ;;  %v735_v45 = vshll.u32 %v659_v33, 16  ;;  %v741_v46 = vshll.u32 %v660_v35, 16 }
  0x1b   : > { %v729_v43 = vrot.slane %v727_v34, 5  ;;  %v734_v44 = vrot.slane %v732_v37, 4  ;;  %v1450_v47 = vld [vmem:[%s6960_s22 + $0x4] sm:$0xf]  ;;  %v714_v48 = vor.u32 %v713_v39, %v710_v38  ;;  %v745_v50 = vshrl.u32 %v660_v35, 16  ;;  %v6849_v6 = vld [vmem:[%s6960_s22 + $0x54] sm:$0xff]  }
  0x1c   : > { %6513 = vmatmul.mubr.msk.bf16.gmra.mrb[4].mxu1 %vm201_vm1, %v6839_v14  ;;  %v724_v49 = vor.u32 %v723_v41, %v719_v40  ;;  %v751_v51 = vshll.u32 %v661_v36, 16  ;;  %v1451_v52 = vld [vmem:[%s6960_s22 + $0x8] sm:$0x1]  ;;  %v737_v55 = vrot.slane %v735_v45, 5  ;;  %v743_v56 = vrot.slane %v741_v46, 5 }
  0x1d   : > { %6516 = vmatprep.mubr.msk.bf16.mxu1 %vm201_vm1, %v6842_v15  ;;  %6497 = vmatmul.mubr.msk.bf16.gmra.mrb[4].mxu0 %vm201_vm1, %v6841_v16  ;;  %v5799_v57 = vrot.slane %v1449_v42, 9  ;;  %v1550_v58 = vrot.slane %v1450_v47, 5  ;;  %v662_v59 = vld [vmem:[%s6960_s22 + $0x18] sm:$0xf]  ;;  %v715_v61 = vrot.slane %v714_v48, 4  ;;  %v747_v63 = vrot.slane %v745_v50, 4 }
  0x1e   : > { %6500 = vmatprep.mubr.msk.bf16.mxu0 %vm201_vm1, %v6844_v17  ;;  %v725_v62 = vrot.slane %v724_v49, 4  ;;  %v753_v0 = vrot.slane %v751_v51, 5  ;;  %v738_v1 = vor.u32 %v737_v55, %v734_v44  ;;  %v1553_v4 = vrot.slane %v1451_v52, 5  ;;  %v663_v5 = vld [vmem:[%s6960_s22 + $0x1c] sm:$0xf] }
  0x1f   : > { %v1551_v2 = vsel %vm7025_vm6, %v5799_v57, %v1550_v58  ;;  %v1552_v3 = vrot.slane %v1550_v58, 4  ;;  %v720_v7 = vsel %vm7032_vm7, %v715_v61, %v719_v40  ;;  %v748_v9 = vor.u32 %v747_v63, %v743_v56  ;;  %v664_v10 = vld [vmem:[%s6960_s22 + $0x20] sm:$0x1]  ;;  %v1452_v16 = vld [vmem:[%s6960_s22 + $0xc] sm:$0xe] }
  0x20   : > { %v730_v8 = vsel %vm7032_vm7, %v725_v62, %v729_v43  ;;  %v756_v11 = vshrl.u32 %v662_v59, 16  ;;  %v739_v13 = vrot.slane %v738_v1, 4  ;;  %v759_v15 = vshll.u32 %v662_v59, 16  ;;  %v1453_v17 = vld [vmem:[%s6960_s22 + $0x10] sm:$0xf] }
  0x21   : > { %v5767_v12 = vcombine.low %v720_v7, %v730_v8  ;;  %v1554_v14 = vsel %vm7025_vm6, %v1552_v3, %v1553_v4  ;;  %v1454_v26 = vld [vmem:[%s6960_s22 + $0x14] sm:$0x1]  ;;  %v769_v29 = vshrl.u32 %v663_v5, 16  ;;  %v775_v30 = vshll.u32 %v664_v10, 16  ;;  %v665_v31 = vld [vmem:[%s6960_s22 + $0x24] sm:$0xf] }
  0x22   : > { %v744_v27 = vsel %vm7032_vm7, %v739_v13, %v743_v56  ;;  %v761_v28 = vrot.slane %v759_v15, 5  ;;  %v5800_v34 = vrot.slane %v1452_v16, 9  ;;  %v1557_v35 = vrot.slane %v1453_v17, 5  ;;  %v666_v36 = vld [vmem:[%s6960_s22 + $0x28] sm:$0xf] }
  0x23   : > { %v771_v39 = vrot.slane %v769_v29, 4  ;;  %v777_v40 = vrot.slane %v775_v30, 5  ;;  %v667_v41 = vld [vmem:[%s6960_s22 + $0x2c] sm:$0x1]  ;;  %v1560_v44 = vrot.slane %v1454_v26, 5  ;;  %v780_v45 = vshrl.u32 %v665_v31, 16 }
  0x24   : > { %6517 = vmatmul.mubr.msk.bf16.gmra.mrb[8].mxu1 %vm201_vm1, %v6843_v20  ;;  %v749_v20 = vrot.slane %v748_v9, 4  ;;  %v1558_v42 = vsel %vm7025_vm6, %v5800_v34, %v1557_v35  ;;  %v1559_v43 = vrot.slane %v1557_v35, 4  ;;  %v1455_v46 = vld [vmem:[%s6960_s22 + $0x18] sm:$0xe]  ;;  %v783_v49 = vshll.u32 %v665_v31, 16 }
  0x25   : > { %6520 = vmatprep.mubr.msk.bf16.mxu1 %vm201_vm1, %v6846_v23  ;;  %6501 = vmatmul.mubr.msk.bf16.gmra.mrb[8].mxu0 %vm201_vm1, %v6845_v22  ;;  %v5816_v22 = vcombine.low %v1551_v2, %v1554_v14  ;;  %v758_v23 = vrot.slane %v756_v11, 4  ;;  %v789_v50 = vshll.u32 %v666_v36, 16  ;;  %v1456_v51 = vld [vmem:[%s6960_s22 + $0x1c] sm:$0xf]  ;;  %v782_v55 = vrot.slane %v780_v45, 4 }
  0x26   : > { %6504 = vmatprep.mubr.msk.bf16.mxu0 %vm201_vm1, %v6848_v25  ;;  %v765_v25 = vshll.u32 %v663_v5, 16  ;;  %v754_v32 = vsel %vm7032_vm7, %v749_v20, %v753_v0  ;;  %v1561_v52 = vsel %vm7025_vm6, %v1559_v43, %v1560_v44  ;;  %v793_v56 = vshrl.u32 %v666_v36, 16  ;;  %v1457_v58 = vld [vmem:[%s6960_s22 + $0x20] sm:$0x1]  ;;  %v668_v63 = vld [vmem:[%s6960_s22 + $0x30] sm:$0xf] }
  0x27   : > { %v5768_v37 = vcombine.low %v744_v27, %v754_v32  ;;  %v762_v38 = vor.u32 %v761_v28, %v758_v23  ;;  %v799_v57 = vshll.u32 %v667_v41, 16  ;;  %v5817_v61 = vcombine.low %v1558_v42, %v1561_v52  ;;  %v669_v4 = vld [vmem:[%s6960_s22 + $0x34] sm:$0xf]  ;;  %v670_v11 = vld [vmem:[%s6960_s22 + $0x38] sm:$0x1] }
  0x28   : > { %v767_v33 = vrot.slane %v765_v25, 5  ;;  %v785_v62 = vrot.slane %v783_v49, 5  ;;  %v791_v0 = vrot.slane %v789_v50, 5  ;;  %v795_v1 = vrot.slane %v793_v56, 4  ;;  %v1458_v17 = vld [vmem:[%s6960_s22 + $0x24] sm:$0xe] }
  0x29   : > { %v763_v47 = vrot.slane %v762_v38, 4  ;;  %v801_v2 = vrot.slane %v799_v57, 5  ;;  %v5801_v3 = vrot.slane %v1455_v46, 9  ;;  %v1564_v7 = vrot.slane %v1456_v51, 5  ;;  %v1459_v26 = vld [vmem:[%s6960_s22 + $0x28] sm:$0xf] }
  0x2a   : > { %v772_v48 = vor.u32 %v771_v39, %v767_v33  ;;  %v1567_v8 = vrot.slane %v1457_v58, 5  ;;  %v796_v10 = vor.u32 %v795_v1, %v791_v0  ;;  %v807_v13 = vshll.u32 %v668_v63, 16  ;;  %v1460_v29 = vld [vmem:[%s6960_s22 + $0x2c] sm:$0x1]  ;;  %v671_v30 = vld [vmem:[%s6960_s22 + $0x3c] sm:$0xf] }
  0x2b   : > { %v768_v59 = vsel %vm7032_vm7, %v763_v47, %v767_v33  ;;  %v1566_v15 = vrot.slane %v1564_v7, 4  ;;  %v813_v16 = vshll.u32 %v669_v4, 16  ;;  %v817_v25 = vshrl.u32 %v669_v4, 16  ;;  %v672_v35 = vld [vmem:[%s6960_s22 + $0x40] sm:$0xf] }
  0x2c   : > { %6521 = vmatmul.mubr.msk.bf16.gmra.mrb[12].mxu1 %vm201_vm1, %v6847_v60  ;;  %v773_v60 = vrot.slane %v772_v48, 4  ;;  %v797_v20 = vrot.slane %v796_v10, 4  ;;  %v809_v23 = vrot.slane %v807_v13, 5  ;;  %v823_v28 = vshll.u32 %v670_v11, 16  ;;  %v1461_v45 = vld [vmem:[%s6960_s22 + $0x30] sm:$0xe] }
  0x2d   : > { %6526 = vmatprep.mubr.msk.bf16.mxu1 %vm201_vm1, %v5767_v12  ;;  %6505 = vmatmul.mubr.msk.bf16.gmra.mrb[12].mxu0 %vm201_vm1, %v6849_v6  ;;  %v786_v6 = vor.u32 %v785_v62, %v782_v55  ;;  %v804_v12 = vshrl.u32 %v668_v63, 16  ;;  %v815_v27 = vrot.slane %v813_v16, 5  ;;  %v819_v34 = vrot.slane %v817_v25, 4  ;;  %v1462_v50 = vld [vmem:[%s6960_s22 + $0x34] sm:$0xf] }
  0x2e   : > { %6560 = vmatprep.mubr.msk.bf16.mxu0 %vm201_vm1, %v5816_v22  ;;  %v778_v5 = vsel %vm7032_vm7, %v773_v60, %v777_v40  ;;  %v802_v31 = vsel %vm7032_vm7, %v797_v20, %v801_v2  ;;  %v5802_v38 = vrot.slane %v1458_v17, 9  ;;  %v1571_v39 = vrot.slane %v1459_v26, 5  ;;  %v673_v40 = vld [vmem:[%s6960_s22 + $0x44] sm:$0x1]  ;;  %v1463_v57 = vld [vmem:[%s6960_s22 + $0x38] sm:$0x1] }
  0x2f   : > { %v5769_v9 = vcombine.low %v768_v59, %v778_v5  ;;  %v787_v14 = vrot.slane %v786_v6, 4  ;;  %v806_v22 = vrot.slane %v804_v12, 4  ;;  %v820_v42 = vor.u32 %v819_v34, %v815_v27  ;;  %v674_v62 = vld [vmem:[%s6960_s22 + $0x48] sm:$0xf]  ;;  %v676_v10 = vld [vmem:[%s6960_s22 + $0x50] sm:$0x1] }
  0x30   : > { %v1574_v43 = vrot.slane %v1460_v29, 5  ;;  %v828_v44 = vshrl.u32 %v671_v30, 16  ;;  %v1572_v46 = vsel %vm7025_vm6, %v5802_v38, %v1571_v39  ;;  %v1573_v47 = vrot.slane %v1571_v39, 4  ;;  %v1464_v16 = vld [vmem:[%s6960_s22 + $0x3c] sm:$0xe] }
  0x31   : > { %v810_v33 = vor.u32 %v809_v23, %v806_v22  ;;  %v831_v48 = vshll.u32 %v671_v30, 16  ;;  %v837_v49 = vshll.u32 %v672_v35, 16  ;;  %v821_v52 = vrot.slane %v820_v42, 4  ;;  %v1465_v25 = vld [vmem:[%s6960_s22 + $0x40] sm:$0xf] }
  0x32   : > { %v830_v55 = vrot.slane %v828_v44, 4  ;;  %v841_v56 = vshrl.u32 %v672_v35, 16  ;;  %v1575_v58 = vsel %vm7025_vm6, %v1573_v47, %v1574_v43  ;;  %v5803_v2 = vrot.slane %v1461_v45, 9  ;;  %v677_v29 = vld [vmem:[%s6960_s22 + $0x54] sm:$0xf] }
  0x33   : > { %v811_v41 = vrot.slane %v810_v33, 4  ;;  %v833_v59 = vrot.slane %v831_v48, 5  ;;  %v839_v60 = vrot.slane %v837_v49, 5  ;;  %v852_v11 = vshrl.u32 %v674_v62, 16  ;;  %v678_v34 = vld [vmem:[%s6960_s22 + $0x58] sm:$0xf] }
  0x34   : > { %6527 = vmatmul.mubr.msk.bf16.vlgmr.msra.gmra.mrb[16].mxu1 %vm201_vm1, %v5768_v37  ;;  %v825_v37 = vrot.slane %v823_v28, 5  ;;  %v843_v1 = vrot.slane %v841_v56, 4  ;;  %v855_v12 = vshll.u32 %v674_v62, 16  ;;  %v1466_v28 = vld [vmem:[%s6960_s22 + $0x44] sm:$0x1]  ;;  %v1585_v38 = vrot.slane %v1465_v25, 5 }
  0x35   : > { %6593 = vmatpush3.bf16.msra.mxu1 %v6997_v19  ;;  %6561 = vmatmul.mubr.msk.bf16.vlgmr.msra.gmra.mrb[16].mxu0 %vm201_vm1, %v5817_v61  ;;  %v1565_v19 = vsel %vm7025_vm6, %v5801_v3, %v1564_v7  ;;  %v816_v51 = vsel %vm7032_vm7, %v811_v41, %v815_v27  ;;  %v847_v61 = vshll.u32 %v673_v40, 16  ;;  %v675_v3 = vld [vmem:[%s6960_s22 + $0x4c] sm:$0xf]  ;;  %v834_v5 = vor.u32 %v833_v59, %v830_v55  ;;  %v679_v39 = vld [vmem:[%s6960_s22 + $0x5c] sm:$0x1] }
  0x36   : > { %6804 = vmatprep.subr.msk.bf16.mxu1 %vm427_vm0, %v6993_v18  ;;  %6627 = vmatpush3.bf16.msra.mxu0 %v7002_v21  ;;  %v792_v18 = vsel %vm7032_vm7, %v787_v14, %v791_v0  ;;  %v1568_v21 = vsel %vm7025_vm6, %v1566_v15, %v1567_v8  ;;  %v826_v63 = vsel %vm7032_vm7, %v821_v52, %v825_v37  ;;  %v1578_v7 = vrot.slane %v1462_v50, 5  ;;  %v1467_v44 = vld [vmem:[%s6960_s22 + $0x48] sm:$0xe]  ;;  %v1468_v49 = vld [vmem:[%s6960_s22 + $0x4c] sm:$0xf] }
  0x37   : > { %6530 = vmatprep.mubr.msk.bf16.mxu1 %vm201_vm1, %v5769_v9  ;;  %v5818_v32 = vcombine.low %v1565_v19, %v1568_v21  ;;  %v5770_v36 = vcombine.low %v792_v18, %v802_v31  ;;  %v5819_v0 = vcombine.low %v1572_v46, %v1575_v58  ;;  %v5771_v4 = vcombine.low %v816_v51, %v826_v63  ;;  %v1469_v56 = vld [vmem:[%s6960_s22 + $0x50] sm:$0x1] }
  0x38   : > { %v849_v6 = vrot.slane %v847_v61, 5  ;;  %v844_v8 = vor.u32 %v843_v1, %v839_v60  ;;  %v1581_v9 = vrot.slane %v1463_v57, 5  ;;  %v835_v13 = vrot.slane %v834_v5, 4  ;;  %v680_v61 = vld [vmem:[%s6960_s22 + $0x60] sm:$0xf] }
  0x39   : > { %6564 = vmatprep.mubr.msk.bf16.mxu0 %vm201_vm1, %v5818_v32  ;;  %v1579_v14 = vsel %vm7025_vm6, %v5803_v2, %v1578_v7  ;;  %v1580_v19 = vrot.slane %v1578_v7, 4  ;;  %v861_v15 = vshll.u32 %v675_v3, 16  ;;  %v854_v20 = vrot.slane %v852_v11, 4  ;;  %v681_v2 = vld [vmem:[%s6960_s22 + $0x64] sm:$0xf] }
  0x3a   : > { %v845_v17 = vrot.slane %v844_v8, 4  ;;  %v857_v22 = vrot.slane %v855_v12, 5  ;;  %v865_v23 = vshrl.u32 %v675_v3, 16  ;;  %v840_v26 = vsel %vm7032_vm7, %v835_v13, %v839_v60 }
  0x3b   : > { %v1582_v18 = vsel %vm7025_vm6, %v1580_v19, %v1581_v9  ;;  %v863_v21 = vrot.slane %v861_v15, 5  ;;  %v871_v27 = vshll.u32 %v676_v10, 16  ;;  %v5804_v37 = vrot.slane %v1464_v16, 9  ;;  %v682_v9 = vld [vmem:[%s6960_s22 + $0x68] sm:$0x1] }
  0x3c   : > { %6531 = vmatmul.mubr.msk.bf16.gmra.mrb[20].mxu1 %vm201_vm1, %v5770_v36  ;;  %v850_v30 = vsel %vm7032_vm7, %v845_v17, %v849_v6  ;;  %v5820_v31 = vcombine.low %v1579_v14, %v1582_v18  ;;  %v858_v32 = vor.u32 %v857_v22, %v854_v20  ;;  %v867_v33 = vrot.slane %v865_v23, 4  ;;  %v1470_v15 = vld [vmem:[%s6960_s22 + $0x54] sm:$0xe]  ;;  %v1471_v23 = vld [vmem:[%s6960_s22 + $0x58] sm:$0xf] }
  0x3d   : > { %6565 = vmatmul.mubr.msk.bf16.gmra.mrb[20].mxu0 %vm201_vm1, %v5819_v0  ;;  %6534 = vmatprep.mubr.msk.bf16.mxu1 %vm201_vm1, %v5771_v4  ;;  %v5772_v35 = vcombine.low %v840_v26, %v850_v30  ;;  %v873_v36 = vrot.slane %v871_v27, 5  ;;  %v1588_v42 = vrot.slane %v1466_v28, 5  ;;  %v876_v43 = vshrl.u32 %v677_v29, 16  ;;  %v1472_v27 = vld [vmem:[%s6960_s22 + $0x5c] sm:$0x1] }
  0x3e   : > { %6568 = vmatprep.mubr.msk.bf16.mxu0 %vm201_vm1, %v5820_v31  ;;  %v859_v40 = vrot.slane %v858_v32, 4  ;;  %v868_v41 = vor.u32 %v867_v33, %v863_v21  ;;  %v1586_v45 = vsel %vm7025_vm6, %v5804_v37, %v1585_v38  ;;  %v1587_v46 = vrot.slane %v1585_v38, 4  ;;  %v683_v28 = vld [vmem:[%s6960_s22 + $0x6c] sm:$0xf]  ;;  %v684_v33 = vld [vmem:[%s6960_s22 + $0x70] sm:$0xf] }
  0x3f   : > { %v879_v47 = vshll.u32 %v677_v29, 16  ;;  %v885_v48 = vshll.u32 %v678_v34, 16  ;;  %v878_v52 = vrot.slane %v876_v43, 4  ;;  %v889_v55 = vshrl.u32 %v678_v34, 16  ;;  %v685_v38 = vld [vmem:[%s6960_s22 + $0x74] sm:$0x1] }
  0x40   : > { %v864_v50 = vsel %vm7032_vm7, %v859_v40, %v863_v21  ;;  %v869_v51 = vrot.slane %v868_v41, 4  ;;  %v1589_v57 = vsel %vm7025_vm6, %v1587_v46, %v1588_v42  ;;  %v895_v60 = vshll.u32 %v679_v39, 16  ;;  %v1473_v43 = vld [vmem:[%s6960_s22 + $0x60] sm:$0xe] }
  0x41   : > { %v881_v58 = vrot.slane %v879_v47, 5  ;;  %v887_v59 = vrot.slane %v885_v48, 5  ;;  %v5821_v63 = vcombine.low %v1586_v45, %v1589_v57  ;;  %v891_v0 = vrot.slane %v889_v55, 4  ;;  %v1474_v48 = vld [vmem:[%s6960_s22 + $0x64] sm:$0xf] }
  0x42   : > { %v874_v62 = vsel %vm7032_vm7, %v869_v51, %v873_v36  ;;  %v5805_v1 = vrot.slane %v1467_v44, 9  ;;  %v897_v5 = vrot.slane %v895_v60, 5  ;;  %v1592_v6 = vrot.slane %v1468_v49, 5  ;;  %v1475_v55 = vld [vmem:[%s6960_s22 + $0x68] sm:$0x1] }
  0x43   : > { %v5773_v3 = vcombine.low %v864_v50, %v874_v62  ;;  %v882_v4 = vor.u32 %v881_v58, %v878_v52  ;;  %v892_v7 = vor.u32 %v891_v0, %v887_v59  ;;  %v1595_v8 = vrot.slane %v1469_v56, 5  ;;  %v686_v60 = vld [vmem:[%s6960_s22 + $0x78] sm:$0xf] }
  0x44   : > { %6535 = vmatmul.mubr.msk.bf16.gmra.mrb[24].mxu1 %vm201_vm1, %v5772_v35  ;;  %v900_v10 = vshrl.u32 %v680_v61, 16  ;;  %v903_v11 = vshll.u32 %v680_v61, 16  ;;  %v1593_v13 = vsel %vm7025_vm6, %v5805_v1, %v1592_v6  ;;  %v1594_v14 = vrot.slane %v1592_v6, 4  ;;  %v687_v1 = vld [vmem:[%s6960_s22 + $0x7c] sm:$0xf] }
  0x45   : > { %6569 = vmatmul.mubr.msk.bf16.gmra.mrb[24].mxu0 %vm201_vm1, %v5821_v63  ;;  %6538 = vmatprep.mubr.msk.bf16.mxu1 %vm201_vm1, %v5773_v3  ;;  %v883_v12 = vrot.slane %v882_v4, 4  ;;  %v909_v19 = vshll.u32 %v681_v2, 16  ;;  %v893_v16 = vrot.slane %v892_v7, 4  ;;  %v913_v22 = vshrl.u32 %v681_v2, 16 }
  0x46   : > { %v902_v17 = vrot.slane %v900_v10, 4  ;;  %v905_v20 = vrot.slane %v903_v11, 5  ;;  %v1596_v26 = vsel %vm7025_vm6, %v1594_v14, %v1595_v8  ;;  %v919_v21 = vshll.u32 %v682_v9, 16  ;;  %v688_v8 = vld [vmem:[%s6960_s22 + $0x80] sm:$0x1] }
  0x47   : > { %v888_v25 = vsel %vm7032_vm7, %v883_v12, %v887_v59  ;;  %v911_v18 = vrot.slane %v909_v19, 5  ;;  %v898_v29 = vsel %vm7032_vm7, %v893_v16, %v897_v5  ;;  %v5822_v30 = vcombine.low %v1593_v13, %v1596_v26  ;;  %v1476_v19 = vld [vmem:[%s6960_s22 + $0x6c] sm:$0xe] }
  0x48   : > { %v906_v31 = vor.u32 %v905_v20, %v902_v17  ;;  %v915_v32 = vrot.slane %v913_v22, 4  ;;  %v5774_v34 = vcombine.low %v888_v25, %v898_v29  ;;  %v921_v35 = vrot.slane %v919_v21, 5  ;;  %v1477_v22 = vld [vmem:[%s6960_s22 + $0x70] sm:$0xf]  ;;  %v1478_v21 = vld [vmem:[%s6960_s22 + $0x74] sm:$0x1] }
  0x49   : > { %v5806_v36 = vrot.slane %v1470_v15, 9  ;;  %v1599_v37 = vrot.slane %v1471_v23, 5  ;;  %6572 = vmatprep.mubr.msk.bf16.mxu0 %vm201_vm1, %v5822_v30  ;;  %v1602_v41 = vrot.slane %v1472_v27, 5  ;;  %v924_v42 = vshrl.u32 %v683_v28, 16  ;;  %v689_v27 = vld [vmem:[%s6960_s22 + $0x84] sm:$0xf] }
  0x4a   : > { %v907_v39 = vrot.slane %v906_v31, 4  ;;  %v916_v40 = vor.u32 %v915_v32, %v911_v18  ;;  %v927_v46 = vshll.u32 %v683_v28, 16  ;;  %v933_v47 = vshll.u32 %v684_v33, 16  ;;  %v690_v32 = vld [vmem:[%s6960_s22 + $0x88] sm:$0xf] }
  0x4b   : > { %v1600_v44 = vsel %vm7025_vm6, %v5806_v36, %v1599_v37  ;;  %v1601_v45 = vrot.slane %v1599_v37, 4  ;;  %v926_v51 = vrot.slane %v924_v42, 4  ;;  %v937_v52 = vshrl.u32 %v684_v33, 16  ;;  %v691_v37 = vld [vmem:[%s6960_s22 + $0x8c] sm:$0x1] }
  0x4c   : > { %6539 = vmatmul.mubr.msk.bf16.gmra.mrb[28].mxu1 %vm201_vm1, %v5774_v34  ;;  %v912_v49 = vsel %vm7032_vm7, %v907_v39, %v911_v18  ;;  %v917_v50 = vrot.slane %v916_v40, 4  ;;  %v929_v57 = vrot.slane %v927_v46, 5  ;;  %v935_v58 = vrot.slane %v933_v47, 5  ;;  %v1479_v42 = vld [vmem:[%s6960_s22 + $0x78] sm:$0xe] }
  0x4d   : > { %v1603_v56 = vsel %vm7025_vm6, %v1601_v45, %v1602_v41  ;;  %v943_v59 = vshll.u32 %v685_v38, 16  ;;  %v939_v63 = vrot.slane %v937_v52, 4  ;;  %v5807_v0 = vrot.slane %v1473_v43, 9  ;;  %v1480_v47 = vld [vmem:[%s6960_s22 + $0x7c] sm:$0xf] }
  0x4e   : > { %v922_v61 = vsel %vm7032_vm7, %v917_v50, %v921_v35  ;;  %v5823_v62 = vcombine.low %v1600_v44, %v1603_v56  ;;  %v930_v3 = vor.u32 %v929_v57, %v926_v51  ;;  %v1606_v5 = vrot.slane %v1474_v48, 5  ;;  %v1481_v52 = vld [vmem:[%s6960_s22 + $0x80] sm:$0x1] }
  0x4f   : > { %v5775_v2 = vcombine.low %v912_v49, %v922_v61  ;;  %v945_v4 = vrot.slane %v943_v59, 5  ;;  %v940_v6 = vor.u32 %v939_v63, %v935_v58  ;;  %v1609_v7 = vrot.slane %v1475_v55, 5  ;;  %v692_v59 = vld [vmem:[%s6960_s22 + $0x90] sm:$0xf] }
  0x50   : > { %6573 = vmatmul.mubr.msk.bf16.gmra.mrb[28].mxu0 %vm201_vm1, %v5823_v62  ;;  %v948_v9 = vshrl.u32 %v686_v60, 16  ;;  %v951_v10 = vshll.u32 %v686_v60, 16  ;;  %v931_v11 = vrot.slane %v930_v3, 4  ;;  %v1607_v12 = vsel %vm7025_vm6, %v5807_v0, %v1606_v5  ;;  %v693_v0 = vld [vmem:[%s6960_s22 + $0x94] sm:$0xf] }
  0x51   : > { %6542 = vmatprep.mubr.msk.bf16.mxu1 %vm201_vm1, %v5775_v2  ;;  %v1608_v13 = vrot.slane %v1606_v5, 4  ;;  %v957_v14 = vshll.u32 %v687_v1, 16  ;;  %v941_v15 = vrot.slane %v940_v6, 4  ;;  %v961_v20 = vshrl.u32 %v687_v1, 16  ;;  %v694_v5 = vld [vmem:[%s6960_s22 + $0x98] sm:$0x1] }
  0x52   : > { %v950_v16 = vrot.slane %v948_v9, 4  ;;  %v953_v17 = vrot.slane %v951_v10, 5  ;;  %v936_v23 = vsel %vm7032_vm7, %v931_v11, %v935_v58  ;;  %v967_v18 = vshll.u32 %v688_v8, 16  ;;  %v1482_v10 = vld [vmem:[%s6960_s22 + $0x84] sm:$0xe] }
  0x53   : > { %v1610_v25 = vsel %vm7025_vm6, %v1608_v13, %v1609_v7  ;;  %v959_v26 = vrot.slane %v957_v14, 5  ;;  %v946_v28 = vsel %vm7032_vm7, %v941_v15, %v945_v4  ;;  %v963_v31 = vrot.slane %v961_v20, 4  ;;  %v1483_v11 = vld [vmem:[%s6960_s22 + $0x88] sm:$0xf]  ;;  %v1484_v15 = vld [vmem:[%s6960_s22 + $0x8c] sm:$0x1] }
  0x54   : > { %v5824_v29 = vcombine.low %v1607_v12, %v1610_v25  ;;  %v954_v30 = vor.u32 %v953_v17, %v950_v16  ;;  %v5776_v33 = vcombine.low %v936_v23, %v946_v28  ;;  %v969_v34 = vrot.slane %v967_v18, 5 }
  0x55   : > { %v5808_v35 = vrot.slane %v1476_v19, 9  ;;  %v1613_v36 = vrot.slane %v1477_v22, 5  ;;  %v964_v39 = vor.u32 %v963_v31, %v959_v26  ;;  %v1616_v40 = vrot.slane %v1478_v21, 5  ;;  %v695_v21 = vld [vmem:[%s6960_s22 + $0x9c] sm:$0xf] }
  0x56   : > { %6576 = vmatprep.mubr.msk.bf16.mxu0 %vm201_vm1, %v5824_v29  ;;  %v955_v38 = vrot.slane %v954_v30, 4  ;;  %v972_v41 = vshrl.u32 %v689_v27, 16  ;;  %6543 = vmatmul.mubr.msk.bf16.gmra.mrb[32].mxu1 %vm201_vm1, %v5776_v33  ;;  %v975_v45 = vshll.u32 %v689_v27, 16  ;;  %v981_v46 = vshll.u32 %v690_v32, 16  ;;  %v696_v31 = vld [vmem:[%s6960_s22 + $0xa0] sm:$0xf] }
  0x57   : > { %v1614_v43 = vsel %vm7025_vm6, %v5808_v35, %v1613_v36  ;;  %v1615_v44 = vrot.slane %v1613_v36, 4  ;;  %v965_v49 = vrot.slane %v964_v39, 4  ;;  %v985_v51 = vshrl.u32 %v690_v32, 16  ;;  %v697_v32 = vld [vmem:[%s6960_s22 + $0xa4] sm:$0x1] }
  0x58   : > { %v960_v48 = vsel %vm7032_vm7, %v955_v38, %v959_v26  ;;  %v974_v50 = vrot.slane %v972_v41, 4  ;;  %v977_v56 = vrot.slane %v975_v45, 5  ;;  %v983_v57 = vrot.slane %v981_v46, 5 }
  0x59   : > { %v1617_v55 = vsel %vm7025_vm6, %v1615_v44, %v1616_v40  ;;  %v991_v58 = vshll.u32 %v691_v37, 16  ;;  %v970_v60 = vsel %vm7032_vm7, %v965_v49, %v969_v34  ;;  %v987_v62 = vrot.slane %v985_v51, 4  ;;  %v1485_v37 = vld [vmem:[%s6960_s22 + $0x90] sm:$0xe] }
  0x5a   : > { %v5825_v61 = vcombine.low %v1614_v43, %v1617_v55  ;;  %v5809_v63 = vrot.slane %v1479_v42, 9  ;;  %v5777_v1 = vcombine.low %v960_v48, %v970_v60  ;;  %v978_v2 = vor.u32 %v977_v56, %v974_v50  ;;  %v1486_v42 = vld [vmem:[%s6960_s22 + $0x94] sm:$0xf] }
  0x5b   : > { %v993_v3 = vrot.slane %v991_v58, 5  ;;  %v1620_v4 = vrot.slane %v1480_v47, 5  ;;  %v988_v6 = vor.u32 %v987_v62, %v983_v57  ;;  %v1623_v7 = vrot.slane %v1481_v52, 5  ;;  %v1487_v47 = vld [vmem:[%s6960_s22 + $0x98] sm:$0x1] }
  0x5c   : > { %6577 = vmatmul.mubr.msk.bf16.gmra.mrb[32].mxu0 %vm201_vm1, %v5825_v61  ;;  %v996_v8 = vshrl.u32 %v692_v59, 16  ;;  %v999_v9 = vshll.u32 %v692_v59, 16  ;;  %6546 = vmatprep.mubr.msk.bf16.mxu1 %vm201_vm1, %v5777_v1  ;;  %v979_v12 = vrot.slane %v978_v2, 4  ;;  %v1005_v19 = vshll.u32 %v693_v0, 16  ;;  %v698_v52 = vld [vmem:[%s6960_s22 + $0xa8] sm:$0xf] }
  0x5d   : > { %v1621_v13 = vsel %vm7025_vm6, %v5809_v63, %v1620_v4  ;;  %v1622_v14 = vrot.slane %v1620_v4, 4  ;;  %v989_v16 = vrot.slane %v988_v6, 4  ;;  %v1009_v22 = vshrl.u32 %v693_v0, 16  ;;  %v699_v59 = vld [vmem:[%s6960_s22 + $0xac] sm:$0xf] }
  0x5e   : > { %v998_v17 = vrot.slane %v996_v8, 4  ;;  %v1001_v20 = vrot.slane %v999_v9, 5  ;;  %v984_v23 = vsel %vm7032_vm7, %v979_v12, %v983_v57  ;;  %v1007_v26 = vrot.slane %v1005_v19, 5  ;;  %v700_v4 = vld [vmem:[%s6960_s22 + $0xb0] sm:$0x1] }
  0x5f   : > { %v1624_v25 = vsel %vm7025_vm6, %v1622_v14, %v1623_v7  ;;  %v1015_v18 = vshll.u32 %v694_v5, 16  ;;  %v994_v27 = vsel %vm7032_vm7, %v989_v16, %v993_v3  ;;  %v1011_v30 = vrot.slane %v1009_v22, 4  ;;  %v7245_v5 = vld [vmem:[%s8677_s1 + $0x18] sm:$0xf] }
  0x60   : > { %v5826_v28 = vcombine.low %v1621_v13, %v1624_v25  ;;  %v1002_v29 = vor.u32 %v1001_v20, %v998_v17  ;;  %v5778_v33 = vcombine.low %v984_v23, %v994_v27  ;;  %v5810_v35 = vrot.slane %v1482_v10, 9  ;;  %v1488_v10 = vld [vmem:[%s6960_s22 + $0x9c] sm:$0xe]  ;;  %6805 = vmatprep.subr.msk.bf16.mxu0 %vm427_vm0, %v7245_v5 }
  0x61   : > { %v1017_v34 = vrot.slane %v1015_v18, 5  ;;  %v1627_v36 = vrot.slane %v1483_v11, 5  ;;  %v1012_v39 = vor.u32 %v1011_v30, %v1007_v26  ;;  %v1630_v40 = vrot.slane %v1484_v15, 5  ;;  %v1489_v11 = vld [vmem:[%s6960_s22 + $0xa0] sm:$0xf] }
  0x62   : > { %6580 = vmatprep.mubr.msk.bf16.mxu0 %vm201_vm1, %v5826_v28  ;;  %v1003_v38 = vrot.slane %v1002_v29, 4  ;;  %v1020_v41 = vshrl.u32 %v695_v21, 16  ;;  %6547 = vmatmul.mubr.msk.bf16.gmra.mrb[36].mxu1 %vm201_vm1, %v5778_v33  ;;  %v1023_v45 = vshll.u32 %v695_v21, 16  ;;  %v1029_v46 = vshll.u32 %v696_v31, 16  ;;  %v1490_v15 = vld [vmem:[%s6960_s22 + $0xa4] sm:$0x1] }
  0x63   : > { %v1628_v43 = vsel %vm7025_vm6, %v5810_v35, %v1627_v36  ;;  %v1629_v44 = vrot.slane %v1627_v36, 4  ;;  %v1013_v49 = vrot.slane %v1012_v39, 4  ;;  %v1033_v51 = vshrl.u32 %v696_v31, 16  ;;  %v701_v21 = vld [vmem:[%s6960_s22 + $0xb4] sm:$0xf] }
  0x64   : > { %v1008_v48 = vsel %vm7032_vm7, %v1003_v38, %v1007_v26  ;;  %v1022_v50 = vrot.slane %v1020_v41, 4  ;;  %v1025_v56 = vrot.slane %v1023_v45, 5  ;;  %v1031_v57 = vrot.slane %v1029_v46, 5  ;;  %v702_v31 = vld [vmem:[%s6960_s22 + $0xb8] sm:$0xf] }
  0x65   : > { %v1631_v55 = vsel %vm7025_vm6, %v1629_v44, %v1630_v40  ;;  %v1039_v58 = vshll.u32 %v697_v32, 16  ;;  %v1018_v60 = vsel %vm7032_vm7, %v1013_v49, %v1017_v34  ;;  %v1035_v62 = vrot.slane %v1033_v51, 4  ;;  %v703_v32 = vld [vmem:[%s6960_s22 + $0xbc] sm:$0x1] }
  0x66   : > { %v5827_v61 = vcombine.low %v1628_v43, %v1631_v55  ;;  %v5811_v63 = vrot.slane %v1485_v37, 9  ;;  %v5779_v0 = vcombine.low %v1008_v48, %v1018_v60  ;;  %v1026_v1 = vor.u32 %v1025_v56, %v1022_v50  ;;  %v1491_v37 = vld [vmem:[%s6960_s22 + $0xa8] sm:$0xe]  ;;  %v1494_v48 = vld [vmem:[%s6960_s22 + $0xb4] sm:$0xe] }
  0x67   : > { %v1041_v2 = vrot.slane %v1039_v58, 5  ;;  %v1634_v3 = vrot.slane %v1486_v42, 5  ;;  %v1036_v6 = vor.u32 %v1035_v62, %v1031_v57  ;;  %v1637_v7 = vrot.slane %v1487_v47, 5  ;;  %v1492_v42 = vld [vmem:[%s6960_s22 + $0xac] sm:$0xf] }
  0x68   : > { %6581 = vmatmul.mubr.msk.bf16.gmra.mrb[36].mxu0 %vm201_vm1, %v5827_v61  ;;  %v1044_v8 = vshrl.u32 %v698_v52, 16  ;;  %v1047_v9 = vshll.u32 %v698_v52, 16  ;;  %6550 = vmatprep.mubr.msk.bf16.mxu1 %vm201_vm1, %v5779_v0  ;;  %v1027_v12 = vrot.slane %v1026_v1, 4  ;;  %v1053_v19 = vshll.u32 %v699_v59, 16  ;;  %v1493_v47 = vld [vmem:[%s6960_s22 + $0xb0] sm:$0x1] }
  0x69   : > { %v1635_v13 = vsel %vm7025_vm6, %v5811_v63, %v1634_v3  ;;  %v1636_v14 = vrot.slane %v1634_v3, 4  ;;  %v1037_v16 = vrot.slane %v1036_v6, 4  ;;  %v1057_v22 = vshrl.u32 %v699_v59, 16  ;;  %v1495_v55 = vld [vmem:[%s6960_s22 + $0xb8] sm:$0xf] }
  0x6a   : > { %v1046_v17 = vrot.slane %v1044_v8, 4  ;;  %v1049_v20 = vrot.slane %v1047_v9, 5  ;;  %v1032_v23 = vsel %vm7032_vm7, %v1027_v12, %v1031_v57  ;;  %v1055_v26 = vrot.slane %v1053_v19, 5  ;;  %v1496_v60 = vld [vmem:[%s6960_s22 + $0xbc] sm:$0x1] }
  0x6b   : > { %v1638_v25 = vsel %vm7025_vm6, %v1636_v14, %v1637_v7  ;;  %v1063_v18 = vshll.u32 %v700_v4, 16  ;;  %v1042_v27 = vsel %vm7032_vm7, %v1037_v16, %v1041_v2  ;;  %v1059_v30 = vrot.slane %v1057_v22, 4  ;;  %v5913_v6 = vld [vmem:[%s6960_s22 + $0xc] sm:$0xf] }
  0x6c   : > { %v5828_v28 = vcombine.low %v1635_v13, %v1638_v25  ;;  %v1050_v29 = vor.u32 %v1049_v20, %v1046_v17  ;;  %v5780_v33 = vcombine.low %v1032_v23, %v1042_v27  ;;  %v5812_v35 = vrot.slane %v1488_v10, 9  ;;  %v5917_v27 = vld [vmem:[%s6960_s22 + $0x1c] sm:$0xf] }
  0x6d   : > { %v1065_v34 = vrot.slane %v1063_v18, 5  ;;  %v1641_v36 = vrot.slane %v1489_v11, 5  ;;  %v1060_v39 = vor.u32 %v1059_v30, %v1055_v26  ;;  %v1644_v40 = vrot.slane %v1490_v15, 5  ;;  %v5914_v11 = vld [vmem:[%s6960_s22 + $0x10] sm:$0xf] }
  0x6e   : > { %6584 = vmatprep.mubr.msk.bf16.mxu0 %vm201_vm1, %v5828_v28  ;;  %v1051_v38 = vrot.slane %v1050_v29, 4  ;;  %v1068_v41 = vshrl.u32 %v701_v21, 16  ;;  %6551 = vmatmul.mubr.msk.bf16.gmra.mrb[40].mxu1 %vm201_vm1, %v5780_v33  ;;  %v1071_v45 = vshll.u32 %v701_v21, 16  ;;  %v1077_v46 = vshll.u32 %v702_v31, 16  ;;  %v5915_v15 = vld [vmem:[%s6960_s22 + $0x14] sm:$0x1] }
  0x6f   : > { %v1642_v43 = vsel %vm7025_vm6, %v5812_v35, %v1641_v36  ;;  %v1643_v44 = vrot.slane %v1641_v36, 4  ;;  %v1061_v50 = vrot.slane %v1060_v39, 4  ;;  %v1081_v52 = vshrl.u32 %v702_v31, 16  ;;  %v5916_v21 = vld [vmem:[%s6960_s22 + $0x18] sm:$0xf]  ;;  %v6850_v31 = vld [vmem:[%s6960_s22 + $0xc] sm:$0xff]  }
  0x70   : > { %v1056_v49 = vsel %vm7032_vm7, %v1051_v38, %v1055_v26  ;;  %v1070_v51 = vrot.slane %v1068_v41, 4  ;;  %v1073_v57 = vrot.slane %v1071_v45, 5  ;;  %v1079_v58 = vrot.slane %v1077_v46, 5  ;;  %v5918_v33 = vld [vmem:[%s6960_s22 + $0x20] sm:$0x1] }
  0x71   : > { %v1645_v56 = vsel %vm7025_vm6, %v1643_v44, %v1644_v40  ;;  %v1087_v59 = vshll.u32 %v703_v32, 16  ;;  %v1066_v61 = vsel %vm7032_vm7, %v1061_v50, %v1065_v34  ;;  %v1083_v63 = vrot.slane %v1081_v52, 4 }
  0x72   : > { %v5829_v62 = vcombine.low %v1642_v43, %v1645_v56  ;;  %v5813_v0 = vrot.slane %v1491_v37, 9  ;;  %v5781_v1 = vcombine.low %v1056_v49, %v1066_v61  ;;  %v1074_v2 = vor.u32 %v1073_v57, %v1070_v51 }
  0x73   : > { %v1089_v3 = vrot.slane %v1087_v59, 5  ;;  %v1648_v4 = vrot.slane %v1492_v42, 5  ;;  %v1084_v7 = vor.u32 %v1083_v63, %v1079_v58  ;;  %v1651_v8 = vrot.slane %v1493_v47, 5  ;;  %v5919_v42 = vld [vmem:[%s6960_s22 + $0x24] sm:$0xf] }
  0x74   : > { %6585 = vmatmul.mubr.msk.bf16.gmra.mrb[40].mxu0 %vm201_vm1, %v5829_v62  ;;  %v5814_v9 = vrot.slane %v1494_v48, 9  ;;  %v1655_v10 = vrot.slane %v1495_v55, 5  ;;  %6554 = vmatprep.mubr.msk.bf16.mxu1 %vm201_vm1, %v5781_v1  ;;  %v1075_v12 = vrot.slane %v1074_v2, 4  ;;  %v1658_v19 = vrot.slane %v1496_v60, 5  ;;  %v5920_v47 = vld [vmem:[%s6960_s22 + $0x28] sm:$0xf] }
  0x75   : > { %v1649_v13 = vsel %vm7025_vm6, %v5813_v0, %v1648_v4  ;;  %v1650_v14 = vrot.slane %v1648_v4, 4  ;;  %v1085_v16 = vrot.slane %v1084_v7, 4  ;;  %v2490_v22 = vshrl.u32 %v5913_v6, 16  ;;  %v6852_v60 = vld [vmem:[%s6960_s22 + $0x24] sm:$0xff]   ;;  %v5921_v63 = vld [vmem:[%s6960_s22 + $0x2c] sm:$0x1] }
  0x76   : > { %v1656_v17 = vsel %vm7025_vm6, %v5814_v9, %v1655_v10  ;;  %v1657_v20 = vrot.slane %v1655_v10, 4  ;;  %v1080_v23 = vsel %vm7032_vm7, %v1075_v12, %v1079_v58  ;;  %v2493_v26 = vshll.u32 %v5913_v6, 16  ;;  %v6851_v58 = vld [vmem:[%s6960_s22 + $0x18] sm:$0xff]   ;;  %v5922_v6 = vld [vmem:[%s6960_s22 + $0x30] sm:$0xf] }
  0x77   : > { %v1652_v25 = vsel %vm7025_vm6, %v1650_v14, %v1651_v8  ;;  %v2499_v18 = vshll.u32 %v5914_v11, 16  ;;  %v1090_v28 = vsel %vm7032_vm7, %v1085_v16, %v1089_v3  ;;  %v2492_v32 = vrot.slane %v2490_v22, 4  ;;  %v5923_v14 = vld [vmem:[%s6960_s22 + $0x34] sm:$0xf]  ;;  %v5925_v22 = vld [vmem:[%s6960_s22 + $0x3c] sm:$0xf] }
  0x78   : > { %v5830_v29 = vcombine.low %v1649_v13, %v1652_v25  ;;  %v1659_v30 = vsel %vm7025_vm6, %v1657_v20, %v1658_v19  ;;  %v5782_v34 = vcombine.low %v1080_v23, %v1090_v28  ;;  %v2495_v36 = vrot.slane %v2493_v26, 5 }
  0x79   : > { %v5831_v35 = vcombine.low %v1656_v17, %v1659_v30  ;;  %v2501_v37 = vrot.slane %v2499_v18, 5  ;;  %v2503_v38 = vshrl.u32 %v5914_v11, 16  ;;  %v2509_v39 = vshll.u32 %v5915_v15, 16  ;;  %v5924_v17 = vld [vmem:[%s6960_s22 + $0x38] sm:$0x1] }
  0x7a   : > { %6588 = vmatprep.mubr.msk.bf16.mxu0 %vm201_vm1, %v5830_v29  ;;  %v2514_v40 = vshrl.u32 %v5916_v21, 16  ;;  %v2517_v41 = vshll.u32 %v5916_v21, 16  ;;  %6555 = vmatmul.mubr.msk.bf16.gmra.mrb[44].mxu1 %vm201_vm1, %v5782_v34  ;;  %v2496_v43 = vor.u32 %v2495_v36, %v2492_v32  ;;  %v2523_v44 = vshll.u32 %v5917_v27, 16  ;;  %v5926_v30 = vld [vmem:[%s6960_s22 + $0x40] sm:$0xf] }
  0x7b   : > { %v2527_v45 = vshrl.u32 %v5917_v27, 16  ;;  %v2533_v46 = vshll.u32 %v5918_v33, 16  ;;  %6594 = vmatprep.mubr.msk.bf16.mxu1 %vm201_vm1, %v6850_v31  ;;  %v2505_v48 = vrot.slane %v2503_v38, 4  ;;  %v2511_v49 = vrot.slane %v2509_v39, 5  ;;  %v5928_v36 = vld [vmem:[%s6960_s22 + $0x48] sm:$0xf] }
  0x7c   : > { %6589 = vmatmul.mubr.msk.bf16.gmra.mrb[44].mxu0 %vm201_vm1, %v5831_v35  ;;  %v2516_v50 = vrot.slane %v2514_v40, 4  ;;  %v2519_v51 = vrot.slane %v2517_v41, 5  ;;  %v2497_v52 = vrot.slane %v2496_v43, 4  ;;  %v2525_v55 = vrot.slane %v2523_v44, 5  ;;  %v5927_v35 = vld [vmem:[%s6960_s22 + $0x44] sm:$0x1] }
  0x7d   : > { %v2529_v56 = vrot.slane %v2527_v45, 4  ;;  %v2535_v57 = vrot.slane %v2533_v46, 5  ;;  %v2506_v59 = vor.u32 %v2505_v48, %v2501_v37  ;;  %v3993_v62 = vsel %vm427_vm0, %v7245_v5, 0  ;;  %v6853_v40 = vld [vmem:[%s6960_s22 + $0x30] sm:$0xff]   ;;  %v6854_v46 = vld [vmem:[%s6960_s22 + $0x3c] sm:$0xff]  }
  0x7e   : > { %v2520_v61 = vor.u32 %v2519_v51, %v2516_v50  ;;  %v2538_v0 = vshrl.u32 %v5919_v42, 16  ;;  %v2502_v1 = vsel %vm7032_vm7, %v2497_v52, %v2501_v37  ;;  %v2541_v3 = vshll.u32 %v5919_v42, 16 }
  0x7f   : > { %v2530_v2 = vor.u32 %v2529_v56, %v2525_v55  ;;  %v2547_v4 = vshll.u32 %v5920_v47, 16  ;;  %v2507_v7 = vrot.slane %v2506_v59, 4  ;;  %v2551_v10 = vshrl.u32 %v5920_v47, 16  ;;  %v5929_v56 = vld [vmem:[%s6960_s22 + $0x4c] sm:$0xf] }
  0x80   : > { %v2521_v8 = vrot.slane %v2520_v61, 4  ;;  %v2540_v9 = vrot.slane %v2538_v0, 4  ;;  %v2543_v12 = vrot.slane %v2541_v3, 5  ;;  %v2557_v5 = vshll.u32 %v5921_v63, 16  ;;  %v5930_v0 = vld [vmem:[%s6960_s22 + $0x50] sm:$0x1] }
  0x81   : > { %v2531_v11 = vrot.slane %v2530_v2, 4  ;;  %v2549_v13 = vrot.slane %v2547_v4, 5  ;;  %v2512_v19 = vsel %vm7032_vm7, %v2507_v7, %v2511_v49  ;;  %v2553_v16 = vrot.slane %v2551_v10, 4  ;;  %v5931_v7 = vld [vmem:[%s6960_s22 + $0x54] sm:$0xf] }
  0x82   : > { %v2526_v15 = vsel %vm7032_vm7, %v2521_v8, %v2525_v55  ;;  %v2562_v20 = vshrl.u32 %v5922_v6, 16  ;;  %6595 = vmatmul.mubr.msk.bf16.vlgmr.msra.gmra.mrb[48].mxu1 %vm201_vm1, %v6851_v58  ;;  %v5962_v23 = vcombine.low %v2502_v1, %v2512_v19  ;;  %v2544_v26 = vor.u32 %v2543_v12, %v2540_v9  ;;  %v6855_v9 = vld [vmem:[%s6960_s22 + $0x48] sm:$0xff]  }
  0x83   : > { %v2536_v25 = vsel %vm7032_vm7, %v2531_v11, %v2535_v57  ;;  %v2559_v18 = vrot.slane %v2557_v5, 5  ;;  %6661 = vmatpush3.bf16.msra.mxu1 %v7008_v24  ;;  %6598 = vmatprep.mubr.msk.bf16.mxu1 %vm201_vm1, %v6852_v60  ;;  %v2554_v27 = vor.u32 %v2553_v16, %v2549_v13  ;;  %v2565_v29 = vshll.u32 %v5922_v6, 16  ;;  %v5933_v16 = vld [vmem:[%s6960_s22 + $0x5c] sm:$0x1] }
  0x84   : > { %v5963_v21 = vcombine.low %v2526_v15, %v2536_v25  ;;  %v2564_v28 = vrot.slane %v2562_v20, 4  ;;  %6628 = vmatprep.mubr.msk.bf16.mxu0 %vm201_vm1, %v5962_v23  ;;  %v2545_v31 = vrot.slane %v2544_v26, 4  ;;  %v2571_v32 = vshll.u32 %v5923_v14, 16  ;;  %v6856_v20 = vld [vmem:[%s6960_s22 + $0x54] sm:$0xff]   ;;  %v5934_v26 = vld [vmem:[%s6960_s22 + $0x60] sm:$0xf] }
  0x85   : > { %v2575_v33 = vshrl.u32 %v5923_v14, 16  ;;  %v2581_v34 = vshll.u32 %v5924_v17, 16  ;;  %v2555_v24 = vrot.slane %v2554_v27, 4  ;;  %v2567_v37 = vrot.slane %v2565_v29, 5  ;;  %v5935_v29 = vld [vmem:[%s6960_s22 + $0x64] sm:$0xf] }
  0x86   : > { %6629 = vmatmul.mubr.msk.bf16.vlgmr.msra.gmra.mrb[48].mxu0 %vm201_vm1, %v5963_v21  ;;  %v2586_v38 = vshrl.u32 %v5925_v22, 16  ;;  %v2589_v39 = vshll.u32 %v5925_v22, 16  ;;  %v2550_v41 = vsel %vm7032_vm7, %v2545_v31, %v2549_v13  ;;  %v2573_v42 = vrot.slane %v2571_v32, 5  ;;  %v5932_v13 = vld [vmem:[%s6960_s22 + $0x58] sm:$0xf] }
  0x87   : > { %6695 = vmatpush3.bf16.msra.mxu0 %v3993_v62  ;;  %v2577_v43 = vrot.slane %v2575_v33, 4  ;;  %v2583_v44 = vrot.slane %v2581_v34, 5  ;;  %v2560_v45 = vsel %vm7032_vm7, %v2555_v24, %v2559_v18  ;;  %v2568_v47 = vor.u32 %v2567_v37, %v2564_v28 }
  0x88   : > { %v2588_v48 = vrot.slane %v2586_v38, 4  ;;  %v2591_v49 = vrot.slane %v2589_v39, 5  ;;  %v5964_v50 = vcombine.low %v2550_v41, %v2560_v45  ;;  %v2595_v52 = vshll.u32 %v5926_v30, 16 }
  0x89   : > { %v2578_v51 = vor.u32 %v2577_v43, %v2573_v42  ;;  %v2599_v55 = vshrl.u32 %v5926_v30, 16  ;;  %v2569_v57 = vrot.slane %v2568_v47, 4  ;;  %v2605_v59 = vshll.u32 %v5927_v35, 16  ;;  %v5936_v43 = vld [vmem:[%s6960_s22 + $0x68] sm:$0x1] }
  0x8a   : > { %v2592_v58 = vor.u32 %v2591_v49, %v2588_v48  ;;  %v2610_v60 = vshrl.u32 %v5928_v36, 16  ;;  %6599 = vmatmul.mubr.msk.bf16.gmra.mrb[52].mxu1 %vm201_vm1, %v6853_v40  ;;  %6632 = vmatprep.mubr.msk.bf16.mxu0 %vm201_vm1, %v5964_v50  ;;  %v2597_v62 = vrot.slane %v2595_v52, 5  ;;  %v2613_v1 = vshll.u32 %v5928_v36, 16  ;;  %v5937_v50 = vld [vmem:[%s6960_s22 + $0x6c] sm:$0xf] }
  0x8b   : > { %v2579_v61 = vrot.slane %v2578_v51, 4  ;;  %v2601_v63 = vrot.slane %v2599_v55, 4  ;;  %6602 = vmatprep.mubr.msk.bf16.mxu1 %vm201_vm1, %v6854_v46  ;;  %v2574_v2 = vsel %vm7032_vm7, %v2569_v57, %v2573_v42  ;;  %v2607_v4 = vrot.slane %v2605_v59, 5  ;;  %v5938_v57 = vld [vmem:[%s6960_s22 + $0x70] sm:$0xf]  ;;  %v6857_v59 = vld [vmem:[%s6960_s22 + $0x60] sm:$0xff]  }
  0x8c   : > { %v2593_v3 = vrot.slane %v2592_v58, 4  ;;  %v2612_v6 = vrot.slane %v2610_v60, 4  ;;  %v2615_v11 = vrot.slane %v2613_v1, 5  ;;  %v2619_v12 = vshll.u32 %v5929_v56, 16 }
  0x8d   : > { %v2584_v8 = vsel %vm7032_vm7, %v2579_v61, %v2583_v44  ;;  %v2602_v10 = vor.u32 %v2601_v63, %v2597_v62  ;;  %v2623_v19 = vshrl.u32 %v5929_v56, 16  ;;  %v2629_v15 = vshll.u32 %v5930_v0, 16  ;;  %v6858_v0 = vld [vmem:[%s6960_s22 + $0x6c] sm:$0xff]  }
  0x8e   : > { %v5965_v5 = vcombine.low %v2574_v2, %v2584_v8  ;;  %v2598_v14 = vsel %vm7032_vm7, %v2593_v3, %v2597_v62  ;;  %v2616_v22 = vor.u32 %v2615_v11, %v2612_v6  ;;  %v2621_v23 = vrot.slane %v2619_v12, 5  ;;  %v5939_v2 = vld [vmem:[%s6960_s22 + $0x74] sm:$0x1]  ;;  %v7382_v11 = vld [vmem:[%s8677_s1 + $0x1c] sm:$0xf] }
  0x8f   : > { %v2603_v17 = vrot.slane %v2602_v10, 4  ;;  %v2634_v25 = vshrl.u32 %v5931_v7, 16  ;;  %v2625_v18 = vrot.slane %v2623_v19, 4  ;;  %v2631_v21 = vrot.slane %v2629_v15, 5  ;;  %v5940_v10 = vld [vmem:[%s6960_s22 + $0x78] sm:$0xf]  ;;  %6806 = vmatprep.subr.msk.bf16.mxu1 %vm427_vm0, %v7382_v11 }
  0x90   : > { %6633 = vmatmul.mubr.msk.bf16.gmra.mrb[52].mxu0 %vm201_vm1, %v5965_v5  ;;  %v2637_v27 = vshll.u32 %v5931_v7, 16  ;;  %v2643_v28 = vshll.u32 %v5932_v13, 16  ;;  %v2617_v31 = vrot.slane %v2616_v22, 4  ;;  %v2647_v33 = vshrl.u32 %v5932_v13, 16  ;;  %v5941_v19 = vld [vmem:[%s6960_s22 + $0x7c] sm:$0xf] }
  0x91   : > { %v2608_v30 = vsel %vm7032_vm7, %v2603_v17, %v2607_v4  ;;  %v2636_v32 = vrot.slane %v2634_v25, 4  ;;  %v2626_v35 = vor.u32 %v2625_v18, %v2621_v23  ;;  %v2653_v39 = vshll.u32 %v5933_v16, 16  ;;  %v5942_v22 = vld [vmem:[%s6960_s22 + $0x80] sm:$0x1] }
  0x92   : > { %v5966_v34 = vcombine.low %v2598_v14, %v2608_v30  ;;  %v2639_v36 = vrot.slane %v2637_v27, 5  ;;  %v2645_v24 = vrot.slane %v2643_v28, 5  ;;  %6603 = vmatmul.mubr.msk.bf16.gmra.mrb[56].mxu1 %vm201_vm1, %v6855_v9  ;;  %v2622_v37 = vsel %vm7032_vm7, %v2617_v31, %v2621_v23 }
  0x93   : > { %v2649_v38 = vrot.slane %v2647_v33, 4  ;;  %v2658_v40 = vshrl.u32 %v5934_v26, 16  ;;  %6606 = vmatprep.mubr.msk.bf16.mxu1 %vm201_vm1, %v6856_v20  ;;  %v2627_v41 = vrot.slane %v2626_v35, 4  ;;  %v2661_v44 = vshll.u32 %v5934_v26, 16  ;;  %v5944_v35 = vld [vmem:[%s6960_s22 + $0x88] sm:$0xf] }
  0x94   : > { %6636 = vmatprep.mubr.msk.bf16.mxu0 %vm201_vm1, %v5966_v34  ;;  %v2640_v42 = vor.u32 %v2639_v36, %v2636_v32  ;;  %v2667_v45 = vshll.u32 %v5935_v29, 16  ;;  %v2655_v47 = vrot.slane %v2653_v39, 5  ;;  %v2671_v49 = vshrl.u32 %v5935_v29, 16  ;;  %v6859_v36 = vld [vmem:[%s6960_s22 + $0x78] sm:$0xff]  }
  0x95   : > { %v2650_v46 = vor.u32 %v2649_v38, %v2645_v24  ;;  %v2660_v48 = vrot.slane %v2658_v40, 4  ;;  %v2632_v51 = vsel %vm7032_vm7, %v2627_v41, %v2631_v21  ;;  %v2663_v55 = vrot.slane %v2661_v44, 5  ;;  %v5943_v21 = vld [vmem:[%s6960_s22 + $0x84] sm:$0xf] }
  0x96   : > { %v2641_v52 = vrot.slane %v2640_v42, 4  ;;  %v2669_v56 = vrot.slane %v2667_v45, 5  ;;  %v5967_v58 = vcombine.low %v2622_v37, %v2632_v51  ;;  %v2673_v61 = vrot.slane %v2671_v49, 4  ;;  %v6860_v37 = vld [vmem:[%s6960_s22 + $0x84] sm:$0xff]  }
  0x97   : > { %v2651_v60 = vrot.slane %v2650_v46, 4  ;;  %v2677_v62 = vshll.u32 %v5936_v43, 16  ;;  %v2664_v1 = vor.u32 %v2663_v55, %v2660_v48  ;;  %v2682_v3 = vshrl.u32 %v5937_v50, 16  ;;  %v5945_v43 = vld [vmem:[%s6960_s22 + $0x8c] sm:$0x1] }
  0x98   : > { %v2646_v63 = vsel %vm7032_vm7, %v2641_v52, %v2645_v24  ;;  %v2685_v4 = vshll.u32 %v5937_v50, 16  ;;  %6637 = vmatmul.mubr.msk.bf16.gmra.mrb[56].mxu0 %vm201_vm1, %v5967_v58  ;;  %v2674_v7 = vor.u32 %v2673_v61, %v2669_v56  ;;  %v2691_v9 = vshll.u32 %v5938_v57, 16  ;;  %v5947_v61 = vld [vmem:[%s6960_s22 + $0x94] sm:$0xf] }
  0x99   : > { %v2656_v6 = vsel %vm7032_vm7, %v2651_v60, %v2655_v47  ;;  %v2679_v8 = vrot.slane %v2677_v62, 5  ;;  %v2665_v13 = vrot.slane %v2664_v1, 4  ;;  %v2684_v5 = vrot.slane %v2682_v3, 4  ;;  %v5948_v62 = vld [vmem:[%s6960_s22 + $0x98] sm:$0x1] }
  0x9a   : > { %v5968_v12 = vcombine.low %v2646_v63, %v2656_v6  ;;  %v2687_v14 = vrot.slane %v2685_v4, 5  ;;  %6607 = vmatmul.mubr.msk.bf16.gmra.mrb[60].mxu1 %vm201_vm1, %v6857_v59  ;;  %v2675_v15 = vrot.slane %v2674_v7, 4  ;;  %v2693_v16 = vrot.slane %v2691_v9, 5  ;;  %v7415_v3 = vld [vmem:[%s8677_s1 + $0x20] sm:$0xf]  ;;  %v6861_v9 = vld [vmem:[%s6960_s22 + $0x90] sm:$0xff]  }
  0x9b   : > { %v2695_v17 = vshrl.u32 %v5938_v57, 16  ;;  %v2701_v20 = vshll.u32 %v5939_v2, 16  ;;  %6610 = vmatprep.mubr.msk.bf16.mxu1 %vm201_vm1, %v6858_v0  ;;  %v2670_v23 = vsel %vm7032_vm7, %v2665_v13, %v2669_v56  ;;  %v2706_v26 = vshrl.u32 %v5940_v10, 16  ;;  %v5946_v56 = vld [vmem:[%s6960_s22 + $0x90] sm:$0xf]  ;;  %6807 = vmatprep.subr.msk.bf16.mxu0 %vm427_vm0, %v7415_v3 }
  0x9c   : > { %6640 = vmatprep.mubr.msk.bf16.mxu0 %vm201_vm1, %v5968_v12  ;;  %v2688_v25 = vor.u32 %v2687_v14, %v2684_v5  ;;  %v2709_v18 = vshll.u32 %v5940_v10, 16  ;;  %v2680_v27 = vsel %vm7032_vm7, %v2675_v15, %v2679_v8  ;;  %v2715_v30 = vshll.u32 %v5941_v19, 16  ;;  %v5949_v14 = vld [vmem:[%s6960_s22 + $0x9c] sm:$0xf] }
  0x9d   : > { %v2697_v28 = vrot.slane %v2695_v17, 4  ;;  %v2703_v29 = vrot.slane %v2701_v20, 5  ;;  %v5969_v31 = vcombine.low %v2670_v23, %v2680_v27  ;;  %v2708_v33 = vrot.slane %v2706_v26, 4  ;;  %v6862_v15 = vld [vmem:[%s6960_s22 + $0x9c] sm:$0xff]  }
  0x9e   : > { %v2689_v32 = vrot.slane %v2688_v25, 4  ;;  %v2711_v34 = vrot.slane %v2709_v18, 5  ;;  %v2717_v38 = vrot.slane %v2715_v30, 5  ;;  %v2719_v39 = vshrl.u32 %v5941_v19, 16 }
  0x9f   : > { %v2698_v24 = vor.u32 %v2697_v28, %v2693_v16  ;;  %v2725_v40 = vshll.u32 %v5942_v22, 16  ;;  %v2730_v44 = vshrl.u32 %v5943_v21, 16  ;;  %v2733_v45 = vshll.u32 %v5943_v21, 16  ;;  %v5950_v22 = vld [vmem:[%s6960_s22 + $0xa0] sm:$0xf] }
  0xa0   : > { %v2694_v41 = vsel %vm7032_vm7, %v2689_v32, %v2693_v16  ;;  %v2712_v42 = vor.u32 %v2711_v34, %v2708_v33  ;;  %6641 = vmatmul.mubr.msk.bf16.gmra.mrb[60].mxu0 %vm201_vm1, %v5969_v31  ;;  %v2721_v47 = vrot.slane %v2719_v39, 4  ;;  %v2739_v49 = vshll.u32 %v5944_v35, 16  ;;  %v5951_v21 = vld [vmem:[%s6960_s22 + $0xa4] sm:$0x1]  ;;  %v5953_v39 = vld [vmem:[%s6960_s22 + $0xac] sm:$0xf] }
  0xa1   : > { %v2699_v46 = vrot.slane %v2698_v24, 4  ;;  %v2727_v48 = vrot.slane %v2725_v40, 5  ;;  %v2732_v51 = vrot.slane %v2730_v44, 4  ;;  %v2735_v52 = vrot.slane %v2733_v45, 5 }
  0xa2   : > { %v2713_v50 = vrot.slane %v2712_v42, 4  ;;  %v2743_v55 = vshrl.u32 %v5944_v35, 16  ;;  %6611 = vmatmul.mubr.msk.bf16.gmra.mrb[64].mxu1 %vm201_vm1, %v6859_v36  ;;  %v2722_v58 = vor.u32 %v2721_v47, %v2717_v38  ;;  %v2741_v59 = vrot.slane %v2739_v49, 5  ;;  %v5952_v35 = vld [vmem:[%s6960_s22 + $0xa8] sm:$0xf] }
  0xa3   : > { %v2704_v57 = vsel %vm7032_vm7, %v2699_v46, %v2703_v29  ;;  %v2749_v60 = vshll.u32 %v5945_v43, 16  ;;  %6614 = vmatprep.mubr.msk.bf16.mxu1 %vm201_vm1, %v6860_v37  ;;  %v2736_v1 = vor.u32 %v2735_v52, %v2732_v51  ;;  %v2754_v7 = vshrl.u32 %v5946_v56, 16  ;;  %v5954_v51 = vld [vmem:[%s6960_s22 + $0xb0] sm:$0x1] }
  0xa4   : > { %v5970_v63 = vcombine.low %v2694_v41, %v2704_v57  ;;  %v2718_v0 = vsel %vm7032_vm7, %v2713_v50, %v2717_v38  ;;  %v2745_v2 = vrot.slane %v2743_v55, 4  ;;  %v2723_v4 = vrot.slane %v2722_v58, 4  ;;  %v5955_v55 = vld [vmem:[%s6960_s22 + $0xb4] sm:$0xf]  ;;  %v6863_v57 = vld [vmem:[%s6960_s22 + $0xa8] sm:$0xff]  }
  0xa5   : > { %v2751_v6 = vrot.slane %v2749_v60, 5  ;;  %v2757_v8 = vshll.u32 %v5946_v56, 16  ;;  %v2737_v10 = vrot.slane %v2736_v1, 4  ;;  %v2763_v13 = vshll.u32 %v5947_v61, 16  ;;  %v6864_v1 = vld [vmem:[%s6960_s22 + $0xb4] sm:$0xff]  }
  0xa6   : > { %6644 = vmatprep.mubr.msk.bf16.mxu0 %vm201_vm1, %v5970_v63  ;;  %v2746_v12 = vor.u32 %v2745_v2, %v2741_v59  ;;  %v2767_v5 = vshrl.u32 %v5947_v61, 16  ;;  %v2728_v19 = vsel %vm7032_vm7, %v2723_v4, %v2727_v48  ;;  %v2756_v16 = vrot.slane %v2754_v7, 4  ;;  %v5956_v61 = vld [vmem:[%s6960_s22 + $0xb8] sm:$0xf] }
  0xa7   : > { %v2759_v17 = vrot.slane %v2757_v8, 5  ;;  %v2773_v20 = vshll.u32 %v5948_v62, 16  ;;  %v5971_v23 = vcombine.low %v2718_v0, %v2728_v19  ;;  %v2742_v25 = vsel %vm7032_vm7, %v2737_v10, %v2741_v59 }
  0xa8   : > { %v2747_v26 = vrot.slane %v2746_v12, 4  ;;  %v2765_v18 = vrot.slane %v2763_v13, 5  ;;  %v2769_v28 = vrot.slane %v2767_v5, 4  ;;  %v2778_v30 = vshrl.u32 %v5949_v14, 16  ;;  %v5957_v12 = vld [vmem:[%s6960_s22 + $0xbc] sm:$0x1] }
  0xa9   : > { %v2760_v27 = vor.u32 %v2759_v17, %v2756_v16  ;;  %v2775_v29 = vrot.slane %v2773_v20, 5  ;;  %6645 = vmatmul.mubr.msk.bf16.gmra.mrb[64].mxu0 %vm201_vm1, %v5971_v23  ;;  %v2781_v32 = vshll.u32 %v5949_v14, 16  ;;  %v2787_v33 = vshll.u32 %v5950_v22, 16  ;;  %v5958_v14 = vld [vmem:[%s6960_s22 + $0xc0] sm:$0xf] }
  0xaa   : > { %v2752_v31 = vsel %vm7032_vm7, %v2747_v26, %v2751_v6  ;;  %v2791_v34 = vshrl.u32 %v5950_v22, 16  ;;  %6615 = vmatmul.mubr.msk.bf16.gmra.mrb[68].mxu1 %vm201_vm1, %v6861_v9  ;;  %v2770_v37 = vor.u32 %v2769_v28, %v2765_v18  ;;  %v2780_v38 = vrot.slane %v2778_v30, 4  ;;  %v5959_v20 = vld [vmem:[%s6960_s22 + $0xc4] sm:$0xf] }
  0xab   : > { %v5972_v36 = vcombine.low %v2742_v25, %v2752_v31  ;;  %v2761_v24 = vrot.slane %v2760_v27, 4  ;;  %6618 = vmatprep.mubr.msk.bf16.mxu1 %vm201_vm1, %v6862_v15  ;;  %v2783_v40 = vrot.slane %v2781_v32, 5  ;;  %v2789_v41 = vrot.slane %v2787_v33, 5  ;;  %v5995_v31 = vld [vmem:[%s6960_s22 + $0x10] sm:$0xf] }
  0xac   : > { %v2793_v42 = vrot.slane %v2791_v34, 4  ;;  %v2797_v43 = vshll.u32 %v5951_v21, 16  ;;  %v2771_v45 = vrot.slane %v2770_v37, 4  ;;  %v2802_v46 = vshrl.u32 %v5952_v35, 16  ;;  %v5994_v21 = vld [vmem:[%s6960_s22 + $0xc] sm:$0xe] }
  0xad   : > { %6648 = vmatprep.mubr.msk.bf16.mxu0 %vm201_vm1, %v5972_v36  ;;  %v2766_v44 = vsel %vm7032_vm7, %v2761_v24, %v2765_v18  ;;  %v2805_v47 = vshll.u32 %v5952_v35, 16  ;;  %v2784_v48 = vor.u32 %v2783_v40, %v2780_v38  ;;  %v2811_v52 = vshll.u32 %v5953_v39, 16  ;;  %v5960_v18 = vld [vmem:[%s6960_s22 + $0xc8] sm:$0x1]  ;;  %v5996_v36 = vld [vmem:[%s6960_s22 + $0x14] sm:$0x1] }
  0xae   : > { %v2794_v49 = vor.u32 %v2793_v42, %v2789_v41  ;;  %v2799_v50 = vrot.slane %v2797_v43, 5  ;;  %v2776_v56 = vsel %vm7032_vm7, %v2771_v45, %v2775_v29  ;;  %v2804_v58 = vrot.slane %v2802_v46, 4  ;;  %v6865_v37 = vld [vmem:[%s6960_s22 + $0xc0] sm:$0xff]  }
  0xaf   : > { %v2807_v59 = vrot.slane %v2805_v47, 5  ;;  %v2815_v60 = vshrl.u32 %v5953_v39, 16  ;;  %v5973_v62 = vcombine.low %v2766_v44, %v2776_v56  ;;  %v2785_v63 = vrot.slane %v2784_v48, 4 }
  0xb0   : > { %v2795_v0 = vrot.slane %v2794_v49, 4  ;;  %v2813_v2 = vrot.slane %v2811_v52, 5  ;;  %v2821_v7 = vshll.u32 %v5954_v51, 16  ;;  %v2826_v8 = vshrl.u32 %v5955_v55, 16 }
  0xb1   : > { %v2808_v4 = vor.u32 %v2807_v59, %v2804_v58  ;;  %v2817_v6 = vrot.slane %v2815_v60, 4  ;;  %6649 = vmatmul.mubr.msk.bf16.gmra.mrb[68].mxu0 %vm201_vm1, %v5973_v62  ;;  %v2790_v9 = vsel %vm7032_vm7, %v2785_v63, %v2789_v41  ;;  %v2829_v13 = vshll.u32 %v5955_v55, 16  ;;  %v5997_v41 = vld [vmem:[%s6960_s22 + $0x18] sm:$0xe]  ;;  %v6000_v58 = vld [vmem:[%s6960_s22 + $0x24] sm:$0xe] }
  0xb2   : > { %v2800_v10 = vsel %vm7032_vm7, %v2795_v0, %v2799_v50  ;;  %v2835_v5 = vshll.u32 %v5956_v61, 16  ;;  %6619 = vmatmul.mubr.msk.bf16.gmra.mrb[72].mxu1 %vm201_vm1, %v6863_v57  ;;  %v2823_v17 = vrot.slane %v2821_v7, 5  ;;  %v2828_v22 = vrot.slane %v2826_v8, 4  ;;  %v5998_v50 = vld [vmem:[%s6960_s22 + $0x1c] sm:$0xf] }
  0xb3   : > { %v5974_v19 = vcombine.low %v2790_v9, %v2800_v10  ;;  %v2809_v15 = vrot.slane %v2808_v4, 4  ;;  %v2818_v16 = vor.u32 %v2817_v6, %v2813_v2  ;;  %6622 = vmatprep.mubr.msk.bf16.mxu1 %vm201_vm1, %v6864_v1  ;;  %v2831_v23 = vrot.slane %v2829_v13, 5  ;;  %v5999_v57 = vld [vmem:[%s6960_s22 + $0x20] sm:$0x1]  ;;  %v6001_v63 = vld [vmem:[%s6960_s22 + $0x28] sm:$0xf] }
  0xb4   : > { %v2837_v25 = vrot.slane %v2835_v5, 5  ;;  %v2839_v26 = vshrl.u32 %v5956_v61, 16  ;;  %v2845_v29 = vshll.u32 %v5957_v12, 16  ;;  %v2850_v30 = vshrl.u32 %v5958_v14, 16  ;;  %v6002_v0 = vld [vmem:[%s6960_s22 + $0x2c] sm:$0x1] }
  0xb5   : > { %6652 = vmatprep.mubr.msk.bf16.mxu0 %vm201_vm1, %v5974_v19  ;;  %v2814_v27 = vsel %vm7032_vm7, %v2809_v15, %v2813_v2  ;;  %v2819_v28 = vrot.slane %v2818_v16, 4  ;;  %v2832_v32 = vor.u32 %v2831_v23, %v2828_v22  ;;  %v2853_v34 = vshll.u32 %v5958_v14, 16  ;;  %v6003_v1 = vld [vmem:[%s6960_s22 + $0x30] sm:$0xe]  ;;  %v6004_v8 = vld [vmem:[%s6960_s22 + $0x34] sm:$0xf] }
  0xb6   : > { %v2841_v33 = vrot.slane %v2839_v26, 4  ;;  %v2859_v35 = vshll.u32 %v5959_v20, 16  ;;  %v2847_v38 = vrot.slane %v2845_v29, 5  ;;  %v2852_v39 = vrot.slane %v2850_v30, 4  ;;  %v6005_v9 = vld [vmem:[%s6960_s22 + $0x38] sm:$0x1] }
  0xb7   : > { %v2824_v24 = vsel %vm7032_vm7, %v2819_v28, %v2823_v17  ;;  %v2863_v40 = vshrl.u32 %v5959_v20, 16  ;;  %v2833_v43 = vrot.slane %v2832_v32, 4  ;;  %v2855_v45 = vrot.slane %v2853_v34, 5  ;;  %v6006_v14 = vld [vmem:[%s6960_s22 + $0x3c] sm:$0xe] }
  0xb8   : > { %v5975_v42 = vcombine.low %v2814_v27, %v2824_v24  ;;  %v2842_v44 = vor.u32 %v2841_v33, %v2837_v25  ;;  %v2861_v46 = vrot.slane %v2859_v35, 5  ;;  %v2869_v48 = vshll.u32 %v5960_v18, 16  ;;  %v6007_v17 = vld [vmem:[%s6960_s22 + $0x40] sm:$0xf]  ;;  %v6008_v20 = vld [vmem:[%s6960_s22 + $0x44] sm:$0x1] }
  0xb9   : > { %v2865_v47 = vrot.slane %v2863_v40, 4  ;;  %v6042_v49 = vrot.slane %v5994_v21, 9  ;;  %v2838_v51 = vsel %vm7032_vm7, %v2833_v43, %v2837_v25  ;;  %v2856_v55 = vor.u32 %v2855_v45, %v2852_v39  ;;  %v6866_v18 = vld [vmem:[%s6960_s22 + $0x18] sm:$0xff]   ;;  %v6009_v21 = vld [vmem:[%s6960_s22 + $0x48] sm:$0xe] }
  0xba   : > { %6653 = vmatmul.mubr.msk.bf16.gmra.mrb[72].mxu0 %vm201_vm1, %v5975_v42  ;;  %v2843_v52 = vrot.slane %v2842_v44, 4  ;;  %v3329_v56 = vrot.slane %v5995_v31, 5  ;;  %6623 = vmatmul.mubr.msk.bf16.gmra.mrb[76].mxu1 %vm201_vm1, %v6865_v37  ;;  %v2871_v60 = vrot.slane %v2869_v48, 5  ;;  %v3332_v61 = vrot.slane %v5996_v36, 5  ;;  %v6010_v27 = vld [vmem:[%s6960_s22 + $0x4c] sm:$0xf] }
  0xbb   : > { %v2866_v59 = vor.u32 %v2865_v47, %v2861_v46  ;;  %v6043_v62 = vrot.slane %v5997_v41, 9  ;;  %v2857_v4 = vrot.slane %v2856_v55, 4  ;;  %v3336_v13 = vrot.slane %v5998_v50, 5  ;;  %v6011_v32 = vld [vmem:[%s6960_s22 + $0x50] sm:$0x1]  ;;  %v6867_v47 = vld [vmem:[%s6960_s22 + $0x24] sm:$0xff]  }
  0xbc   : > { %v2848_v2 = vsel %vm7032_vm7, %v2843_v52, %v2847_v38  ;;  %v3330_v6 = vsel %vm7025_vm6, %v6042_v49, %v3329_v56  ;;  %v3331_v7 = vrot.slane %v3329_v56, 4  ;;  %v3339_v5 = vrot.slane %v5999_v57, 5  ;;  %v6012_v24 = vld [vmem:[%s6960_s22 + $0x54] sm:$0xe]  ;;  %v6013_v41 = vld [vmem:[%s6960_s22 + $0x58] sm:$0xf] }
  0xbd   : > { %v5976_v10 = vcombine.low %v2838_v51, %v2848_v2  ;;  %v2867_v12 = vrot.slane %v2866_v59, 4  ;;  %v2862_v19 = vsel %vm7032_vm7, %v2857_v4, %v2861_v46  ;;  %v6044_v16 = vrot.slane %v6000_v58, 9  ;;  %v6014_v42 = vld [vmem:[%s6960_s22 + $0x5c] sm:$0x1]  ;;  %v6015_v45 = vld [vmem:[%s6960_s22 + $0x60] sm:$0xe] }
  0xbe   : > { %v3333_v15 = vsel %vm7025_vm6, %v3331_v7, %v3332_v61  ;;  %v3337_v25 = vsel %vm7025_vm6, %v6043_v62, %v3336_v13  ;;  %v3338_v26 = vrot.slane %v3336_v13, 4  ;;  %v3343_v29 = vrot.slane %v6001_v63, 5  ;;  %v6016_v51 = vld [vmem:[%s6960_s22 + $0x64] sm:$0xf]  ;;  %v6017_v52 = vld [vmem:[%s6960_s22 + $0x68] sm:$0x1] }
  0xbf   : > { %6656 = vmatprep.mubr.msk.bf16.mxu0 %vm201_vm1, %v5976_v10  ;;  %v2872_v22 = vsel %vm7032_vm7, %v2867_v12, %v2871_v60  ;;  %v6059_v23 = vcombine.low %v3330_v6, %v3333_v15  ;;  %v3346_v30 = vrot.slane %v6002_v0, 5  ;;  %v6045_v31 = vrot.slane %v6003_v1, 9  ;;  %v7523_v59 = vld [vmem:[%s6960_s22 + $0x6c] sm:$0xe]  ;;  %v7526_v60 = vld [vmem:[%s6960_s22 + $0x70] sm:$0xf] }
  0xc0   : > { %v5977_v28 = vcombine.low %v2862_v19, %v2872_v22  ;;  %v3340_v33 = vsel %vm7025_vm6, %v3338_v26, %v3339_v5  ;;  %v4783_v34 = vsel %vm427_vm0, %v7382_v11, 0  ;;  %v3350_v35 = vrot.slane %v6004_v8, 5  ;;  %v6020_v0 = vld [vmem:[%s6960_s22 + $0x74] sm:$0x1]  ;;  %v6021_v1 = vld [vmem:[%s6960_s22 + $0x78] sm:$0xe] }
  0xc1   : > { %6662 = vmatprep.mubr.msk.bf16.mxu1 %vm201_vm1, %v6059_v23  ;;  %v3353_v36 = vrot.slane %v6005_v9, 5  ;;  %v6060_v37 = vcombine.low %v3337_v25, %v3340_v33  ;;  %v3344_v38 = vsel %vm7025_vm6, %v6044_v16, %v3343_v29  ;;  %v3345_v39 = vrot.slane %v3343_v29, 4  ;;  %v6022_v2 = vld [vmem:[%s6960_s22 + $0x7c] sm:$0xf]  ;;  %v6868_v6 = vld [vmem:[%s6960_s22 + $0x30] sm:$0xff]  }
  0xc2   : > { %6657 = vmatmul.mubr.msk.bf16.gmra.mrb[76].mxu0 %vm201_vm1, %v5977_v28  ;;  %v6046_v40 = vrot.slane %v6006_v14, 9  ;;  %v3352_v43 = vrot.slane %v3350_v35, 4  ;;  %v3357_v11 = vrot.slane %v6007_v17, 5  ;;  %v3360_v44 = vrot.slane %v6008_v20, 5  ;;  %v6023_v10 = vld [vmem:[%s6960_s22 + $0x80] sm:$0x1] }
  0xc3   : > { %6696 = vmatprep.mubr.msk.bf16.mxu0 %vm201_vm1, %v6866_v18  ;;  %6663 = vmatmul.mubr.msk.bf16.vlgmr.msra.gmra.mrb[80].mxu1 %vm201_vm1, %v6060_v37  ;;  %v3347_v46 = vsel %vm7025_vm6, %v3345_v39, %v3346_v30  ;;  %v3351_v48 = vsel %vm7025_vm6, %v6045_v31, %v3350_v35  ;;  %v6047_v49 = vrot.slane %v6009_v21, 9  ;;  %v3364_v50 = vrot.slane %v6010_v27, 5  ;;  %v6024_v19 = vld [vmem:[%s6960_s22 + $0x84] sm:$0xe]  ;;  %v6025_v20 = vld [vmem:[%s6960_s22 + $0x88] sm:$0xf] }
  0xc4   : > { %6729 = vmatpush3.bf16.msra.mxu1 %v4783_v34  ;;  %v6061_v55 = vcombine.low %v3344_v38, %v3347_v46  ;;  %v3354_v56 = vsel %vm7025_vm6, %v3352_v43, %v3353_v36  ;;  %v3359_v57 = vrot.slane %v3357_v11, 4  ;;  %v3367_v58 = vrot.slane %v6011_v32, 5  ;;  %v6026_v22 = vld [vmem:[%s6960_s22 + $0x8c] sm:$0x1]  ;;  %v6027_v23 = vld [vmem:[%s6960_s22 + $0x90] sm:$0xe] }
  0xc5   : > { %v3358_v61 = vsel %vm7025_vm6, %v6046_v40, %v3357_v11  ;;  %v3366_v62 = vrot.slane %v3364_v50, 4  ;;  %v6048_v63 = vrot.slane %v6012_v24, 9  ;;  %v5349_v4 = vsel %vm427_vm0, %v7415_v3, 0  ;;  %v6028_v27 = vld [vmem:[%s6960_s22 + $0x94] sm:$0xf]  ;;  %v6869_v33 = vld [vmem:[%s6960_s22 + $0x3c] sm:$0xff]  }
  0xc6   : > { %6666 = vmatprep.mubr.msk.bf16.mxu1 %vm201_vm1, %v6061_v55  ;;  %v3361_v7 = vsel %vm7025_vm6, %v3359_v57, %v3360_v44  ;;  %v3371_v8 = vrot.slane %v6013_v41, 5  ;;  %v3374_v9 = vrot.slane %v6014_v42, 5  ;;  %v6062_v12 = vcombine.low %v3351_v48, %v3354_v56  ;;  %v6029_v32 = vld [vmem:[%s6960_s22 + $0x98] sm:$0x1]  ;;  %v6030_v37 = vld [vmem:[%s6960_s22 + $0x9c] sm:$0xe] }
  0xc7   : > { %v6049_v13 = vrot.slane %v6015_v45, 9  ;;  %v3378_v5 = vrot.slane %v6016_v51, 5  ;;  %v3381_v14 = vrot.slane %v6017_v52, 5  ;;  %v6063_v15 = vcombine.low %v3358_v61, %v3361_v7  ;;  %v6031_v38 = vld [vmem:[%s6960_s22 + $0xa0] sm:$0xf]  ;;  %v6870_v11 = vld [vmem:[%s6960_s22 + $0x48] sm:$0xff]  }
  0xc8   : > { %v7543_v16 = vsel %vm7025_vm6, %v6047_v49, %v3364_v50  ;;  %v7547_v3 = vsel %vm7025_vm6, %v3366_v62, %v3367_v58  ;;  %v3373_v17 = vrot.slane %v3371_v8, 4  ;;  %v7555_v25 = vsel %vm7025_vm6, %v6048_v63, %v3371_v8  ;;  %v7580_v42 = vld [vmem:[%s6960_s22 + $0xa4] sm:$0x1]  ;;  %v7583_v43 = vld [vmem:[%s6960_s22 + $0xac] sm:$0xf] }
  0xc9   : > { %v3380_v26 = vrot.slane %v3378_v5, 4  ;;  %v6050_v18 = vrot.slane %v7523_v59, 9  ;;  %v3385_v21 = vrot.slane %v7526_v60, 5  ;;  %v3388_v29 = vrot.slane %v6020_v0, 5  ;;  %v7588_v48 = vld [vmem:[%s6960_s22 + $0xa8] sm:$0xe] }
  0xca   : > { %6697 = vmatmul.mubr.msk.bf16.vlgmr.msra.gmra.mrb[80].mxu0 %vm201_vm1, %v6867_v47  ;;  %v3375_v28 = vsel %vm7025_vm6, %v3373_v17, %v3374_v9  ;;  %v6051_v30 = vrot.slane %v6021_v1, 9  ;;  %v3392_v31 = vrot.slane %v6022_v2, 5  ;;  %v7568_v34 = vsel %vm7025_vm6, %v6049_v13, %v3378_v5  ;;  %v7591_v49 = vld [vmem:[%s6960_s22 + $0xb0] sm:$0x1]  ;;  %v7616_v0 = vld [vmem:[%s6960_s22 + $0xb4] sm:$0xe] }
  0xcb   : > { %6763 = vmatpush3.bf16.msra.mxu0 %v5349_v4  ;;  %6700 = vmatprep.mubr.msk.bf16.mxu0 %vm201_vm1, %v6868_v6  ;;  %v7572_v35 = vsel %vm7025_vm6, %v3380_v26, %v3381_v14  ;;  %v3387_v36 = vrot.slane %v3385_v21, 4  ;;  %v3395_v24 = vrot.slane %v6023_v10, 5  ;;  %v6064_v39 = vcombine.low %v7543_v16, %v7547_v3  ;;  %v7630_v7 = vld [vmem:[%s6960_s22 + $0xb8] sm:$0xf]  ;;  %v7633_v8 = vld [vmem:[%s6960_s22 + $0xbc] sm:$0x1] }
  0xcc   : > { %6667 = vmatmul.mubr.msk.bf16.gmra.mrb[84].mxu1 %vm201_vm1, %v6062_v12  ;;  %v3394_v40 = vrot.slane %v3392_v31, 4  ;;  %v6052_v41 = vrot.slane %v6024_v19, 9  ;;  %v6065_v44 = vcombine.low %v7555_v25, %v3375_v28  ;;  %v3399_v45 = vrot.slane %v6025_v20, 5  ;;  %v7643_v5 = vld [vmem:[%s6960_s22 + $0xc4] sm:$0xf] }
  0xcd   : > { %6670 = vmatprep.mubr.msk.bf16.mxu1 %vm201_vm1, %v6063_v15  ;;  %v3402_v46 = vrot.slane %v6026_v22, 5  ;;  %v6053_v47 = vrot.slane %v6027_v23, 9  ;;  %v6066_v50 = vcombine.low %v7568_v34, %v7572_v35  ;;  %v7597_v51 = vsel %vm7025_vm6, %v6050_v18, %v3385_v21  ;;  %v7653_v16 = vld [vmem:[%s6960_s22 + $0xc0] sm:$0xe]  ;;  %v7656_v3 = vld [vmem:[%s6960_s22 + $0xc8] sm:$0x1] }
  0xce   : > { %v3406_v52 = vrot.slane %v6028_v27, 5  ;;  %v3409_v55 = vrot.slane %v6029_v32, 5  ;;  %v7601_v56 = vsel %vm7025_vm6, %v3387_v36, %v3388_v29  ;;  %v7605_v57 = vsel %vm7025_vm6, %v6051_v30, %v3392_v31  ;;  %v6156_v26 = vld [vmem:[%s6960_s22 + $0x18] sm:$0xf]  ;;  %v6157_v18 = vld [vmem:[%s6960_s22 + $0x1c] sm:$0xf] }
  0xcf   : > { %v7609_v58 = vsel %vm7025_vm6, %v3394_v40, %v3395_v24  ;;  %v3401_v59 = vrot.slane %v3399_v45, 4  ;;  %v7613_v60 = vsel %vm7025_vm6, %v6052_v41, %v3399_v45  ;;  %v6054_v62 = vrot.slane %v6030_v37, 9  ;;  %v6871_v21 = vld [vmem:[%s6960_s22 + $0x54] sm:$0xff]   ;;  %v6158_v31 = vld [vmem:[%s6960_s22 + $0x20] sm:$0x1] }
  0xd0   : > { %v3408_v61 = vrot.slane %v3406_v52, 4  ;;  %v3413_v63 = vrot.slane %v6031_v38, 5  ;;  %v7625_v2 = vsel %vm7025_vm6, %v6053_v47, %v3406_v52  ;;  %v3416_v4 = vrot.slane %v7580_v42, 5  ;;  %v6872_v32 = vld [vmem:[%s6960_s22 + $0x60] sm:$0xff]   ;;  %v7737_v52 = vld [vmem:[%s6960_s22 + $0x28] sm:$0xf] }
  0xd1   : > { %v7621_v1 = vsel %vm7025_vm6, %v3401_v59, %v3402_v46  ;;  %v3420_v6 = vrot.slane %v7583_v43, 5  ;;  %v6055_v12 = vrot.slane %v7588_v48, 9  ;;  %v3423_v13 = vrot.slane %v7591_v49, 5  ;;  %v6159_v45 = vld [vmem:[%s6960_s22 + $0x24] sm:$0xf] }
  0xd2   : > { %6701 = vmatmul.mubr.msk.bf16.gmra.mrb[84].mxu0 %vm201_vm1, %v6869_v33  ;;  %v7638_v9 = vsel %vm7025_vm6, %v3408_v61, %v3409_v55  ;;  %v3415_v10 = vrot.slane %v3413_v63, 4  ;;  %v6067_v14 = vcombine.low %v7597_v51, %v7601_v56  ;;  %v6068_v19 = vcombine.low %v7605_v57, %v7609_v58 }
  0xd3   : > { %6704 = vmatprep.mubr.msk.bf16.mxu0 %vm201_vm1, %v6870_v11  ;;  %v3422_v15 = vrot.slane %v3420_v6, 4  ;;  %v6069_v17 = vcombine.low %v7613_v60, %v7621_v1  ;;  %v6070_v20 = vcombine.low %v7625_v2, %v7638_v9  ;;  %v7665_v22 = vsel %vm7025_vm6, %v6054_v62, %v3413_v63  ;;  %v6875_v60 = vld [vmem:[%s6960_s22 + $0x84] sm:$0xff]  }
  0xd4   : > { %6671 = vmatmul.mubr.msk.bf16.gmra.mrb[88].mxu1 %vm201_vm1, %v6064_v39  ;;  %v6906_v23 = vmov 0.0   ;;  %v3427_v25 = vrot.slane %v7630_v7, 5  ;;  %v7705_v27 = vsel %vm7025_vm6, %v3415_v10, %v3416_v4  ;;  %v6056_v28 = vrot.slane %v7616_v0, 9  ;;  %v6161_v7 = vld [vmem:[%s6960_s22 + $0x2c] sm:$0x1] }
  0xd5   : > { %6674 = vmatprep.mubr.msk.bf16.mxu1 %vm201_vm1, %v6065_v44  ;;  %220 = vst.msk [vmem:[#allocation2 + $0x90] sm:$0xff] %vm201_vm1, %v6906_v23  ;;  %202 = vst.msk [vmem:[#allocation2] sm:$0xff] %vm201_vm1, %v6906_v23  ;;  %v3430_v29 = vrot.slane %v7633_v8, 5  ;;  %v3434_v30 = vrot.slane %v7643_v5, 5  ;;  %v7716_v33 = vsel %vm7025_vm6, %v6055_v12, %v3420_v6  ;;  %v7720_v36 = vsel %vm7025_vm6, %v3422_v15, %v3423_v13  ;;  %v6873_v12 = vld [vmem:[%s6960_s22 + $0x6c] sm:$0xff]  }
  0xd6   : > { %203 = vst.msk [vmem:[#allocation2 + $0x8] sm:$0xff] %vm201_vm1, %v6906_v23  ;;  %204 = vst.msk [vmem:[#allocation2 + $0x10] sm:$0xff] %vm201_vm1, %v6906_v23  ;;  %v3429_v24 = vrot.slane %v3427_v25, 4  ;;  %v6057_v37 = vrot.slane %v7653_v16, 9  ;;  %v3437_v39 = vrot.slane %v7656_v3, 5  ;;  %v4269_v40 = vshrl.u32 %v6156_v26, 16 }
  0xd7   : > { %205 = vst.msk [vmem:[#allocation2 + $0x18] sm:$0xff] %vm201_vm1, %v6906_v23  ;;  %206 = vst.msk [vmem:[#allocation2 + $0x20] sm:$0xff] %vm201_vm1, %v6906_v23  ;;  %v3436_v38 = vrot.slane %v3434_v30, 4  ;;  %v4272_v41 = vshll.u32 %v6156_v26, 16  ;;  %v6071_v42 = vcombine.low %v7665_v22, %v7705_v27  ;;  %v4278_v43 = vshll.u32 %v6157_v18, 16 }
  0xd8   : > { %207 = vst.msk [vmem:[#allocation2 + $0x28] sm:$0xff] %vm201_vm1, %v6906_v23  ;;  %208 = vst.msk [vmem:[#allocation2 + $0x30] sm:$0xff] %vm201_vm1, %v6906_v23  ;;  %v4282_v11 = vshrl.u32 %v6157_v18, 16  ;;  %v4288_v44 = vshll.u32 %v6158_v31, 16  ;;  %v7730_v46 = vsel %vm7025_vm6, %v6056_v28, %v3427_v25  ;;  %v7734_v47 = vsel %vm7025_vm6, %v3429_v24, %v3430_v29  ;;  %v6237_v18 = vld [vmem:[%s6960_s22 + $0x18] sm:$0xe] }
  0xd9   : > { %209 = vst.msk [vmem:[#allocation2 + $0x38] sm:$0xff] %vm201_vm1, %v6906_v23  ;;  %210 = vst.msk [vmem:[#allocation2 + $0x40] sm:$0xff] %vm201_vm1, %v6906_v23  ;;  %v4271_v48 = vrot.slane %v4269_v40, 4  ;;  %v4274_v49 = vrot.slane %v4272_v41, 5  ;;  %v6072_v55 = vcombine.low %v7716_v33, %v7720_v36  ;;  %v7744_v59 = vsel %vm7025_vm6, %v6057_v37, %v3434_v30  ;;  %v6880_v33 = vld [vmem:[%s6960_s22 + $0xc0] sm:$0xff]  }
  0xda   : > { %211 = vst.msk [vmem:[#allocation2 + $0x48] sm:$0xff] %vm201_vm1, %v6906_v23  ;;  %212 = vst.msk [vmem:[#allocation2 + $0x50] sm:$0xff] %vm201_vm1, %v6906_v23  ;;  %6705 = vmatmul.mubr.msk.bf16.gmra.mrb[88].mxu0 %vm201_vm1, %v6871_v21  ;;  %v4280_v61 = vrot.slane %v4278_v43, 5  ;;  %v4284_v62 = vrot.slane %v4282_v11, 4  ;;  %v7752_v4 = vsel %vm7025_vm6, %v3436_v38, %v3437_v39  ;;  %v4293_v8 = vshrl.u32 %v6159_v45, 16  ;;  %v6874_v21 = vld [vmem:[%s6960_s22 + $0x78] sm:$0xff]  }
  0xdb   : > { %213 = vst.msk [vmem:[#allocation2 + $0x58] sm:$0xff] %vm201_vm1, %v6906_v23  ;;  %214 = vst.msk [vmem:[#allocation2 + $0x60] sm:$0xff] %vm201_vm1, %v6906_v23  ;;  %6708 = vmatprep.mubr.msk.bf16.mxu0 %vm201_vm1, %v6872_v32  ;;  %v4275_v6 = vor.u32 %v4274_v49, %v4271_v48  ;;  %v4296_v10 = vshll.u32 %v6159_v45, 16  ;;  %v4290_v15 = vrot.slane %v4288_v44, 5  ;;  %v4302_v16 = vshll.u32 %v7737_v52, 16 }
  0xdc   : > { %215 = vst.msk [vmem:[#allocation2 + $0x68] sm:$0xff] %vm201_vm1, %v6906_v23  ;;  %216 = vst.msk [vmem:[#allocation2 + $0x70] sm:$0xff] %vm201_vm1, %v6906_v23  ;;  %6675 = vmatmul.mubr.msk.bf16.gmra.mrb[92].mxu1 %vm201_vm1, %v6066_v50  ;;  %v284_v63 = vld [vmem:[#allocation2 + $0x90] sm:$0xff]  ;;  %v6073_v50 = vcombine.low %v7730_v46, %v7734_v47  ;;  %v4285_v5 = vor.u32 %v4284_v62, %v4280_v61  ;;  %v266_v26 = vld [vmem:[#allocation2] sm:$0xff]  ;;  %v4295_v56 = vrot.slane %v4293_v8, 4  ;;  %v4312_v37 = vshll.u32 %v6161_v7, 16 }
  0xdd   : > { %217 = vst.msk [vmem:[#allocation2 + $0x78] sm:$0xff] %vm201_vm1, %v6906_v23  ;;  %218 = vst.msk [vmem:[#allocation2 + $0x80] sm:$0xff] %vm201_vm1, %v6906_v23  ;;  %6678 = vmatprep.mubr.msk.bf16.mxu1 %vm201_vm1, %v6067_v14  ;;  %v268_v13 = vld [vmem:[#allocation2 + $0x10] sm:$0xff]  ;;  %v4276_v51 = vrot.slane %v4275_v6, 4  ;;  %v4306_v14 = vshrl.u32 %v7737_v52, 16  ;;  %v6074_v30 = vcombine.low %v7744_v59, %v7752_v4  ;;  %v267_v43 = vld [vmem:[#allocation2 + $0x8] sm:$0xff] }
  0xde   : > { %219 = vst.msk [vmem:[#allocation2 + $0x88] sm:$0xff] %vm201_vm1, %v6906_v23  ;;  %221 = vst.msk [vmem:[#allocation2 + $0x98] sm:$0xff] %vm201_vm1, %v6906_v23  ;;  %v269_v32 = vld [vmem:[#allocation2 + $0x18] sm:$0xff]  ;;  %v4286_v24 = vrot.slane %v4285_v5, 4  ;;  %v4298_v44 = vrot.slane %v4296_v10, 5  ;;  %v4314_v5 = vrot.slane %v4312_v37, 5 }
  0xdf   : > { %222 = vst.msk [vmem:[#allocation2 + $0xa0] sm:$0xff] %vm201_vm1, %v6906_v23  ;;  %223 = vst.msk [vmem:[#allocation2 + $0xa8] sm:$0xff] %vm201_vm1, %v6906_v23  ;;  %v4281_v11 = vsel %vm7032_vm7, %v4276_v51, %v4280_v61  ;;  %v6238_v45 = vld [vmem:[%s6960_s22 + $0x1c] sm:$0xf]  ;;  %v6162_v6 = vld [vmem:[%s6960_s22 + $0x30] sm:$0xf] }
  0xe0   : > { %224 = vst.msk [vmem:[#allocation2 + $0xb0] sm:$0xff] %vm201_vm1, %v6906_v23  ;;  %225 = vst.msk [vmem:[#allocation2 + $0xb8] sm:$0xff] %vm201_vm1, %v6906_v23  ;;  %v4291_v62 = vsel %vm7032_vm7, %v4286_v24, %v4290_v15  ;;  %v4299_v10 = vor.u32 %v4298_v44, %v4295_v56  ;;  %v6285_v15 = vrot.slane %v6237_v18, 9  ;;  %v4317_v51 = vshrl.u32 %v6162_v6, 16  ;;  %v272_v58 = vld [vmem:[#allocation2 + $0x30] sm:$0xff]  ;;  %v270_v37 = vld [vmem:[#allocation2 + $0x20] sm:$0xff] }
  0xe1   : > { %226 = vst.msk [vmem:[#allocation2 + $0xc0] sm:$0xff] %vm201_vm1, %v6906_v23  ;;  %227 = vst.msk [vmem:[#allocation2 + $0xc8] sm:$0xff] %vm201_vm1, %v6906_v23  ;;  %v7782_v8 = vcombine.low %v4281_v11, %v4291_v62  ;;  %v6164_v18 = vld [vmem:[%s6960_s22 + $0x38] sm:$0x1] }
  0xe2   : > { %228 = vst.msk [vmem:[#allocation2 + $0xd0] sm:$0xff] %vm201_vm1, %v6906_v23  ;;  %229 = vst.msk [vmem:[#allocation2 + $0xd8] sm:$0xff] %vm201_vm1, %v6906_v23  ;;  %6709 = vmatmul.mubr.msk.bf16.gmra.mrb[92].mxu0 %vm201_vm1, %v6873_v12  ;;  %v273_v44 = vld [vmem:[#allocation2 + $0x38] sm:$0xff]  ;;  %v278_v4 = vld [vmem:[#allocation2 + $0x60] sm:$0xff] }
  0xe3   : > { %230 = vst.msk [vmem:[#allocation2 + $0xe0] sm:$0xff] %vm201_vm1, %v6906_v23  ;;  %231 = vst.msk [vmem:[#allocation2 + $0xe8] sm:$0xff] %vm201_vm1, %v6906_v23  ;;  %6712 = vmatprep.mubr.msk.bf16.mxu0 %vm201_vm1, %v6874_v21  ;;  %v4320_v21 = vshll.u32 %v6162_v6, 16 }
  0xe4   : > { %232 = vst.msk [vmem:[#allocation2 + $0xf0] sm:$0xff] %vm201_vm1, %v6906_v23  ;;  %233 = vst.msk [vmem:[#allocation2 + $0xf8] sm:$0xff] %vm201_vm1, %v6906_v23  ;;  %v282_v0 = vld [vmem:[#allocation2 + $0x80] sm:$0xff]  ;;  %6679 = vmatmul.mubr.msk.bf16.gmra.mrb[96].mxu1 %vm201_vm1, %v6068_v19 }
  0xe5   : > { %v285_v35 = vld [vmem:[#allocation2 + $0x98] sm:$0xff]  ;;  %v283_v25 = vld [vmem:[#allocation2 + $0x88] sm:$0xff]  ;;  %6682 = vmatprep.mubr.msk.bf16.mxu1 %vm201_vm1, %v6069_v17 }
  0xe7   : > { %v6510_v34 = vpop.f32.mrb[0].mxu1  ;;  %v289_v57 = vld [vmem:[#allocation2 + $0xb8] sm:$0xff] }
  0xe8   : > { %v610_v3 = vadd.f32 %v6510_v34, %v284_v63  ;;  %v529_v23 = vpop.f32.mrb[1].mxu1  ;;  %v6494_v31 = vpop.f32.mrb[0].mxu0  ;;  %v7775_v63 = vrot.slane %v4302_v16, 5  ;;  %v4308_v34 = vrot.slane %v4306_v14, 4  ;;  %v5108_v16 = vrot.slane %v6238_v45, 5  ;;  %v291_v2 = vld [vmem:[#allocation2 + $0xc8] sm:$0xff] }
  0xe9   : > { %v608_v28 = vadd.f32 %v529_v23, %v282_v0  ;;  %v6511_v29 = vpop.f32.mrb[2].mxu1  ;;  %v594_v40 = vadd.f32 %v6494_v31, %v268_v13  ;;  %v465_v41 = vpop.f32.mrb[1].mxu0  ;;  %v6239_v0 = vld [vmem:[%s6960_s22 + $0x20] sm:$0x1]  ;;  %v288_v13 = vld [vmem:[#allocation2 + $0xb0] sm:$0xff]  ;;  %v4300_v23 = vrot.slane %v4299_v10, 4 }
  0xea   : > { %642 = vst.msk [vmem:[#allocation2 + $0x90] sm:$0xff] %vm201_vm1, %v610_v3  ;;  %v611_v38 = vadd.f32 %v6511_v29, %v285_v35  ;;  %v532_v39 = vpop.f32.mrb[3].mxu1  ;;  %v592_v49 = vadd.f32 %v465_v41, %v266_v26  ;;  %v6495_v52 = vpop.f32.mrb[2].mxu0  ;;  %v7785_v35 = vld [vmem:[%s6960_s22 + $0x34] sm:$0xf]  ;;  %v286_v3 = vld [vmem:[#allocation2 + $0xa0] sm:$0xff]  ;;  %v7803_v19 = vsel %vm7025_vm6, %v6285_v15, %v5108_v16  ;;  %6713 = vmatmul.mubr.msk.bf16.gmra.mrb[96].mxu0 %vm201_vm1, %v6875_v60 }
  0xeb   : > { %640 = vst.msk [vmem:[#allocation2 + $0x80] sm:$0xff] %vm201_vm1, %v608_v28  ;;  %v609_v48 = vadd.f32 %v532_v39, %v283_v25  ;;  %626 = vst.msk [vmem:[#allocation2 + $0x10] sm:$0xff] %vm201_vm1, %v594_v40  ;;  %v595_v61 = vadd.f32 %v6495_v52, %v269_v32  ;;  %v468_v7 = vpop.f32.mrb[3].mxu0  ;;  %v4309_v25 = vor.u32 %v4308_v34, %v7775_v63  ;;  %v5111_v26 = vrot.slane %v6239_v0, 5  ;;  %v7808_v29 = vld [vmem:[%s6960_s22 + $0x24] sm:$0xe] }
  0xec   : > { %643 = vst.msk [vmem:[#allocation2 + $0x98] sm:$0xff] %vm201_vm1, %v611_v38  ;;  %624 = vst.msk [vmem:[#allocation2] sm:$0xff] %vm201_vm1, %v592_v49  ;;  %v593_v12 = vadd.f32 %v468_v7, %v267_v43  ;;  %v5110_v14 = vrot.slane %v5108_v16, 4  ;;  %v4326_v28 = vshll.u32 %v7785_v35, 16  ;;  %v287_v31 = vld [vmem:[#allocation2 + $0xa8] sm:$0xff]  ;;  %v4305_v32 = vsel %vm7032_vm7, %v4300_v23, %v7775_v63  ;;  %v6876_v40 = vld [vmem:[%s6960_s22 + $0x90] sm:$0xff]   ;;  %6683 = vmatmul.mubr.msk.bf16.gmra.mrb[100].mxu1 %vm201_vm1, %v6070_v20 }
  0xed   : > { %641 = vst.msk [vmem:[#allocation2 + $0x88] sm:$0xff] %vm201_vm1, %v609_v48  ;;  %627 = vst.msk [vmem:[#allocation2 + $0x18] sm:$0xff] %vm201_vm1, %v595_v61  ;;  %v4310_v24 = vrot.slane %v4309_v25, 4  ;;  %v4319_v38 = vrot.slane %v4317_v51, 4  ;;  %v6241_v39 = vld [vmem:[%s6960_s22 + $0x28] sm:$0xf]  ;;  %6716 = vmatprep.mubr.msk.bf16.mxu0 %vm201_vm1, %v6876_v40  ;;  %6686 = vmatprep.mubr.msk.bf16.mxu1 %vm201_vm1, %v6071_v42 }
  0xee   : > { %625 = vst.msk [vmem:[#allocation2 + $0x8] sm:$0xff] %vm201_vm1, %v593_v12  ;;  %v7818_v45 = vsel %vm7025_vm6, %v5110_v14, %v5111_v26  ;;  %v4322_v48 = vrot.slane %v4320_v21, 5  ;;  %v7820_v49 = vrot.slane %v4326_v28, 5  ;;  %v271_v61 = vld [vmem:[#allocation2 + $0x28] sm:$0xff]  ;;  %v4330_v25 = vshrl.u32 %v7785_v35, 16  ;;  %v6877_v35 = vld [vmem:[%s6960_s22 + $0x9c] sm:$0xff]  }
  0xef   : > { %v6514_v56 = vpop.f32.mrb[4].mxu1  ;;  %v4315_v63 = vsel %vm7032_vm7, %v4310_v24, %v4314_v5  ;;  %v6302_v7 = vcombine.low %v7803_v19, %v7818_v45  ;;  %v6242_v10 = vld [vmem:[%s6960_s22 + $0x2c] sm:$0x1]  ;;  %v4336_v26 = vshll.u32 %v6164_v18, 16  ;;  %v6286_v51 = vrot.slane %v7808_v29, 9  ;;  %v290_v18 = vld [vmem:[#allocation2 + $0xc0] sm:$0xff] }
  0xf0   : > { %v614_v1 = vadd.f32 %v6514_v56, %v288_v13  ;;  %v545_v17 = vpop.f32.mrb[5].mxu1  ;;  %v6498_v11 = vpop.f32.mrb[4].mxu0  ;;  %v7829_v13 = vcombine.low %v4305_v32, %v4315_v63  ;;  %v4323_v16 = vor.u32 %v4322_v48, %v4319_v38  ;;  %v6166_v56 = vld [vmem:[%s6960_s22 + $0x40] sm:$0xf]  ;;  %v5115_v21 = vrot.slane %v6241_v39, 5  ;;  %v293_v29 = vld [vmem:[#allocation2 + $0xd8] sm:$0xff] }
  0xf1   : > { %v612_v41 = vadd.f32 %v545_v17, %v286_v3  ;;  %v6515_v43 = vpop.f32.mrb[6].mxu1  ;;  %v598_v0 = vadd.f32 %v6498_v11, %v272_v58  ;;  %v481_v6 = vpop.f32.mrb[5].mxu0  ;;  %v6165_v3 = vld [vmem:[%s6960_s22 + $0x3c] sm:$0xf]  ;;  %v5118_v28 = vrot.slane %v6242_v10, 5  ;;  %v4332_v60 = vrot.slane %v4330_v25, 4 }
  0xf2   : > { %646 = vst.msk [vmem:[#allocation2 + $0xb0] sm:$0xff] %vm201_vm1, %v614_v1  ;;  %v615_v52 = vadd.f32 %v6515_v43, %v289_v57  ;;  %v548_v62 = vpop.f32.mrb[7].mxu1  ;;  %v596_v12 = vadd.f32 %v481_v6, %v270_v37  ;;  %v6499_v15 = vpop.f32.mrb[6].mxu0  ;;  %v292_v57 = vld [vmem:[#allocation2 + $0xd0] sm:$0xff]  ;;  %v7841_v14 = vrot.slane %v4323_v16, 4  ;;  %v4338_v1 = vrot.slane %v4336_v26, 5  ;;  %6717 = vmatmul.mubr.msk.bf16.gmra.mrb[100].mxu0 %vm201_vm1, %v6877_v35 }
  0xf3   : > { %644 = vst.msk [vmem:[#allocation2 + $0xa0] sm:$0xff] %vm201_vm1, %v612_v41  ;;  %v613_v34 = vadd.f32 %v548_v62, %v287_v31  ;;  %630 = vst.msk [vmem:[#allocation2 + $0x30] sm:$0xff] %vm201_vm1, %v598_v0  ;;  %v599_v5 = vadd.f32 %v6499_v15, %v273_v44  ;;  %v484_v23 = vpop.f32.mrb[7].mxu0  ;;  %v4341_v17 = vshrl.u32 %v6165_v3, 16  ;;  %v4344_v31 = vshll.u32 %v6165_v3, 16  ;;  %v6878_v32 = vld [vmem:[%s6960_s22 + $0xa8] sm:$0xff]  }
  0xf4   : > { %647 = vst.msk [vmem:[#allocation2 + $0xb8] sm:$0xff] %vm201_vm1, %v615_v52  ;;  %628 = vst.msk [vmem:[#allocation2 + $0x20] sm:$0xff] %vm201_vm1, %v596_v12  ;;  %v597_v58 = vadd.f32 %v484_v23, %v271_v61  ;;  %v4329_v9 = vsel %vm7032_vm7, %v7841_v14, %v7820_v49  ;;  %v7861_v20 = vsel %vm7025_vm6, %v6286_v51, %v5115_v21  ;;  %v5117_v37 = vrot.slane %v5115_v21, 4  ;;  %v6167_v38 = vld [vmem:[%s6960_s22 + $0x44] sm:$0x1]  ;;  %v276_v43 = vld [vmem:[#allocation2 + $0x50] sm:$0xff] }
  0xf5   : > { %645 = vst.msk [vmem:[#allocation2 + $0xa8] sm:$0xff] %vm201_vm1, %v613_v34  ;;  %631 = vst.msk [vmem:[#allocation2 + $0x38] sm:$0xff] %vm201_vm1, %v599_v5  ;;  %v4350_v22 = vshll.u32 %v6166_v56, 16  ;;  %v4333_v39 = vor.u32 %v4332_v60, %v7820_v49  ;;  %v4343_v40 = vrot.slane %v4341_v17, 4  ;;  %v4346_v41 = vrot.slane %v4344_v31, 5  ;;  %v274_v11 = vld [vmem:[#allocation2 + $0x40] sm:$0xff]  ;;  %6720 = vmatprep.mubr.msk.bf16.mxu0 %vm201_vm1, %v6878_v32  ;;  %6687 = vmatmul.mubr.msk.bf16.gmra.mrb[104].mxu1 %vm201_vm1, %v6072_v55 }
  0xf6   : > { %629 = vst.msk [vmem:[#allocation2 + $0x28] sm:$0xff] %vm201_vm1, %v597_v58  ;;  %v277_v44 = vld [vmem:[#allocation2 + $0x58] sm:$0xff]  ;;  %v7867_v62 = vsel %vm7025_vm6, %v5117_v37, %v5118_v28  ;;  %v4354_v0 = vshrl.u32 %v6166_v56, 16  ;;  %v6243_v61 = vld [vmem:[%s6960_s22 + $0x30] sm:$0xe]  ;;  %v275_v3 = vld [vmem:[#allocation2 + $0x48] sm:$0xff]  ;;  %6690 = vmatprep.mubr.msk.bf16.mxu1 %vm201_vm1, %v6073_v50 }
  0xf7   : > { %v6518_v24 = vpop.f32.mrb[8].mxu1  ;;  %v7869_v63 = vrot.slane %v4350_v22, 5  ;;  %v4334_v34 = vrot.slane %v4333_v39, 4  ;;  %v6303_v12 = vcombine.low %v7861_v20, %v7867_v62  ;;  %v4347_v15 = vor.u32 %v4346_v41, %v4343_v40  ;;  %v6244_v5 = vld [vmem:[%s6960_s22 + $0x34] sm:$0xf] }
  0xf8   : > { %v618_v27 = vadd.f32 %v6518_v24, %v292_v57  ;;  %v561_v42 = vpop.f32.mrb[9].mxu1  ;;  %v6502_v6 = vpop.f32.mrb[8].mxu0  ;;  %v4356_v25 = vrot.slane %v4354_v0, 4  ;;  %v4360_v26 = vshll.u32 %v6167_v38, 16  ;;  %v6245_v57 = vld [vmem:[%s6960_s22 + $0x38] sm:$0x1] }
  0xf9   : > { %v616_v48 = vadd.f32 %v561_v42, %v290_v18  ;;  %v6519_v52 = vpop.f32.mrb[10].mxu1  ;;  %v497_v16 = vpop.f32.mrb[9].mxu0  ;;  %v602_v51 = vadd.f32 %v6502_v6, %v276_v43  ;;  %v4339_v58 = vsel %vm7032_vm7, %v4334_v34, %v4338_v1  ;;  %v4348_v14 = vrot.slane %v4347_v15, 4  ;;  %v6169_v60 = vld [vmem:[%s6960_s22 + $0x4c] sm:$0xf]  ;;  %v296_v1 = vld [vmem:[#allocation2 + $0xf0] sm:$0xff] }
  0xfa   : > { %650 = vst.msk [vmem:[#allocation2 + $0xd0] sm:$0xff] %vm201_vm1, %v618_v27  ;;  %v619_v49 = vadd.f32 %v6519_v52, %v293_v29  ;;  %v564_v10 = vpop.f32.mrb[11].mxu1  ;;  %v6503_v56 = vpop.f32.mrb[10].mxu0  ;;  %v600_v21 = vadd.f32 %v497_v16, %v274_v11  ;;  %v6168_v29 = vld [vmem:[%s6960_s22 + $0x48] sm:$0xf]  ;;  %v7886_v17 = vcombine.low %v4329_v9, %v4339_v58  ;;  %v4357_v35 = vor.u32 %v4356_v25, %v7869_v63  ;;  %v294_v9 = vld [vmem:[#allocation2 + $0xe0] sm:$0xff] }
  0xfb   : > { %648 = vst.msk [vmem:[#allocation2 + $0xc0] sm:$0xff] %vm201_vm1, %v616_v48  ;;  %v617_v23 = vadd.f32 %v564_v10, %v291_v2  ;;  %v603_v28 = vadd.f32 %v6503_v56, %v277_v44  ;;  %v500_v18 = vpop.f32.mrb[11].mxu0  ;;  %v4362_v31 = vrot.slane %v4360_v26, 5  ;;  %634 = vst.msk [vmem:[#allocation2 + $0x50] sm:$0xff] %vm201_vm1, %v602_v51  ;;  %v6879_v2 = vld [vmem:[%s6960_s22 + $0xb4] sm:$0xff]   ;;  %v4353_v32 = vsel %vm7032_vm7, %v4348_v14, %v7869_v63  ;;  %v295_v48 = vld [vmem:[#allocation2 + $0xe8] sm:$0xff] }
  0xfc   : > { %651 = vst.msk [vmem:[#allocation2 + $0xd8] sm:$0xff] %vm201_vm1, %v619_v49  ;;  %v601_v24 = vadd.f32 %v500_v18, %v275_v3  ;;  %632 = vst.msk [vmem:[#allocation2 + $0x40] sm:$0xff] %vm201_vm1, %v600_v21  ;;  %v6287_v37 = vrot.slane %v6243_v61, 9  ;;  %v5122_v38 = vrot.slane %v6244_v5, 5  ;;  %v5125_v22 = vrot.slane %v6245_v57, 5  ;;  %v297_v27 = vld [vmem:[#allocation2 + $0xf8] sm:$0xff]  ;;  %6721 = vmatmul.mubr.msk.bf16.gmra.mrb[104].mxu0 %vm201_vm1, %v6879_v2 }
  0xfd   : > { %649 = vst.msk [vmem:[#allocation2 + $0xc8] sm:$0xff] %vm201_vm1, %v617_v23  ;;  %635 = vst.msk [vmem:[#allocation2 + $0x58] sm:$0xff] %vm201_vm1, %v603_v28  ;;  %v4358_v36 = vrot.slane %v4357_v35, 4  ;;  %v6170_v42 = vld [vmem:[%s6960_s22 + $0x50] sm:$0x1]  ;;  %v4365_v39 = vshrl.u32 %v6168_v29, 16  ;;  %6724 = vmatprep.mubr.msk.bf16.mxu0 %vm201_vm1, %v6880_v33  ;;  %6691 = vmatmul.mubr.msk.bf16.gmra.mrb[108].mxu1 %vm201_vm1, %v6074_v30 }
  0xfe   : > { %633 = vst.msk [vmem:[#allocation2 + $0x48] sm:$0xff] %vm201_vm1, %v601_v24  ;;  %v4368_v40 = vshll.u32 %v6168_v29, 16  ;;  %v4374_v41 = vshll.u32 %v6169_v60, 16  ;;  %v6246_v43 = vld [vmem:[%s6960_s22 + $0x3c] sm:$0xe]  ;;  %v7910_v46 = vsel %vm7025_vm6, %v6287_v37, %v5122_v38  ;;  %v5124_v47 = vrot.slane %v5122_v38, 4  ;;  %6730 = vmatprep.mubr.msk.bf16.mxu1 %vm201_vm1, %v7782_v8 }
  0xff   : > { %v6522_v55 = vpop.f32.mrb[12].mxu1  ;;  %v4378_v50 = vshrl.u32 %v6169_v60, 16  ;;  %v6247_v52 = vld [vmem:[%s6960_s22 + $0x40] sm:$0xf]  ;;  %v4363_v63 = vsel %vm7032_vm7, %v4358_v36, %v4362_v31  ;;  %v4367_v61 = vrot.slane %v4365_v39, 4  ;;  %v4384_v28 = vshll.u32 %v6170_v42, 16 }
 0x100   : > { %v622_v11 = vadd.f32 %v6522_v55, %v296_v1  ;;  %v577_v44 = vpop.f32.mrb[13].mxu1  ;;  %v4370_v49 = vrot.slane %v4368_v40, 5  ;;  %v6248_v10 = vld [vmem:[%s6960_s22 + $0x44] sm:$0x1]  ;;  %v6506_v34 = vpop.f32.mrb[12].mxu0  ;;  %v7916_v15 = vcombine.low %v4353_v32, %v4363_v63  ;;  %v7921_v5 = vsel %vm7025_vm6, %v5124_v47, %v5125_v22  ;;  %v6881_v2 = vld [vmem:[%s6960_s22 + $0xcc] sm:$0xff]  }
 0x101   : > { %v620_v0 = vadd.f32 %v577_v44, %v294_v9  ;;  %v6523_v6 = vpop.f32.mrb[14].mxu1  ;;  %v4376_v23 = vrot.slane %v4374_v41, 5  ;;  %v6171_v25 = vld [vmem:[%s6960_s22 + $0x54] sm:$0xf]  ;;  %v513_v26 = vpop.f32.mrb[13].mxu0  ;;  %v6304_v56 = vcombine.low %v7910_v46, %v7921_v5  ;;  %v4380_v58 = vrot.slane %v4378_v50, 4 }
 0x102   : > { %654 = vst.msk [vmem:[#allocation2 + $0xf0] sm:$0xff] %vm201_vm1, %v622_v11  ;;  %v623_v16 = vadd.f32 %v6523_v6, %v297_v27  ;;  %v580_v3 = vpop.f32.mrb[15].mxu1  ;;  %v4371_v57 = vor.u32 %v4370_v49, %v4367_v61  ;;  %v6172_v14 = vld [vmem:[%s6960_s22 + $0x58] sm:$0xf]  ;;  %v6507_v21 = vpop.f32.mrb[14].mxu0  ;;  %v6288_v18 = vrot.slane %v6246_v43, 9 }
 0x103   : > { %652 = vst.msk [vmem:[#allocation2 + $0xe0] sm:$0xff] %vm201_vm1, %v620_v0  ;;  %v621_v51 = vadd.f32 %v580_v3, %v295_v48  ;;  %v5129_v29 = vrot.slane %v6247_v52, 5  ;;  %v5132_v60 = vrot.slane %v6248_v10, 5  ;;  %v516_v35 = vpop.f32.mrb[15].mxu0  ;;  %v4381_v1 = vor.u32 %v4380_v58, %v4376_v23  ;;  %v6173_v24 = vld [vmem:[%s6960_s22 + $0x5c] sm:$0x1] }
 0x104   : > { %655 = vst.msk [vmem:[#allocation2 + $0xf8] sm:$0xff] %vm201_vm1, %v623_v16  ;;  %v4372_v31 = vrot.slane %v4371_v57, 4  ;;  %v4389_v32 = vshrl.u32 %v6171_v25, 16  ;;  %v4392_v9 = vshll.u32 %v6171_v25, 16  ;;  %v4386_v37 = vrot.slane %v4384_v28, 5  ;;  %v280_v36 = vld [vmem:[#allocation2 + $0x70] sm:$0xff]  ;;  %6725 = vmatmul.mubr.msk.bf16.gmra.mrb[108].mxu0 %vm201_vm1, %v6881_v2 }
 0x105   : > { %653 = vst.msk [vmem:[#allocation2 + $0xe8] sm:$0xff] %vm201_vm1, %v621_v51  ;;  %v7940_v38 = vsel %vm7025_vm6, %v6288_v18, %v5129_v29  ;;  %v5131_v22 = vrot.slane %v5129_v29, 4  ;;  %v4398_v33 = vshll.u32 %v6172_v14, 16  ;;  %v4382_v27 = vrot.slane %v4381_v1, 4  ;;  %v281_v39 = vld [vmem:[#allocation2 + $0x78] sm:$0xff]  ;;  %v1093_v8 = vld [vmem:[#allocation2 + $0x10] sm:$0xff]  ;;  %6764 = vmatprep.mubr.msk.bf16.mxu0 %vm201_vm1, %v6302_v7  ;;  %6731 = vmatmul.mubr.msk.bf16.vlgmr.msra.gmra.mrb[112].mxu1 %vm201_vm1, %v7829_v13 }
 0x106   : > { %v4377_v55 = vsel %vm7032_vm7, %v4372_v31, %v4376_v23  ;;  %v4391_v42 = vrot.slane %v4389_v32, 4  ;;  %v4394_v59 = vrot.slane %v4392_v9, 5  ;;  %v4402_v43 = vshrl.u32 %v6172_v14, 16  ;;  %v1091_v44 = vld [vmem:[#allocation2] sm:$0xff]  ;;  %v279_v47 = vld [vmem:[#allocation2 + $0x68] sm:$0xff]  ;;  %v1094_v6 = vld [vmem:[#allocation2 + $0x18] sm:$0xff]  ;;  %6734 = vmatprep.mubr.msk.bf16.mxu1 %vm201_vm1, %v7886_v17 }
 0x107   : > { %v6528_v30 = vpop.f32.mrb[16].mxu1  ;;  %v7948_v40 = vsel %vm7025_vm6, %v5131_v22, %v5132_v60  ;;  %v7950_v41 = vrot.slane %v4398_v33, 5  ;;  %v4408_v11 = vshll.u32 %v6173_v24, 16  ;;  %v4387_v50 = vsel %vm7032_vm7, %v4382_v27, %v4386_v37  ;;  %v1092_v49 = vld [vmem:[#allocation2 + $0x8] sm:$0xff]  ;;  %v6251_v14 = vld [vmem:[%s6960_s22 + $0x50] sm:$0x1] }
 0x108   : > { %v1258_v48 = vpop.f32.mrb[17].mxu1  ;;  %v6305_v52 = vcombine.low %v7940_v38, %v7948_v40  ;;  %v4395_v63 = vor.u32 %v4394_v59, %v4391_v42  ;;  %v606_v0 = vadd.f32 %v6506_v34, %v280_v36  ;;  %v6249_v10 = vld [vmem:[%s6960_s22 + $0x48] sm:$0xe]  ;;  %v6250_v16 = vld [vmem:[%s6960_s22 + $0x4c] sm:$0xf]  ;;  %v7958_v3 = vpop.f32.mrb[16].mxu0  ;;  %v7960_v23 = vcombine.low %v4377_v55, %v4387_v50 }
 0x109   : > { %v6529_v61 = vpop.f32.mrb[18].mxu1  ;;  %v4404_v25 = vrot.slane %v4402_v43, 4  ;;  %v4410_v51 = vrot.slane %v4408_v11, 5  ;;  %v604_v57 = vadd.f32 %v513_v26, %v278_v4  ;;  %v7963_v28 = vpop.f32.mrb[17].mxu0  ;;  %v1387_v18 = vadd.f32 %v6528_v30, %v1093_v8  ;;  %v6174_v31 = vld [vmem:[%s6960_s22 + $0x60] sm:$0xf] }
 0x10a   : > { %v1261_v58 = vpop.f32.mrb[19].mxu1  ;;  %v4396_v34 = vrot.slane %v4395_v63, 4  ;;  %638 = vst.msk [vmem:[#allocation2 + $0x70] sm:$0xff] %vm201_vm1, %v606_v0  ;;  %v607_v29 = vadd.f32 %v6507_v21, %v281_v39  ;;  %v1385_v60 = vadd.f32 %v1258_v48, %v1091_v44  ;;  %v6175_v1 = vld [vmem:[%s6960_s22 + $0x64] sm:$0xf]  ;;  %v7968_v24 = vpop.f32.mrb[18].mxu0  ;;  %v605_v32 = vadd.f32 %v516_v35, %v279_v47 }
 0x10b   : > { %v4405_v26 = vor.u32 %v4404_v25, %v7950_v41  ;;  %636 = vst.msk [vmem:[#allocation2 + $0x60] sm:$0xff] %vm201_vm1, %v604_v57  ;;  %v1388_v9 = vadd.f32 %v6529_v61, %v1094_v6  ;;  %v1386_v37 = vadd.f32 %v1261_v58, %v1092_v49  ;;  %v6176_v22 = vld [vmem:[%s6960_s22 + $0x68] sm:$0x1]  ;;  %v7974_v33 = vpop.f32.mrb[19].mxu0  ;;  %1419 = vst.msk [vmem:[#allocation2 + $0x10] sm:$0xff] %vm201_vm1, %v1387_v18  ;;  %v6289_v35 = vrot.slane %v6249_v10, 9 }
 0x10c   : > { %v4401_v21 = vsel %vm7032_vm7, %v4396_v34, %v7950_v41  ;;  %639 = vst.msk [vmem:[#allocation2 + $0x78] sm:$0xff] %vm201_vm1, %v607_v29  ;;  %1417 = vst.msk [vmem:[#allocation2] sm:$0xff] %vm201_vm1, %v1385_v60  ;;  %v5136_v2 = vrot.slane %v6250_v16, 5  ;;  %v5139_v36 = vrot.slane %v6251_v14, 5  ;;  %v6252_v55 = vld [vmem:[%s6960_s22 + $0x54] sm:$0xe]  ;;  %6765 = vmatmul.mubr.msk.bf16.vlgmr.msra.gmra.mrb[112].mxu0 %vm201_vm1, %v6303_v12 }
 0x10d   : > { %v4406_v19 = vrot.slane %v4405_v26, 4  ;;  %637 = vst.msk [vmem:[#allocation2 + $0x68] sm:$0xff] %vm201_vm1, %v605_v32  ;;  %1420 = vst.msk [vmem:[#allocation2 + $0x18] sm:$0xff] %vm201_vm1, %v1388_v9  ;;  %v4413_v45 = vshrl.u32 %v6174_v31, 16  ;;  %v4416_v7 = vshll.u32 %v6174_v31, 16  ;;  %v4422_v27 = vshll.u32 %v6175_v1, 16  ;;  %6768 = vmatprep.mubr.msk.bf16.mxu0 %vm201_vm1, %v6304_v56  ;;  %6735 = vmatmul.mubr.msk.bf16.gmra.mrb[116].mxu1 %vm201_vm1, %v7916_v15 }
 0x10e   : > { %1418 = vst.msk [vmem:[#allocation2 + $0x8] sm:$0xff] %vm201_vm1, %v1386_v37  ;;  %v6253_v42 = vld [vmem:[%s6960_s22 + $0x58] sm:$0xf]  ;;  %v7997_v59 = vsel %vm7025_vm6, %v6289_v35, %v5136_v2  ;;  %v5138_v13 = vrot.slane %v5136_v2, 4  ;;  %v4426_v4 = vshrl.u32 %v6175_v1, 16  ;;  %v4432_v30 = vshll.u32 %v6176_v22, 16  ;;  %6738 = vmatprep.mubr.msk.bf16.mxu1 %vm201_vm1, %v7960_v23 }
 0x10f   : > { %v6254_v39 = vld [vmem:[%s6960_s22 + $0x5c] sm:$0x1]  ;;  %v4411_v41 = vsel %vm7032_vm7, %v4406_v19, %v4410_v51  ;;  %v4415_v43 = vrot.slane %v4413_v45, 4  ;;  %v4418_v11 = vrot.slane %v4416_v7, 5  ;;  %v4424_v8 = vrot.slane %v4422_v27, 5  ;;  %v6532_v48 = vpop.f32.mrb[20].mxu1 }
 0x110   : > { %v6177_v44 = vld [vmem:[%s6960_s22 + $0x6c] sm:$0xf]  ;;  %v8003_v47 = vcombine.low %v4401_v21, %v4411_v41  ;;  %v8007_v17 = vsel %vm7025_vm6, %v5138_v13, %v5139_v36  ;;  %v4428_v50 = vrot.slane %v4426_v4, 4  ;;  %v4434_v63 = vrot.slane %v4432_v30, 5  ;;  %v6178_v0 = vld [vmem:[%s6960_s22 + $0x70] sm:$0xf] }
 0x111   : > { %v1274_v6 = vpop.f32.mrb[21].mxu1  ;;  %v6306_v61 = vcombine.low %v7997_v59, %v8007_v17  ;;  %v4419_v49 = vor.u32 %v4418_v11, %v4415_v43  ;;  %v6290_v10 = vrot.slane %v6252_v55, 9  ;;  %v5143_v16 = vrot.slane %v6253_v42, 5  ;;  %v6179_v58 = vld [vmem:[%s6960_s22 + $0x74] sm:$0x1]  ;;  %v1095_v21 = vld [vmem:[#allocation2 + $0x20] sm:$0xff] }
 0x112   : > { %v6533_v25 = vpop.f32.mrb[22].mxu1  ;;  %v4429_v51 = vor.u32 %v4428_v50, %v4424_v8  ;;  %v5146_v57 = vrot.slane %v6254_v39, 5  ;;  %v4437_v14 = vshrl.u32 %v6177_v44, 16  ;;  %v4440_v34 = vshll.u32 %v6177_v44, 16  ;;  %v1662_v22 = vld [vmem:[#allocation2 + $0x10] sm:$0xff]  ;;  %v8035_v35 = vpop.f32.mrb[20].mxu0 }
 0x113   : > { %v1277_v18 = vpop.f32.mrb[23].mxu1  ;;  %v4420_v29 = vrot.slane %v4419_v49, 4  ;;  %v8019_v60 = vsel %vm7025_vm6, %v6290_v10, %v5143_v16  ;;  %v5145_v31 = vrot.slane %v5143_v16, 4  ;;  %v4446_v1 = vshll.u32 %v6178_v0, 16  ;;  %v1097_v5 = vld [vmem:[#allocation2 + $0x30] sm:$0xff]  ;;  %v1660_v56 = vld [vmem:[#allocation2] sm:$0xff] }
 0x114   : > { %v4430_v26 = vrot.slane %v4429_v51, 4  ;;  %v4439_v32 = vrot.slane %v4437_v14, 4  ;;  %v4442_v9 = vrot.slane %v4440_v34, 5  ;;  %v4450_v37 = vshrl.u32 %v6178_v0, 16  ;;  %v1663_v19 = vld [vmem:[#allocation2 + $0x18] sm:$0xff]  ;;  %v1096_v27 = vld [vmem:[#allocation2 + $0x28] sm:$0xff]  ;;  %6769 = vmatmul.mubr.msk.bf16.gmra.mrb[116].mxu0 %vm201_vm1, %v6305_v52 }
 0x115   : > { %v4425_v20 = vsel %vm7032_vm7, %v4420_v29, %v4424_v8  ;;  %v8031_v62 = vsel %vm7025_vm6, %v5145_v31, %v5146_v57  ;;  %v8033_v12 = vrot.slane %v4446_v1, 5  ;;  %v4456_v46 = vshll.u32 %v6179_v58, 16  ;;  %v1098_v45 = vld [vmem:[#allocation2 + $0x38] sm:$0xff]  ;;  %v1661_v7 = vld [vmem:[#allocation2 + $0x8] sm:$0xff]  ;;  %v6255_v42 = vld [vmem:[%s6960_s22 + $0x60] sm:$0xe]  ;;  %6772 = vmatprep.mubr.msk.bf16.mxu0 %vm201_vm1, %v6306_v61  ;;  %6739 = vmatmul.mubr.msk.bf16.gmra.mrb[120].mxu1 %vm201_vm1, %v8003_v47 }
 0x116   : > { %v4435_v15 = vsel %vm7032_vm7, %v4430_v26, %v4434_v63  ;;  %v6307_v2 = vcombine.low %v8019_v60, %v8031_v62  ;;  %v4443_v36 = vor.u32 %v4442_v9, %v4439_v32  ;;  %v4452_v55 = vrot.slane %v4450_v37, 4  ;;  %v8044_v13 = vpop.f32.mrb[21].mxu0  ;;  %v6256_v41 = vld [vmem:[%s6960_s22 + $0x64] sm:$0xf]  ;;  %v6257_v43 = vld [vmem:[%s6960_s22 + $0x68] sm:$0x1] }
 0x117   : > { %v6211_v4 = vcombine.low %v4425_v20, %v4435_v15  ;;  %v4458_v23 = vrot.slane %v4456_v46, 5  ;;  %v1956_v30 = vadd.f32 %v7958_v3, %v1662_v22  ;;  %v1391_v39 = vadd.f32 %v6532_v48, %v1097_v5  ;;  %v8049_v11 = vpop.f32.mrb[22].mxu0  ;;  %v6180_v0 = vld [vmem:[%s6960_s22 + $0x78] sm:$0xf]  ;;  %v6181_v49 = vld [vmem:[%s6960_s22 + $0x7c] sm:$0xf] }
 0x118   : > { %v4444_v8 = vrot.slane %v4443_v36, 4  ;;  %v4453_v44 = vor.u32 %v4452_v55, %v8033_v12  ;;  %v1954_v50 = vadd.f32 %v7963_v28, %v1660_v56  ;;  %v1389_v63 = vadd.f32 %v1274_v6, %v1095_v21  ;;  %v8055_v10 = vpop.f32.mrb[23].mxu0  ;;  %v6182_v57 = vld [vmem:[%s6960_s22 + $0x80] sm:$0x1]  ;;  %v6258_v58 = vld [vmem:[%s6960_s22 + $0x6c] sm:$0xe] }
 0x119   : > { %1988 = vst.msk [vmem:[#allocation2 + $0x10] sm:$0xff] %vm201_vm1, %v1956_v30  ;;  %1423 = vst.msk [vmem:[#allocation2 + $0x30] sm:$0xff] %vm201_vm1, %v1391_v39  ;;  %v1957_v3 = vadd.f32 %v7968_v24, %v1663_v19  ;;  %v1392_v48 = vadd.f32 %v6533_v25, %v1098_v45  ;;  %v1955_v16 = vadd.f32 %v7974_v33, %v1661_v7  ;;  %v6291_v14 = vrot.slane %v6255_v42, 9  ;;  %v6259_v29 = vld [vmem:[%s6960_s22 + $0x70] sm:$0xf]  ;;  %v8077_v31 = vpop.f32.mrb[24].mxu1 }
 0x11a   : > { %v1390_v51 = vadd.f32 %v1277_v18, %v1096_v27  ;;  %v4449_v28 = vsel %vm7032_vm7, %v4444_v8, %v8033_v12  ;;  %v4454_v6 = vrot.slane %v4453_v44, 4  ;;  %1986 = vst.msk [vmem:[#allocation2] sm:$0xff] %vm201_vm1, %v1954_v50  ;;  %1421 = vst.msk [vmem:[#allocation2 + $0x20] sm:$0xff] %vm201_vm1, %v1389_v63  ;;  %v5150_v34 = vrot.slane %v6256_v41, 5  ;;  %v6260_v26 = vld [vmem:[%s6960_s22 + $0x74] sm:$0x1]  ;;  %6742 = vmatprep.mubr.msk.bf16.mxu1 %vm201_vm1, %v6211_v4 }
 0x11b   : > { %1989 = vst.msk [vmem:[#allocation2 + $0x18] sm:$0xff] %vm201_vm1, %v1957_v3  ;;  %1424 = vst.msk [vmem:[#allocation2 + $0x38] sm:$0xff] %vm201_vm1, %v1392_v48  ;;  %v5153_v24 = vrot.slane %v6257_v43, 5  ;;  %v4461_v33 = vshrl.u32 %v6180_v0, 16  ;;  %v4464_v25 = vshll.u32 %v6180_v0, 16  ;;  %v4470_v18 = vshll.u32 %v6181_v49, 16 }
 0x11c   : > { %1987 = vst.msk [vmem:[#allocation2 + $0x8] sm:$0xff] %vm201_vm1, %v1955_v16  ;;  %1422 = vst.msk [vmem:[#allocation2 + $0x28] sm:$0xff] %vm201_vm1, %v1390_v51  ;;  %v4459_v38 = vsel %vm7032_vm7, %v4454_v6, %v4458_v23  ;;  %v5151_v40 = vsel %vm7025_vm6, %v6291_v14, %v5150_v34  ;;  %v5152_v52 = vrot.slane %v5150_v34, 4  ;;  %v4474_v1 = vshrl.u32 %v6181_v49, 16  ;;  %v8088_v32 = vpop.f32.mrb[25].mxu1  ;;  %v8100_v23 = vpop.f32.mrb[24].mxu0  ;;  %6773 = vmatmul.mubr.msk.bf16.gmra.mrb[120].mxu0 %vm201_vm1, %v6307_v2 }
 0x11d   : > { %v6212_v9 = vcombine.low %v4449_v28, %v4459_v38  ;;  %v4463_v37 = vrot.slane %v4461_v33, 4  ;;  %v4466_v59 = vrot.slane %v4464_v25, 5  ;;  %v4472_v17 = vrot.slane %v4470_v18, 5  ;;  %v6183_v61 = vld [vmem:[%s6960_s22 + $0x84] sm:$0xf]  ;;  %v8093_v22 = vpop.f32.mrb[26].mxu1 }
 0x11e   : > { %v5154_v20 = vsel %vm7025_vm6, %v5152_v52, %v5153_v24  ;;  %v4476_v12 = vrot.slane %v4474_v1, 4  ;;  %v4480_v46 = vshll.u32 %v6182_v57, 16  ;;  %v6292_v5 = vrot.slane %v6258_v58, 9  ;;  %v6184_v56 = vld [vmem:[%s6960_s22 + $0x88] sm:$0xf]  ;;  %v1293_v21 = vpop.f32.mrb[27].mxu1 }
 0x11f   : > { %v6308_v15 = vcombine.low %v5151_v40, %v5154_v20  ;;  %v4467_v47 = vor.u32 %v4466_v59, %v4463_v37  ;;  %v5157_v36 = vrot.slane %v6259_v29, 5  ;;  %v5160_v55 = vrot.slane %v6260_v26, 5  ;;  %v6185_v7 = vld [vmem:[%s6960_s22 + $0x8c] sm:$0x1]  ;;  %v8106_v43 = vpop.f32.mrb[25].mxu0  ;;  %v1101_v51 = vld [vmem:[#allocation2 + $0x50] sm:$0xff]  ;;  %6743 = vmatmul.mubr.msk.bf16.gmra.mrb[124].mxu1 %vm201_vm1, %v6212_v9 }
 0x120   : > { %v4477_v19 = vor.u32 %v4476_v12, %v4472_v17  ;;  %v4482_v45 = vrot.slane %v4480_v46, 5  ;;  %v4485_v27 = vshrl.u32 %v6183_v61, 16  ;;  %v4488_v42 = vshll.u32 %v6183_v61, 16  ;;  %v1666_v0 = vld [vmem:[#allocation2 + $0x30] sm:$0xff]  ;;  %v1099_v58 = vld [vmem:[#allocation2 + $0x40] sm:$0xff]  ;;  %v8120_v28 = vpop.f32.mrb[26].mxu0 }
 0x121   : > { %v4468_v4 = vrot.slane %v4467_v47, 4  ;;  %v8104_v30 = vsel %vm7025_vm6, %v6292_v5, %v5157_v36  ;;  %v5159_v39 = vrot.slane %v5157_v36, 4  ;;  %v4494_v41 = vshll.u32 %v6184_v56, 16  ;;  %v1664_v57 = vld [vmem:[#allocation2 + $0x20] sm:$0xff]  ;;  %6776 = vmatprep.mubr.msk.bf16.mxu0 %vm201_vm1, %v6308_v15  ;;  %v6261_v29 = vld [vmem:[%s6960_s22 + $0x78] sm:$0xe] }
 0x122   : > { %v4478_v8 = vrot.slane %v4477_v19, 4  ;;  %v4487_v44 = vrot.slane %v4485_v27, 4  ;;  %v4490_v50 = vrot.slane %v4488_v42, 5  ;;  %v4498_v63 = vshrl.u32 %v6184_v56, 16  ;;  %v1667_v14 = vld [vmem:[#allocation2 + $0x38] sm:$0xff]  ;;  %v8128_v24 = vpop.f32.mrb[27].mxu0 }
 0x123   : > { %v4473_v49 = vsel %vm7032_vm7, %v4468_v4, %v4472_v17  ;;  %v8116_v3 = vsel %vm7025_vm6, %v5159_v39, %v5160_v55  ;;  %v8118_v48 = vrot.slane %v4494_v41, 5  ;;  %v4504_v16 = vshll.u32 %v6185_v7, 16  ;;  %v1665_v34 = vld [vmem:[#allocation2 + $0x28] sm:$0xff]  ;;  %v1102_v40 = vld [vmem:[#allocation2 + $0x58] sm:$0xff]  ;;  %v6263_v1 = vld [vmem:[%s6960_s22 + $0x80] sm:$0x1] }
 0x124   : > { %v4483_v60 = vsel %vm7032_vm7, %v4478_v8, %v4482_v45  ;;  %v6309_v62 = vcombine.low %v8104_v30, %v8116_v3  ;;  %v4491_v2 = vor.u32 %v4490_v50, %v4487_v44  ;;  %v4500_v6 = vrot.slane %v4498_v63, 4  ;;  %v6262_v52 = vld [vmem:[%s6960_s22 + $0x7c] sm:$0xf]  ;;  %v1100_v61 = vld [vmem:[#allocation2 + $0x48] sm:$0xff]  ;;  %v6186_v9 = vld [vmem:[%s6960_s22 + $0x90] sm:$0xf] }
 0x125   : > { %v6213_v33 = vcombine.low %v4473_v49, %v4483_v60  ;;  %v4506_v25 = vrot.slane %v4504_v16, 5  ;;  %v1960_v18 = vadd.f32 %v8035_v35, %v1666_v0  ;;  %v1395_v38 = vadd.f32 %v8077_v31, %v1101_v51  ;;  %v6187_v20 = vld [vmem:[%s6960_s22 + $0x94] sm:$0xf]  ;;  %v6264_v5 = vld [vmem:[%s6960_s22 + $0x84] sm:$0xe]  ;;  %v8176_v51 = vpop.f32.mrb[28].mxu0 }
 0x126   : > { %v4492_v26 = vrot.slane %v4491_v2, 4  ;;  %v4501_v37 = vor.u32 %v4500_v6, %v8118_v48  ;;  %v1958_v59 = vadd.f32 %v8044_v13, %v1664_v57  ;;  %v1393_v17 = vadd.f32 %v8088_v32, %v1099_v58  ;;  %v6188_v13 = vld [vmem:[%s6960_s22 + $0x98] sm:$0x1]  ;;  %v8148_v32 = vpop.f32.mrb[28].mxu1  ;;  %v6266_v30 = vld [vmem:[%s6960_s22 + $0x8c] sm:$0x1]  ;;  %6777 = vmatmul.mubr.msk.bf16.gmra.mrb[124].mxu0 %vm201_vm1, %v6309_v62 }
 0x127   : > { %6746 = vmatprep.mubr.msk.bf16.mxu1 %vm201_vm1, %v6213_v33  ;;  %1992 = vst.msk [vmem:[#allocation2 + $0x30] sm:$0xff] %vm201_vm1, %v1960_v18  ;;  %1427 = vst.msk [vmem:[#allocation2 + $0x50] sm:$0xff] %vm201_vm1, %v1395_v38  ;;  %v1961_v35 = vadd.f32 %v8049_v11, %v1667_v14  ;;  %v1396_v31 = vadd.f32 %v8093_v22, %v1102_v40  ;;  %v1959_v12 = vadd.f32 %v8055_v10, %v1665_v34  ;;  %v6265_v22 = vld [vmem:[%s6960_s22 + $0x88] sm:$0xf]  ;;  %v8156_v36 = vpop.f32.mrb[29].mxu1  ;;  %v8179_v2 = vpop.f32.mrb[29].mxu0 }
 0x128   : > { %v1394_v46 = vadd.f32 %v1293_v21, %v1100_v61  ;;  %v4497_v56 = vsel %vm7032_vm7, %v4492_v26, %v8118_v48  ;;  %v4502_v15 = vrot.slane %v4501_v37, 4  ;;  %1990 = vst.msk [vmem:[#allocation2 + $0x20] sm:$0xff] %vm201_vm1, %v1958_v59  ;;  %1425 = vst.msk [vmem:[#allocation2 + $0x40] sm:$0xff] %vm201_vm1, %v1393_v17  ;;  %v6293_v47 = vrot.slane %v6261_v29, 9  ;;  %v8162_v45 = vpop.f32.mrb[30].mxu1 }
 0x129   : > { %v5164_v11 = vrot.slane %v6262_v52, 5  ;;  %1993 = vst.msk [vmem:[#allocation2 + $0x38] sm:$0xff] %vm201_vm1, %v1961_v35  ;;  %1428 = vst.msk [vmem:[#allocation2 + $0x58] sm:$0xff] %vm201_vm1, %v1396_v31  ;;  %v5167_v10 = vrot.slane %v6263_v1, 5  ;;  %v4509_v21 = vshrl.u32 %v6186_v9, 16  ;;  %v4512_v55 = vshll.u32 %v6186_v9, 16 }
 0x12a   : > { %1991 = vst.msk [vmem:[#allocation2 + $0x28] sm:$0xff] %vm201_vm1, %v1959_v12  ;;  %1426 = vst.msk [vmem:[#allocation2 + $0x48] sm:$0xff] %vm201_vm1, %v1394_v46  ;;  %v4518_v19 = vshll.u32 %v6187_v20, 16  ;;  %v4507_v7 = vsel %vm7032_vm7, %v4502_v15, %v4506_v25  ;;  %v4522_v4 = vshrl.u32 %v6187_v20, 16  ;;  %v8169_v39 = vpop.f32.mrb[31].mxu1  ;;  %v4528_v3 = vshll.u32 %v6188_v13, 16 }
 0x12b   : > { %v5165_v27 = vsel %vm7025_vm6, %v6293_v47, %v5164_v11  ;;  %v5166_v42 = vrot.slane %v5164_v11, 4  ;;  %v6214_v41 = vcombine.low %v4497_v56, %v4507_v7  ;;  %v4511_v8 = vrot.slane %v4509_v21, 4  ;;  %v6189_v63 = vld [vmem:[%s6960_s22 + $0x9c] sm:$0xf]  ;;  %v6190_v16 = vld [vmem:[%s6960_s22 + $0xa0] sm:$0xf] }
 0x12c   : > { %v4514_v44 = vrot.slane %v4512_v55, 5  ;;  %v4520_v50 = vrot.slane %v4518_v19, 5  ;;  %v4524_v49 = vrot.slane %v4522_v4, 4  ;;  %v6294_v48 = vrot.slane %v6264_v5, 9  ;;  %v6191_v34 = vld [vmem:[%s6960_s22 + $0xa4] sm:$0x1] }
 0x12d   : > { %v5168_v0 = vsel %vm7025_vm6, %v5166_v42, %v5167_v10  ;;  %6747 = vmatmul.mubr.msk.bf16.gmra.mrb[128].mxu1 %vm201_vm1, %v6214_v41  ;;  %v5171_v60 = vrot.slane %v6265_v22, 5  ;;  %v5174_v62 = vrot.slane %v6266_v30, 5  ;;  %v4530_v14 = vrot.slane %v4528_v3, 5  ;;  %v8182_v25 = vpop.f32.mrb[30].mxu0  ;;  %v1105_v12 = vld [vmem:[#allocation2 + $0x70] sm:$0xff]  ;;  %v1103_v13 = vld [vmem:[#allocation2 + $0x60] sm:$0xff] }
 0x12e   : > { %v6310_v57 = vcombine.low %v5165_v27, %v5168_v0  ;;  %v4515_v58 = vor.u32 %v4514_v44, %v4511_v8  ;;  %v4525_v6 = vor.u32 %v4524_v49, %v4520_v50  ;;  %v4533_v29 = vshrl.u32 %v6189_v63, 16  ;;  %v8187_v1 = vpop.f32.mrb[31].mxu0  ;;  %v1670_v61 = vld [vmem:[#allocation2 + $0x50] sm:$0xff]  ;;  %v1106_v22 = vld [vmem:[#allocation2 + $0x78] sm:$0xff]  ;;  %v1104_v21 = vld [vmem:[#allocation2 + $0x68] sm:$0xff]  ;;  %v8200_v41 = vpop.f32.mrb[32].mxu1 }
 0x12f   : > { %v4536_v33 = vshll.u32 %v6189_v63, 16  ;;  %v5172_v38 = vsel %vm7025_vm6, %v6294_v48, %v5171_v60  ;;  %v5173_v40 = vrot.slane %v5171_v60, 4  ;;  %v4542_v52 = vshll.u32 %v6190_v16, 16  ;;  %v1668_v46 = vld [vmem:[#allocation2 + $0x40] sm:$0xff]  ;;  %v6267_v55 = vld [vmem:[%s6960_s22 + $0x90] sm:$0xe] }
 0x130   : > { %6780 = vmatprep.mubr.msk.bf16.mxu0 %vm201_vm1, %v6310_v57  ;;  %v4516_v18 = vrot.slane %v4515_v58, 4  ;;  %v4526_v26 = vrot.slane %v4525_v6, 4  ;;  %v4535_v37 = vrot.slane %v4533_v29, 4  ;;  %v4546_v17 = vshrl.u32 %v6190_v16, 16  ;;  %v1671_v11 = vld [vmem:[#allocation2 + $0x58] sm:$0xff]  ;;  %v8207_v3 = vpop.f32.mrb[33].mxu1 }
 0x131   : > { %v4538_v59 = vrot.slane %v4536_v33, 5  ;;  %v5175_v20 = vsel %vm7025_vm6, %v5173_v40, %v5174_v62  ;;  %v4544_v35 = vrot.slane %v4542_v52, 5  ;;  %v4552_v31 = vshll.u32 %v6191_v34, 16  ;;  %v1669_v10 = vld [vmem:[#allocation2 + $0x48] sm:$0xff]  ;;  %v6268_v4 = vld [vmem:[%s6960_s22 + $0x94] sm:$0xf] }
 0x132   : > { %v4521_v9 = vsel %vm7032_vm7, %v4516_v18, %v4520_v50  ;;  %v4531_v5 = vsel %vm7032_vm7, %v4526_v26, %v4530_v14  ;;  %v6311_v56 = vcombine.low %v5172_v38, %v5175_v20  ;;  %v4548_v47 = vrot.slane %v4546_v17, 4  ;;  %v6269_v30 = vld [vmem:[%s6960_s22 + $0x98] sm:$0x1]  ;;  %v6192_v0 = vld [vmem:[%s6960_s22 + $0xa8] sm:$0xf]  ;;  %v8217_v16 = vpop.f32.mrb[34].mxu1 }
 0x133   : > { %v4539_v15 = vor.u32 %v4538_v59, %v4535_v37  ;;  %v6215_v19 = vcombine.low %v4521_v9, %v4531_v5  ;;  %v4554_v7 = vrot.slane %v4552_v31, 5  ;;  %v1964_v27 = vadd.f32 %v8100_v23, %v1670_v61  ;;  %v6193_v49 = vld [vmem:[%s6960_s22 + $0xac] sm:$0xf]  ;;  %v8224_v62 = vpop.f32.mrb[35].mxu1  ;;  %v6271_v34 = vld [vmem:[%s6960_s22 + $0xa0] sm:$0xf] }
 0x134   : > { %v1399_v42 = vadd.f32 %v8148_v32, %v1105_v12  ;;  %6781 = vmatmul.mubr.msk.bf16.gmra.mrb[128].mxu0 %vm201_vm1, %v6311_v56  ;;  %v4549_v44 = vor.u32 %v4548_v47, %v4544_v35  ;;  %v1962_v50 = vadd.f32 %v8106_v43, %v1668_v46  ;;  %v1397_v63 = vadd.f32 %v8156_v36, %v1103_v13  ;;  %v6194_v36 = vld [vmem:[%s6960_s22 + $0xb0] sm:$0x1]  ;;  %v6272_v40 = vld [vmem:[%s6960_s22 + $0xa4] sm:$0x1]  ;;  %v8236_v52 = vpop.f32.mrb[32].mxu0 }
 0x135   : > { %v4540_v8 = vrot.slane %v4539_v15, 4  ;;  %6750 = vmatprep.mubr.msk.bf16.mxu1 %vm201_vm1, %v6215_v19  ;;  %1996 = vst.msk [vmem:[#allocation2 + $0x50] sm:$0xff] %vm201_vm1, %v1964_v27  ;;  %v1965_v23 = vadd.f32 %v8120_v28, %v1671_v11  ;;  %v1400_v32 = vadd.f32 %v8162_v45, %v1106_v22  ;;  %v1963_v48 = vadd.f32 %v8128_v24, %v1669_v10  ;;  %v6270_v45 = vld [vmem:[%s6960_s22 + $0x9c] sm:$0xe]  ;;  %v6195_v61 = vld [vmem:[%s6960_s22 + $0xb4] sm:$0xf] }
 0x136   : > { %1431 = vst.msk [vmem:[#allocation2 + $0x70] sm:$0xff] %vm201_vm1, %v1399_v42  ;;  %v1398_v43 = vadd.f32 %v8169_v39, %v1104_v21  ;;  %v4550_v58 = vrot.slane %v4549_v44, 4  ;;  %1994 = vst.msk [vmem:[#allocation2 + $0x40] sm:$0xff] %vm201_vm1, %v1962_v50  ;;  %v6295_v60 = vrot.slane %v6267_v55, 9  ;;  %v5178_v28 = vrot.slane %v6268_v4, 5  ;;  %v8239_v9 = vpop.f32.mrb[33].mxu0 }
 0x137   : > { %v4545_v57 = vsel %vm7032_vm7, %v4540_v8, %v4544_v35  ;;  %1429 = vst.msk [vmem:[#allocation2 + $0x60] sm:$0xff] %vm201_vm1, %v1397_v63  ;;  %1997 = vst.msk [vmem:[#allocation2 + $0x58] sm:$0xff] %vm201_vm1, %v1965_v23  ;;  %v5181_v24 = vrot.slane %v6269_v30, 5  ;;  %v4557_v39 = vshrl.u32 %v6192_v0, 16  ;;  %v4560_v6 = vshll.u32 %v6192_v0, 16  ;;  %v8244_v13 = vpop.f32.mrb[34].mxu0 }
 0x138   : > { %1432 = vst.msk [vmem:[#allocation2 + $0x78] sm:$0xff] %vm201_vm1, %v1400_v32  ;;  %1995 = vst.msk [vmem:[#allocation2 + $0x48] sm:$0xff] %vm201_vm1, %v1963_v48  ;;  %v4566_v14 = vshll.u32 %v6193_v49, 16  ;;  %v4555_v29 = vsel %vm7032_vm7, %v4550_v58, %v4554_v7  ;;  %v5179_v33 = vsel %vm7025_vm6, %v6295_v60, %v5178_v28  ;;  %v5180_v18 = vrot.slane %v5178_v28, 4  ;;  %v6196_v46 = vld [vmem:[%s6960_s22 + $0xb8] sm:$0xf] }
 0x139   : > { %1430 = vst.msk [vmem:[#allocation2 + $0x68] sm:$0xff] %vm201_vm1, %v1398_v43  ;;  %v4570_v38 = vshrl.u32 %v6193_v49, 16  ;;  %v6216_v26 = vcombine.low %v4545_v57, %v4555_v29  ;;  %v4559_v37 = vrot.slane %v4557_v39, 4  ;;  %v4562_v59 = vrot.slane %v4560_v6, 5  ;;  %v8247_v11 = vpop.f32.mrb[35].mxu0  ;;  %v1109_v48 = vld [vmem:[#allocation2 + $0x90] sm:$0xff] }
 0x13a   : > { %v4568_v17 = vrot.slane %v4566_v14, 5  ;;  %v5182_v20 = vsel %vm7025_vm6, %v5180_v18, %v5181_v24  ;;  %v4576_v31 = vshll.u32 %v6194_v36, 16  ;;  %v6296_v12 = vrot.slane %v6270_v45, 9  ;;  %v6197_v21 = vld [vmem:[%s6960_s22 + $0xbc] sm:$0x1]  ;;  %v1107_v36 = vld [vmem:[#allocation2 + $0x80] sm:$0xff] }
 0x13b   : > { %v4572_v35 = vrot.slane %v4570_v38, 4  ;;  %6751 = vmatmul.mubr.msk.bf16.gmra.mrb[132].mxu1 %vm201_vm1, %v6216_v26  ;;  %v6312_v5 = vcombine.low %v5179_v33, %v5182_v20  ;;  %v4563_v56 = vor.u32 %v4562_v59, %v4559_v37  ;;  %v5185_v15 = vrot.slane %v6271_v34, 5  ;;  %v8259_v57 = vpop.f32.mrb[36].mxu1  ;;  %v1110_v39 = vld [vmem:[#allocation2 + $0x98] sm:$0xff]  ;;  %v1108_v14 = vld [vmem:[#allocation2 + $0x88] sm:$0xff] }
 0x13c   : > { %v5188_v47 = vrot.slane %v6272_v40, 5  ;;  %v4578_v10 = vrot.slane %v4576_v31, 5  ;;  %v4581_v55 = vshrl.u32 %v6195_v61, 16  ;;  %v4584_v19 = vshll.u32 %v6195_v61, 16  ;;  %v6273_v34 = vld [vmem:[%s6960_s22 + $0xa8] sm:$0xe] }
 0x13d   : > { %v4573_v22 = vor.u32 %v4572_v35, %v4568_v17  ;;  %6784 = vmatprep.mubr.msk.bf16.mxu0 %vm201_vm1, %v6312_v5  ;;  %v4564_v7 = vrot.slane %v4563_v56, 4  ;;  %v5186_v27 = vsel %vm7025_vm6, %v6296_v12, %v5185_v15  ;;  %v5187_v42 = vrot.slane %v5185_v15, 4  ;;  %v1674_v63 = vld [vmem:[#allocation2 + $0x70] sm:$0xff]  ;;  %v8264_v29 = vpop.f32.mrb[37].mxu1  ;;  %v6274_v26 = vld [vmem:[%s6960_s22 + $0xac] sm:$0xf] }
 0x13e   : > { %v4590_v4 = vshll.u32 %v6196_v46, 16  ;;  %v4583_v8 = vrot.slane %v4581_v55, 4  ;;  %v4586_v44 = vrot.slane %v4584_v19, 5  ;;  %v4594_v50 = vshrl.u32 %v6196_v46, 16  ;;  %v1672_v43 = vld [vmem:[#allocation2 + $0x60] sm:$0xff]  ;;  %v8270_v59 = vpop.f32.mrb[38].mxu1 }
 0x13f   : > { %v4574_v30 = vrot.slane %v4573_v22, 4  ;;  %v4569_v0 = vsel %vm7032_vm7, %v4564_v7, %v4568_v17  ;;  %v5189_v49 = vsel %vm7025_vm6, %v5187_v42, %v5188_v47  ;;  %v4600_v32 = vshll.u32 %v6197_v21, 16  ;;  %v1675_v24 = vld [vmem:[#allocation2 + $0x78] sm:$0xff]  ;;  %v6275_v37 = vld [vmem:[%s6960_s22 + $0xb0] sm:$0x1] }
 0x140   : > { %v8257_v23 = vrot.slane %v4590_v4, 5  ;;  %v6313_v60 = vcombine.low %v5186_v27, %v5189_v49  ;;  %v4587_v28 = vor.u32 %v4586_v44, %v4583_v8  ;;  %v4596_v45 = vrot.slane %v4594_v50, 4  ;;  %v1673_v6 = vld [vmem:[#allocation2 + $0x68] sm:$0xff]  ;;  %v6198_v31 = vld [vmem:[%s6960_s22 + $0xc0] sm:$0xf] }
 0x141   : > { %v4579_v58 = vsel %vm7032_vm7, %v4574_v30, %v4578_v10  ;;  %v4602_v18 = vrot.slane %v4600_v32, 5  ;;  %v1968_v38 = vadd.f32 %v8176_v51, %v1674_v63  ;;  %v1403_v40 = vadd.f32 %v8200_v41, %v1109_v48  ;;  %v6199_v12 = vld [vmem:[%s6960_s22 + $0xc4] sm:$0xf]  ;;  %v8278_v51 = vpop.f32.mrb[39].mxu1  ;;  %v6276_v56 = vld [vmem:[%s6960_s22 + $0xb4] sm:$0xe] }
 0x142   : > { %v6217_v33 = vcombine.low %v4569_v0, %v4579_v58  ;;  %6785 = vmatmul.mubr.msk.bf16.gmra.mrb[132].mxu0 %vm201_vm1, %v6313_v60  ;;  %v4588_v17 = vrot.slane %v4587_v28, 4  ;;  %v4597_v61 = vor.u32 %v4596_v45, %v8257_v23  ;;  %v1966_v20 = vadd.f32 %v8179_v2, %v1672_v43  ;;  %v6278_v30 = vld [vmem:[%s6960_s22 + $0xbc] sm:$0x1]  ;;  %v6201_v49 = vld [vmem:[%s6960_s22 + $0xcc] sm:$0xf] }
 0x143   : > { %v1401_v35 = vadd.f32 %v8207_v3, %v1107_v36  ;;  %2000 = vst.msk [vmem:[#allocation2 + $0x70] sm:$0xff] %vm201_vm1, %v1968_v38  ;;  %1435 = vst.msk [vmem:[#allocation2 + $0x90] sm:$0xff] %vm201_vm1, %v1403_v40  ;;  %v1969_v41 = vadd.f32 %v8182_v25, %v1675_v24  ;;  %v1404_v46 = vadd.f32 %v8217_v16, %v1110_v39  ;;  %v6200_v3 = vld [vmem:[%s6960_s22 + $0xc8] sm:$0x1]  ;;  %v6297_v22 = vrot.slane %v6273_v34, 9  ;;  %v8295_v16 = vpop.f32.mrb[36].mxu0 }
 0x144   : > { %6754 = vmatprep.mubr.msk.bf16.mxu1 %vm201_vm1, %v6217_v33  ;;  %v1967_v5 = vadd.f32 %v8187_v1, %v1673_v6  ;;  %v1402_v2 = vadd.f32 %v8224_v62, %v1108_v14  ;;  %v4593_v15 = vsel %vm7032_vm7, %v4588_v17, %v8257_v23  ;;  %v4598_v47 = vrot.slane %v4597_v61, 4  ;;  %1998 = vst.msk [vmem:[#allocation2 + $0x60] sm:$0xff] %vm201_vm1, %v1966_v20  ;;  %v6277_v25 = vld [vmem:[%s6960_s22 + $0xb8] sm:$0xf]  ;;  %v8301_v19 = vpop.f32.mrb[37].mxu0 }
 0x145   : > { %1433 = vst.msk [vmem:[#allocation2 + $0x80] sm:$0xff] %vm201_vm1, %v1401_v35  ;;  %v5192_v10 = vrot.slane %v6274_v26, 5  ;;  %2001 = vst.msk [vmem:[#allocation2 + $0x78] sm:$0xff] %vm201_vm1, %v1969_v41  ;;  %v5195_v1 = vrot.slane %v6275_v37, 5  ;;  %v4605_v62 = vshrl.u32 %v6198_v31, 16  ;;  %v4608_v21 = vshll.u32 %v6198_v31, 16 }
 0x146   : > { %1436 = vst.msk [vmem:[#allocation2 + $0x98] sm:$0xff] %vm201_vm1, %v1404_v46  ;;  %1999 = vst.msk [vmem:[#allocation2 + $0x68] sm:$0xff] %vm201_vm1, %v1967_v5  ;;  %v4614_v55 = vshll.u32 %v6199_v12, 16  ;;  %v4603_v7 = vsel %vm7032_vm7, %v4598_v47, %v4602_v18  ;;  %v4618_v4 = vshrl.u32 %v6199_v12, 16  ;;  %v8308_v8 = vpop.f32.mrb[38].mxu0  ;;  %v4624_v43 = vshll.u32 %v6200_v3, 16 }
 0x147   : > { %1434 = vst.msk [vmem:[#allocation2 + $0x88] sm:$0xff] %vm201_vm1, %v1402_v2  ;;  %v5193_v27 = vsel %vm7025_vm6, %v6297_v22, %v5192_v10  ;;  %v5194_v42 = vrot.slane %v5192_v10, 4  ;;  %v6218_v44 = vcombine.low %v4593_v15, %v4603_v7  ;;  %v4607_v50 = vrot.slane %v4605_v62, 4  ;;  %v8311_v23 = vpop.f32.mrb[39].mxu0  ;;  %v6202_v58 = vld [vmem:[%s6960_s22 + $0xd0] sm:$0xf] }
 0x148   : > { %v4610_v63 = vrot.slane %v4608_v21, 5  ;;  %v4616_v0 = vrot.slane %v4614_v55, 5  ;;  %v4620_v48 = vrot.slane %v4618_v4, 4  ;;  %v6298_v36 = vrot.slane %v6276_v56, 9  ;;  %v6203_v14 = vld [vmem:[%s6960_s22 + $0xd4] sm:$0x1] }
 0x149   : > { %v5196_v32 = vsel %vm7025_vm6, %v5194_v42, %v5195_v1  ;;  %6755 = vmatmul.mubr.msk.bf16.gmra.mrb[136].mxu1 %vm201_vm1, %v6218_v44  ;;  %v5199_v45 = vrot.slane %v6277_v25, 5  ;;  %v5202_v24 = vrot.slane %v6278_v30, 5  ;;  %v4626_v6 = vrot.slane %v4624_v43, 5  ;;  %v8321_v37 = vpop.f32.mrb[40].mxu1  ;;  %v1113_v12 = vld [vmem:[#allocation2 + $0xb0] sm:$0xff]  ;;  %v1111_v56 = vld [vmem:[#allocation2 + $0xa0] sm:$0xff] }
 0x14a   : > { %v6314_v60 = vcombine.low %v5193_v27, %v5196_v32  ;;  %v4611_v28 = vor.u32 %v4610_v63, %v4607_v50  ;;  %v4621_v39 = vor.u32 %v4620_v48, %v4616_v0  ;;  %v4629_v34 = vshrl.u32 %v6201_v49, 16  ;;  %v1678_v31 = vld [vmem:[#allocation2 + $0x90] sm:$0xff]  ;;  %v6279_v15 = vld [vmem:[%s6960_s22 + $0xc0] sm:$0xe]  ;;  %v1354_v47 = vpop.f32.mrb[41].mxu1  ;;  %v1114_v21 = vld [vmem:[#allocation2 + $0xb8] sm:$0xff] }
 0x14b   : > { %v4632_v33 = vshll.u32 %v6201_v49, 16  ;;  %v5200_v38 = vsel %vm7025_vm6, %v6298_v36, %v5199_v45  ;;  %v5201_v40 = vrot.slane %v5199_v45, 4  ;;  %v4638_v26 = vshll.u32 %v6202_v58, 16  ;;  %v1112_v7 = vld [vmem:[#allocation2 + $0xa8] sm:$0xff]  ;;  %v6280_v27 = vld [vmem:[%s6960_s22 + $0xc4] sm:$0xf] }
 0x14c   : > { %6788 = vmatprep.mubr.msk.bf16.mxu0 %vm201_vm1, %v6314_v60  ;;  %v4612_v18 = vrot.slane %v4611_v28, 4  ;;  %v4622_v17 = vrot.slane %v4621_v39, 4  ;;  %v4631_v61 = vrot.slane %v4629_v34, 4  ;;  %v4642_v35 = vshrl.u32 %v6202_v58, 16  ;;  %v1676_v3 = vld [vmem:[#allocation2 + $0x80] sm:$0xff]  ;;  %v6553_v42 = vpop.f32.mrb[42].mxu1 }
 0x14d   : > { %v4634_v20 = vrot.slane %v4632_v33, 5  ;;  %v5203_v46 = vsel %vm7025_vm6, %v5201_v40, %v5202_v24  ;;  %v4640_v5 = vrot.slane %v4638_v26, 5  ;;  %v4648_v2 = vshll.u32 %v6203_v14, 16  ;;  %v1679_v62 = vld [vmem:[#allocation2 + $0x98] sm:$0xff]  ;;  %v6281_v63 = vld [vmem:[%s6960_s22 + $0xc8] sm:$0x1] }
 0x14e   : > { %v4617_v41 = vsel %vm7032_vm7, %v4612_v18, %v4616_v0  ;;  %v4627_v22 = vsel %vm7032_vm7, %v4622_v17, %v4626_v6  ;;  %v6315_v10 = vcombine.low %v5200_v38, %v5203_v46  ;;  %v4644_v1 = vrot.slane %v4642_v35, 4  ;;  %v1677_v55 = vld [vmem:[#allocation2 + $0x88] sm:$0xff]  ;;  %v1357_v49 = vpop.f32.mrb[43].mxu1  ;;  %v6283_v58 = vld [vmem:[%s6960_s22 + $0xd0] sm:$0xf]  ;;  %v8340_v28 = vpop.f32.mrb[40].mxu0 }
 0x14f   : > { %v4635_v25 = vor.u32 %v4634_v20, %v4631_v61  ;;  %v6219_v4 = vcombine.low %v4617_v41, %v4627_v22  ;;  %v4650_v30 = vrot.slane %v4648_v2, 5  ;;  %v1972_v44 = vadd.f32 %v8236_v52, %v1678_v31  ;;  %v6282_v0 = vld [vmem:[%s6960_s22 + $0xcc] sm:$0xe]  ;;  %v6284_v60 = vld [vmem:[%s6960_s22 + $0xd4] sm:$0x1]  ;;  %v8349_v24 = vpop.f32.mrb[41].mxu0 }
 0x150   : > { %v1407_v50 = vadd.f32 %v8259_v57, %v1113_v12  ;;  %6789 = vmatmul.mubr.msk.bf16.gmra.mrb[136].mxu0 %vm201_vm1, %v6315_v10  ;;  %v4645_v48 = vor.u32 %v4644_v1, %v4640_v5  ;;  %v1970_v43 = vadd.f32 %v8239_v9, %v1676_v3  ;;  %v1405_v36 = vadd.f32 %v8264_v29, %v1111_v56  ;;  %v8355_v34 = vpop.f32.mrb[42].mxu0  ;;  %v1117_v33 = vld [vmem:[#allocation2 + $0xd0] sm:$0xff]  ;;  %v1115_v61 = vld [vmem:[#allocation2 + $0xc0] sm:$0xff]  ;;  %v1118_v41 = vld [vmem:[#allocation2 + $0xd8] sm:$0xff] }
 0x151   : > { %v4636_v32 = vrot.slane %v4635_v25, 4  ;;  %6758 = vmatprep.mubr.msk.bf16.mxu1 %vm201_vm1, %v6219_v4  ;;  %2004 = vst.msk [vmem:[#allocation2 + $0x90] sm:$0xff] %vm201_vm1, %v1972_v44  ;;  %v1973_v52 = vadd.f32 %v8244_v13, %v1679_v62  ;;  %v1408_v57 = vadd.f32 %v8270_v59, %v1114_v21  ;;  %v1971_v45 = vadd.f32 %v8247_v11, %v1677_v55  ;;  %v8361_v18 = vpop.f32.mrb[43].mxu0  ;;  %v1116_v46 = vld [vmem:[#allocation2 + $0xc8] sm:$0xff]  ;;  %v1121_v56 = vld [vmem:[#allocation2 + $0xf0] sm:$0xff]  ;;  %v1119_v25 = vld [vmem:[#allocation2 + $0xe0] sm:$0xff] }
 0x152   : > { %1439 = vst.msk [vmem:[#allocation2 + $0xb0] sm:$0xff] %vm201_vm1, %v1407_v50  ;;  %v1406_v9 = vadd.f32 %v8278_v51, %v1112_v7  ;;  %v4646_v39 = vrot.slane %v4645_v48, 4  ;;  %2002 = vst.msk [vmem:[#allocation2 + $0x80] sm:$0xff] %vm201_vm1, %v1970_v43  ;;  %v6299_v6 = vrot.slane %v6279_v15, 9  ;;  %v5206_v14 = vrot.slane %v6280_v27, 5  ;;  %v6556_v15 = vpop.f32.mrb[44].mxu1 }
 0x153   : > { %v4641_v29 = vsel %vm7032_vm7, %v4636_v32, %v4640_v5  ;;  %1437 = vst.msk [vmem:[#allocation2 + $0xa0] sm:$0xff] %vm201_vm1, %v1405_v36  ;;  %2005 = vst.msk [vmem:[#allocation2 + $0x98] sm:$0xff] %vm201_vm1, %v1973_v52  ;;  %v5209_v13 = vrot.slane %v6281_v63, 5  ;;  %v6300_v11 = vrot.slane %v6282_v0, 9  ;;  %v5213_v59 = vrot.slane %v6283_v58, 5  ;;  %v1370_v1 = vpop.f32.mrb[45].mxu1 }
 0x154   : > { %1440 = vst.msk [vmem:[#allocation2 + $0xb8] sm:$0xff] %vm201_vm1, %v1408_v57  ;;  %2003 = vst.msk [vmem:[#allocation2 + $0x88] sm:$0xff] %vm201_vm1, %v1971_v45  ;;  %v5216_v51 = vrot.slane %v6284_v60, 5  ;;  %v4651_v38 = vsel %vm7032_vm7, %v4646_v39, %v4650_v30  ;;  %v5207_v40 = vsel %vm7025_vm6, %v6299_v6, %v5206_v14  ;;  %v5208_v26 = vrot.slane %v5206_v14, 4  ;;  %v6590_v62 = vpop.f32.mrb[44].mxu0  ;;  %v1122_v7 = vld [vmem:[#allocation2 + $0xf8] sm:$0xff] }
 0x155   : > { %1438 = vst.msk [vmem:[#allocation2 + $0xa8] sm:$0xff] %vm201_vm1, %v1406_v9  ;;  %v1411_v17 = vadd.f32 %v8321_v37, %v1117_v33  ;;  %v6220_v20 = vcombine.low %v4641_v29, %v4651_v38  ;;  %v5214_v35 = vsel %vm7025_vm6, %v6300_v11, %v5213_v59  ;;  %v5215_v31 = vrot.slane %v5213_v59, 4  ;;  %v6557_v27 = vpop.f32.mrb[46].mxu1  ;;  %v1120_v63 = vld [vmem:[#allocation2 + $0xe8] sm:$0xff]  ;;  %v2053_v52 = vld [vmem:[#allocation2 + $0x10] sm:$0xff]  ;;  %v2051_v39 = vld [vmem:[#allocation2] sm:$0xff] }
 0x156   : > { %v1409_v12 = vadd.f32 %v1354_v47, %v1115_v61  ;;  %v5210_v5 = vsel %vm7025_vm6, %v5208_v26, %v5209_v13  ;;  %v1412_v54 = vadd.f32 %v6553_v42, %v1118_v41  ;;  %v1410_v2 = vadd.f32 %v1357_v49, %v1116_v46  ;;  %v1939_v42 = vpop.f32.mrb[45].mxu0  ;;  %v1373_v0 = vpop.f32.mrb[47].mxu1  ;;  %v2054_v13 = vld [vmem:[#allocation2 + $0x18] sm:$0xff]  ;;  %v2057_v41 = vld [vmem:[#allocation2 + $0x30] sm:$0xff] }
 0x157   : > { %1443 = vst.msk [vmem:[#allocation2 + $0xd0] sm:$0xff] %vm201_vm1, %v1411_v17  ;;  %6759 = vmatmul.mubr.msk.bf16.gmra.mrb[140].mxu1 %vm201_vm1, %v6220_v20  ;;  %v6316_v3 = vcombine.low %v5207_v40, %v5210_v5  ;;  %v5217_v37 = vsel %vm7025_vm6, %v5215_v31, %v5216_v51  ;;  %v1415_v10 = vadd.f32 %v6556_v15, %v1121_v56  ;;  %v6591_v49 = vpop.f32.mrb[46].mxu0  ;;  %v6596_v57 = vpop.f32.mrb[48].mxu1  ;;  %v2052_v51 = vld [vmem:[#allocation2 + $0x8] sm:$0xff]  ;;  %v2058_v56 = vld [vmem:[#allocation2 + $0x38] sm:$0xff] }
 0x158   : > { %1441 = vst.msk [vmem:[#allocation2 + $0xc0] sm:$0xff] %vm201_vm1, %v1409_v12  ;;  %v6317_v47 = vcombine.low %v5214_v35, %v5217_v37  ;;  %1444 = vst.msk [vmem:[#allocation2 + $0xd8] sm:$0xff] %vm201_vm1, %v1412_v54  ;;  %v1413_v55 = vadd.f32 %v1370_v1, %v1119_v25  ;;  %v1416_v50 = vadd.f32 %v6557_v27, %v1122_v7  ;;  %v1942_v43 = vpop.f32.mrb[47].mxu0  ;;  %v2250_v6 = vpop.f32.mrb[49].mxu1  ;;  %v2055_v54 = vld [vmem:[#allocation2 + $0x20] sm:$0xff]  ;;  %v2056_v25 = vld [vmem:[#allocation2 + $0x28] sm:$0xff] }
 0x159   : > { %v1682_v22 = vld [vmem:[#allocation2 + $0xb0] sm:$0xff]  ;;  %1442 = vst.msk [vmem:[#allocation2 + $0xc8] sm:$0xff] %vm201_vm1, %v1410_v2  ;;  %6792 = vmatprep.mubr.msk.bf16.mxu0 %vm201_vm1, %v6316_v3  ;;  %1447 = vst.msk [vmem:[#allocation2 + $0xf0] sm:$0xff] %vm201_vm1, %v1415_v10  ;;  %v1414_v48 = vadd.f32 %v1373_v0, %v1120_v63  ;;  %v2379_v29 = vadd.f32 %v6596_v57, %v2053_v52  ;;  %v6597_v11 = vpop.f32.mrb[50].mxu1 }
 0x15a   : > { %v1976_v21 = vadd.f32 %v8295_v16, %v1682_v22  ;;  %v1680_v53 = vld [vmem:[#allocation2 + $0xa0] sm:$0xff]  ;;  %6793 = vmatmul.mubr.msk.bf16.gmra.mrb[140].mxu0 %vm201_vm1, %v6317_v47  ;;  %1445 = vst.msk [vmem:[#allocation2 + $0xe0] sm:$0xff] %vm201_vm1, %v1413_v55  ;;  %1448 = vst.msk [vmem:[#allocation2 + $0xf8] sm:$0xff] %vm201_vm1, %v1416_v50  ;;  %v2253_v33 = vpop.f32.mrb[51].mxu1 }
 0x15b   : > { %v1974_v4 = vadd.f32 %v8301_v19, %v1680_v53  ;;  %v1683_v30 = vld [vmem:[#allocation2 + $0xb8] sm:$0xff]  ;;  %1446 = vst.msk [vmem:[#allocation2 + $0xe8] sm:$0xff] %vm201_vm1, %v1414_v48  ;;  %2411 = vst.msk [vmem:[#allocation2 + $0x10] sm:$0xff] %vm201_vm1, %v2379_v29  ;;  %v2378_v26 = vadd.f32 %v2253_v33, %v2052_v51 }
 0x15c   : > { %v1681_v44 = vld [vmem:[#allocation2 + $0xa8] sm:$0xff]  ;;  %2008 = vst.msk [vmem:[#allocation2 + $0xb0] sm:$0xff] %vm201_vm1, %v1976_v21  ;;  %v1977_v16 = vadd.f32 %v8308_v8, %v1683_v30 }
 0x15d   : > { %v1975_v32 = vadd.f32 %v8311_v23, %v1681_v44  ;;  %2006 = vst.msk [vmem:[#allocation2 + $0xa0] sm:$0xff] %vm201_vm1, %v1974_v4  ;;  %2410 = vst.msk [vmem:[#allocation2 + $0x8] sm:$0xff] %vm201_vm1, %v2378_v26  ;;  %v6600_v46 = vpop.f32.mrb[52].mxu1  ;;  %v2061_v44 = vld [vmem:[#allocation2 + $0x50] sm:$0xff] }
 0x15e   : > { %2009 = vst.msk [vmem:[#allocation2 + $0xb8] sm:$0xff] %vm201_vm1, %v1977_v16  ;;  %v1686_v19 = vld [vmem:[#allocation2 + $0xd0] sm:$0xff]  ;;  %v2383_v5 = vadd.f32 %v6600_v46, %v2057_v41  ;;  %v2266_v2 = vpop.f32.mrb[53].mxu1 }
 0x15f   : > { %2007 = vst.msk [vmem:[#allocation2 + $0xa8] sm:$0xff] %vm201_vm1, %v1975_v32  ;;  %v1980_v36 = vadd.f32 %v8340_v28, %v1686_v19  ;;  %v1684_v8 = vld [vmem:[#allocation2 + $0xc0] sm:$0xff]  ;;  %v1687_v58 = vld [vmem:[#allocation2 + $0xd8] sm:$0xff]  ;;  %v2377_v28 = vadd.f32 %v2250_v6, %v2051_v39  ;;  %v2381_v37 = vadd.f32 %v2266_v2, %v2055_v54  ;;  %v6601_v15 = vpop.f32.mrb[54].mxu1 }
 0x160   : > { %v1978_v23 = vadd.f32 %v8349_v24, %v1684_v8  ;;  %v1685_v60 = vld [vmem:[#allocation2 + $0xc8] sm:$0xff]  ;;  %v1981_v45 = vadd.f32 %v8355_v34, %v1687_v58  ;;  %v1690_v14 = vld [vmem:[#allocation2 + $0xf0] sm:$0xff]  ;;  %v2380_v34 = vadd.f32 %v6597_v11, %v2054_v13  ;;  %2415 = vst.msk [vmem:[#allocation2 + $0x30] sm:$0xff] %vm201_vm1, %v2383_v5  ;;  %v2384_v10 = vadd.f32 %v6601_v15, %v2058_v56  ;;  %v2269_v1 = vpop.f32.mrb[55].mxu1 }
 0x161   : > { %2012 = vst.msk [vmem:[#allocation2 + $0xd0] sm:$0xff] %vm201_vm1, %v1980_v36  ;;  %v1979_v9 = vadd.f32 %v8361_v18, %v1685_v60  ;;  %v1984_v24 = vadd.f32 %v6590_v62, %v1690_v14  ;;  %v1688_v59 = vld [vmem:[#allocation2 + $0xe0] sm:$0xff]  ;;  %v6630_v18 = vpop.f32.mrb[48].mxu0  ;;  %v1691_v40 = vld [vmem:[#allocation2 + $0xf8] sm:$0xff]  ;;  %2409 = vst.msk [vmem:[#allocation2] sm:$0xff] %vm201_vm1, %v2377_v28  ;;  %v2382_v53 = vadd.f32 %v2269_v1, %v2056_v25 }
 0x162   : > { %2010 = vst.msk [vmem:[#allocation2 + $0xc0] sm:$0xff] %vm201_vm1, %v1978_v23  ;;  %2013 = vst.msk [vmem:[#allocation2 + $0xd8] sm:$0xff] %vm201_vm1, %v1981_v45  ;;  %v1982_v38 = vadd.f32 %v1939_v42, %v1688_v59  ;;  %v3040_v17 = vpop.f32.mrb[49].mxu0  ;;  %v1985_v61 = vadd.f32 %v6591_v49, %v1691_v40  ;;  %v1689_v20 = vld [vmem:[#allocation2 + $0xe8] sm:$0xff]  ;;  %v2875_v3 = vld [vmem:[#allocation2 + $0x10] sm:$0xff] }
 0x163   : > { %2011 = vst.msk [vmem:[#allocation2 + $0xc8] sm:$0xff] %vm201_vm1, %v1979_v9  ;;  %2016 = vst.msk [vmem:[#allocation2 + $0xf0] sm:$0xff] %vm201_vm1, %v1984_v24  ;;  %v6631_v35 = vpop.f32.mrb[50].mxu0  ;;  %v1983_v31 = vadd.f32 %v1942_v43, %v1689_v20  ;;  %v3169_v47 = vadd.f32 %v6630_v18, %v2875_v3  ;;  %v2059_v49 = vld [vmem:[#allocation2 + $0x40] sm:$0xff]  ;;  %v2062_v43 = vld [vmem:[#allocation2 + $0x58] sm:$0xff] }
 0x164   : > { %2412 = vst.msk [vmem:[#allocation2 + $0x18] sm:$0xff] %vm201_vm1, %v2380_v34  ;;  %2014 = vst.msk [vmem:[#allocation2 + $0xe0] sm:$0xff] %vm201_vm1, %v1982_v38  ;;  %v3043_v12 = vpop.f32.mrb[51].mxu0  ;;  %v2874_v7 = vld [vmem:[#allocation2 + $0x8] sm:$0xff]  ;;  %v2065_v28 = vld [vmem:[#allocation2 + $0x70] sm:$0xff] }
 0x165   : > { %2017 = vst.msk [vmem:[#allocation2 + $0xf8] sm:$0xff] %vm201_vm1, %v1985_v61  ;;  %2015 = vst.msk [vmem:[#allocation2 + $0xe8] sm:$0xff] %vm201_vm1, %v1983_v31  ;;  %v6634_v27 = vpop.f32.mrb[52].mxu0  ;;  %v3168_v42 = vadd.f32 %v3043_v12, %v2874_v7  ;;  %v6604_v50 = vpop.f32.mrb[56].mxu1  ;;  %v2060_v58 = vld [vmem:[#allocation2 + $0x48] sm:$0xff]  ;;  %v2063_v59 = vld [vmem:[#allocation2 + $0x60] sm:$0xff] }
 0x166   : > { %2413 = vst.msk [vmem:[#allocation2 + $0x20] sm:$0xff] %vm201_vm1, %v2381_v37  ;;  %3201 = vst.msk [vmem:[#allocation2 + $0x10] sm:$0xff] %vm201_vm1, %v3169_v47  ;;  %v3056_v4 = vpop.f32.mrb[53].mxu0  ;;  %v2387_v0 = vadd.f32 %v6604_v50, %v2061_v44  ;;  %v2282_v16 = vpop.f32.mrb[57].mxu1  ;;  %v2066_v38 = vld [vmem:[#allocation2 + $0x78] sm:$0xff]  ;;  %v2064_v20 = vld [vmem:[#allocation2 + $0x68] sm:$0xff] }
 0x167   : > { %2416 = vst.msk [vmem:[#allocation2 + $0x38] sm:$0xff] %vm201_vm1, %v2384_v10  ;;  %2414 = vst.msk [vmem:[#allocation2 + $0x28] sm:$0xff] %vm201_vm1, %v2382_v53  ;;  %v6635_v30 = vpop.f32.mrb[54].mxu0  ;;  %v2879_v32 = vld [vmem:[#allocation2 + $0x30] sm:$0xff]  ;;  %v2385_v48 = vadd.f32 %v2282_v16, %v2059_v49  ;;  %v6605_v19 = vpop.f32.mrb[58].mxu1 }
 0x168   : > { %v2873_v22 = vld [vmem:[#allocation2] sm:$0xff]  ;;  %3200 = vst.msk [vmem:[#allocation2 + $0x8] sm:$0xff] %vm201_vm1, %v3168_v42  ;;  %v3059_v63 = vpop.f32.mrb[55].mxu0  ;;  %v3173_v36 = vadd.f32 %v6634_v27, %v2879_v32  ;;  %2419 = vst.msk [vmem:[#allocation2 + $0x50] sm:$0xff] %vm201_vm1, %v2387_v0  ;;  %v2388_v23 = vadd.f32 %v6605_v19, %v2062_v43  ;;  %v2285_v60 = vpop.f32.mrb[59].mxu1  ;;  %v2069_v37 = vld [vmem:[#allocation2 + $0x90] sm:$0xff] }
 0x169   : > { %v3167_v62 = vadd.f32 %v3040_v17, %v2873_v22  ;;  %2417 = vst.msk [vmem:[#allocation2 + $0x40] sm:$0xff] %vm201_vm1, %v2385_v48  ;;  %v2386_v45 = vadd.f32 %v2285_v60, %v2060_v58  ;;  %v2067_v22 = vld [vmem:[#allocation2 + $0x80] sm:$0xff]  ;;  %v2068_v42 = vld [vmem:[#allocation2 + $0x88] sm:$0xff]  ;;  %v2073_v32 = vld [vmem:[#allocation2 + $0xb0] sm:$0xff] }
 0x16a   : > { %3205 = vst.msk [vmem:[#allocation2 + $0x30] sm:$0xff] %vm201_vm1, %v3173_v36  ;;  %2420 = vst.msk [vmem:[#allocation2 + $0x58] sm:$0xff] %vm201_vm1, %v2388_v23  ;;  %v2071_v36 = vld [vmem:[#allocation2 + $0xa0] sm:$0xff] }
 0x16b   : > { %v2876_v21 = vld [vmem:[#allocation2 + $0x18] sm:$0xff]  ;;  %3199 = vst.msk [vmem:[#allocation2] sm:$0xff] %vm201_vm1, %v3167_v62  ;;  %2418 = vst.msk [vmem:[#allocation2 + $0x48] sm:$0xff] %vm201_vm1, %v2386_v45  ;;  %v6638_v6 = vpop.f32.mrb[56].mxu0 }
 0x16c   : > { %v3170_v55 = vadd.f32 %v6631_v35, %v2876_v21  ;;  %v3072_v14 = vpop.f32.mrb[57].mxu0  ;;  %v2070_v21 = vld [vmem:[#allocation2 + $0x98] sm:$0xff] }
 0x16d   : > { %v2877_v8 = vld [vmem:[#allocation2 + $0x20] sm:$0xff]  ;;  %v6608_v13 = vpop.f32.mrb[60].mxu1  ;;  %v6639_v11 = vpop.f32.mrb[58].mxu0 }
 0x16e   : > { %3202 = vst.msk [vmem:[#allocation2 + $0x18] sm:$0xff] %vm201_vm1, %v3170_v55  ;;  %v3171_v52 = vadd.f32 %v3056_v4, %v2877_v8  ;;  %v2880_v57 = vld [vmem:[#allocation2 + $0x38] sm:$0xff]  ;;  %v2878_v29 = vld [vmem:[#allocation2 + $0x28] sm:$0xff]  ;;  %v2391_v24 = vadd.f32 %v6608_v13, %v2065_v28  ;;  %v2298_v34 = vpop.f32.mrb[61].mxu1  ;;  %v3075_v51 = vpop.f32.mrb[59].mxu0 }
 0x16f   : > { %v3174_v9 = vadd.f32 %v6635_v30, %v2880_v57  ;;  %v3172_v39 = vadd.f32 %v3059_v63, %v2878_v29  ;;  %v2883_v33 = vld [vmem:[#allocation2 + $0x50] sm:$0xff]  ;;  %v2389_v18 = vadd.f32 %v2298_v34, %v2063_v59  ;;  %v6609_v40 = vpop.f32.mrb[62].mxu1 }
 0x170   : > { %3203 = vst.msk [vmem:[#allocation2 + $0x20] sm:$0xff] %vm201_vm1, %v3171_v52  ;;  %v3177_v26 = vadd.f32 %v6638_v6, %v2883_v33  ;;  %2423 = vst.msk [vmem:[#allocation2 + $0x70] sm:$0xff] %vm201_vm1, %v2391_v24  ;;  %v2881_v17 = vld [vmem:[#allocation2 + $0x40] sm:$0xff]  ;;  %v2392_v61 = vadd.f32 %v6609_v40, %v2066_v38  ;;  %v2301_v35 = vpop.f32.mrb[63].mxu1  ;;  %v2074_v52 = vld [vmem:[#allocation2 + $0xb8] sm:$0xff] }
 0x171   : > { %3206 = vst.msk [vmem:[#allocation2 + $0x38] sm:$0xff] %vm201_vm1, %v3174_v9  ;;  %3204 = vst.msk [vmem:[#allocation2 + $0x28] sm:$0xff] %vm201_vm1, %v3172_v39  ;;  %v3175_v31 = vadd.f32 %v3072_v14, %v2881_v17  ;;  %v2884_v12 = vld [vmem:[#allocation2 + $0x58] sm:$0xff]  ;;  %v2390_v41 = vadd.f32 %v2301_v35, %v2064_v20  ;;  %v2072_v6 = vld [vmem:[#allocation2 + $0xa8] sm:$0xff] }
 0x172   : > { %2421 = vst.msk [vmem:[#allocation2 + $0x60] sm:$0xff] %vm201_vm1, %v2389_v18  ;;  %3209 = vst.msk [vmem:[#allocation2 + $0x50] sm:$0xff] %vm201_vm1, %v3177_v26  ;;  %v3178_v46 = vadd.f32 %v6639_v11, %v2884_v12  ;;  %v2882_v5 = vld [vmem:[#allocation2 + $0x48] sm:$0xff]  ;;  %v2077_v33 = vld [vmem:[#allocation2 + $0xd0] sm:$0xff] }
 0x173   : > { %2424 = vst.msk [vmem:[#allocation2 + $0x78] sm:$0xff] %vm201_vm1, %v2392_v61  ;;  %3207 = vst.msk [vmem:[#allocation2 + $0x40] sm:$0xff] %vm201_vm1, %v3175_v31  ;;  %v3176_v54 = vadd.f32 %v3075_v51, %v2882_v5  ;;  %v6642_v2 = vpop.f32.mrb[60].mxu0  ;;  %v2075_v26 = vld [vmem:[#allocation2 + $0xc0] sm:$0xff]  ;;  %v2078_v31 = vld [vmem:[#allocation2 + $0xd8] sm:$0xff] }
 0x174   : > { %2422 = vst.msk [vmem:[#allocation2 + $0x68] sm:$0xff] %vm201_vm1, %v2390_v41  ;;  %3210 = vst.msk [vmem:[#allocation2 + $0x58] sm:$0xff] %vm201_vm1, %v3178_v46  ;;  %v3088_v3 = vpop.f32.mrb[61].mxu0 }
 0x175   : > { %3208 = vst.msk [vmem:[#allocation2 + $0x48] sm:$0xff] %vm201_vm1, %v3176_v54  ;;  %v6612_v56 = vpop.f32.mrb[64].mxu1  ;;  %v6643_v15 = vpop.f32.mrb[62].mxu0 }
 0x176   : > { %v2395_v47 = vadd.f32 %v6612_v56, %v2069_v37  ;;  %v2314_v10 = vpop.f32.mrb[65].mxu1  ;;  %v3091_v25 = vpop.f32.mrb[63].mxu0 }
 0x177   : > { %v2887_v1 = vld [vmem:[#allocation2 + $0x70] sm:$0xff]  ;;  %v2393_v62 = vadd.f32 %v2314_v10, %v2067_v22  ;;  %v6613_v53 = vpop.f32.mrb[66].mxu1 }
 0x178   : > { %v3181_v55 = vadd.f32 %v6642_v2, %v2887_v1  ;;  %2427 = vst.msk [vmem:[#allocation2 + $0x90] sm:$0xff] %vm201_vm1, %v2395_v47  ;;  %v2396_v27 = vadd.f32 %v6613_v53, %v2070_v21  ;;  %v2317_v4 = vpop.f32.mrb[67].mxu1  ;;  %v2076_v2 = vld [vmem:[#allocation2 + $0xc8] sm:$0xff]  ;;  %v2081_v1 = vld [vmem:[#allocation2 + $0xf0] sm:$0xff] }
 0x179   : > { %v2885_v7 = vld [vmem:[#allocation2 + $0x60] sm:$0xff]  ;;  %2425 = vst.msk [vmem:[#allocation2 + $0x80] sm:$0xff] %vm201_vm1, %v2393_v62  ;;  %v2394_v50 = vadd.f32 %v2317_v4, %v2068_v42 }
 0x17a   : > { %v3179_v30 = vadd.f32 %v3088_v3, %v2885_v7  ;;  %v2888_v44 = vld [vmem:[#allocation2 + $0x78] sm:$0xff]  ;;  %3213 = vst.msk [vmem:[#allocation2 + $0x70] sm:$0xff] %vm201_vm1, %v3181_v55  ;;  %2428 = vst.msk [vmem:[#allocation2 + $0x98] sm:$0xff] %vm201_vm1, %v2396_v27  ;;  %v2079_v55 = vld [vmem:[#allocation2 + $0xe0] sm:$0xff] }
 0x17b   : > { %v3182_v63 = vadd.f32 %v6643_v15, %v2888_v44  ;;  %v2886_v0 = vld [vmem:[#allocation2 + $0x68] sm:$0xff]  ;;  %2426 = vst.msk [vmem:[#allocation2 + $0x88] sm:$0xff] %vm201_vm1, %v2394_v50 }
 0x17c   : > { %3211 = vst.msk [vmem:[#allocation2 + $0x60] sm:$0xff] %vm201_vm1, %v3179_v30  ;;  %v3180_v49 = vadd.f32 %v3091_v25, %v2886_v0  ;;  %v6646_v16 = vpop.f32.mrb[64].mxu0  ;;  %v2082_v30 = vld [vmem:[#allocation2 + $0xf8] sm:$0xff] }
 0x17d   : > { %3214 = vst.msk [vmem:[#allocation2 + $0x78] sm:$0xff] %vm201_vm1, %v3182_v63  ;;  %v6616_v48 = vpop.f32.mrb[68].mxu1  ;;  %v3104_v43 = vpop.f32.mrb[65].mxu0 }
 0x17e   : > { %3212 = vst.msk [vmem:[#allocation2 + $0x68] sm:$0xff] %vm201_vm1, %v3180_v49  ;;  %v2399_v19 = vadd.f32 %v6616_v48, %v2073_v32  ;;  %v2330_v8 = vpop.f32.mrb[69].mxu1  ;;  %v6647_v23 = vpop.f32.mrb[66].mxu0 }
 0x17f   : > { %v2891_v58 = vld [vmem:[#allocation2 + $0x90] sm:$0xff]  ;;  %v2397_v60 = vadd.f32 %v2330_v8, %v2071_v36  ;;  %v6617_v57 = vpop.f32.mrb[70].mxu1  ;;  %v3107_v45 = vpop.f32.mrb[67].mxu0 }
 0x180   : > { %v3185_v9 = vadd.f32 %v6646_v16, %v2891_v58  ;;  %2431 = vst.msk [vmem:[#allocation2 + $0xb0] sm:$0xff] %vm201_vm1, %v2399_v19  ;;  %v2889_v29 = vld [vmem:[#allocation2 + $0x80] sm:$0xff]  ;;  %v2400_v39 = vadd.f32 %v6617_v57, %v2074_v52  ;;  %v2333_v14 = vpop.f32.mrb[71].mxu1  ;;  %v2080_v16 = vld [vmem:[#allocation2 + $0xe8] sm:$0xff]  ;;  %v3441_v52 = vld [vmem:[#allocation2 + $0x10] sm:$0xff] }
 0x181   : > { %v3183_v28 = vadd.f32 %v3104_v43, %v2889_v29  ;;  %2429 = vst.msk [vmem:[#allocation2 + $0xa0] sm:$0xff] %vm201_vm1, %v2397_v60  ;;  %v2892_v13 = vld [vmem:[#allocation2 + $0x98] sm:$0xff]  ;;  %v2398_v11 = vadd.f32 %v2333_v14, %v2072_v6 }
 0x182   : > { %3217 = vst.msk [vmem:[#allocation2 + $0x90] sm:$0xff] %vm201_vm1, %v3185_v9  ;;  %v3186_v24 = vadd.f32 %v6647_v23, %v2892_v13  ;;  %2432 = vst.msk [vmem:[#allocation2 + $0xb8] sm:$0xff] %vm201_vm1, %v2400_v39  ;;  %v2890_v59 = vld [vmem:[#allocation2 + $0x88] sm:$0xff]  ;;  %v3439_v39 = vld [vmem:[#allocation2] sm:$0xff] }
 0x183   : > { %3215 = vst.msk [vmem:[#allocation2 + $0x80] sm:$0xff] %vm201_vm1, %v3183_v28  ;;  %v3184_v34 = vadd.f32 %v3107_v45, %v2890_v59  ;;  %2430 = vst.msk [vmem:[#allocation2 + $0xa8] sm:$0xff] %vm201_vm1, %v2398_v11 }
 0x184   : > { %3218 = vst.msk [vmem:[#allocation2 + $0x98] sm:$0xff] %vm201_vm1, %v3186_v24  ;;  %v6650_v51 = vpop.f32.mrb[68].mxu0  ;;  %v3442_v24 = vld [vmem:[#allocation2 + $0x18] sm:$0xff] }
 0x185   : > { %3216 = vst.msk [vmem:[#allocation2 + $0x88] sm:$0xff] %vm201_vm1, %v3184_v34  ;;  %v6620_v18 = vpop.f32.mrb[72].mxu1  ;;  %v3120_v38 = vpop.f32.mrb[69].mxu0 }
 0x186   : > { %v2403_v40 = vadd.f32 %v6620_v18, %v2077_v33  ;;  %v2346_v17 = vpop.f32.mrb[73].mxu1  ;;  %v6651_v61 = vpop.f32.mrb[70].mxu0  ;;  %v3440_v18 = vld [vmem:[#allocation2 + $0x8] sm:$0xff] }
 0x187   : > { %v2895_v20 = vld [vmem:[#allocation2 + $0xb0] sm:$0xff]  ;;  %v2401_v35 = vadd.f32 %v2346_v17, %v2075_v26  ;;  %v6621_v12 = vpop.f32.mrb[74].mxu1  ;;  %v3123_v41 = vpop.f32.mrb[71].mxu0 }
 0x188   : > { %v3189_v46 = vadd.f32 %v6650_v51, %v2895_v20  ;;  %2435 = vst.msk [vmem:[#allocation2 + $0xd0] sm:$0xff] %vm201_vm1, %v2403_v40  ;;  %v2893_v5 = vld [vmem:[#allocation2 + $0xa0] sm:$0xff]  ;;  %v2404_v54 = vadd.f32 %v6621_v12, %v2078_v31  ;;  %v2349_v3 = vpop.f32.mrb[75].mxu1  ;;  %v3445_v31 = vld [vmem:[#allocation2 + $0x30] sm:$0xff] }
 0x189   : > { %v3187_v37 = vadd.f32 %v3120_v38, %v2893_v5  ;;  %2433 = vst.msk [vmem:[#allocation2 + $0xc0] sm:$0xff] %vm201_vm1, %v2401_v35  ;;  %v2896_v56 = vld [vmem:[#allocation2 + $0xb8] sm:$0xff]  ;;  %v2402_v15 = vadd.f32 %v2349_v3, %v2076_v2  ;;  %v3443_v5 = vld [vmem:[#allocation2 + $0x20] sm:$0xff] }
 0x18a   : > { %3221 = vst.msk [vmem:[#allocation2 + $0xb0] sm:$0xff] %vm201_vm1, %v3189_v46  ;;  %v3190_v47 = vadd.f32 %v6651_v61, %v2896_v56  ;;  %2436 = vst.msk [vmem:[#allocation2 + $0xd8] sm:$0xff] %vm201_vm1, %v2404_v54  ;;  %v2894_v22 = vld [vmem:[#allocation2 + $0xa8] sm:$0xff]  ;;  %v3446_v56 = vld [vmem:[#allocation2 + $0x38] sm:$0xff] }
 0x18b   : > { %3219 = vst.msk [vmem:[#allocation2 + $0xa0] sm:$0xff] %vm201_vm1, %v3187_v37  ;;  %v3188_v10 = vadd.f32 %v3123_v41, %v2894_v22  ;;  %2434 = vst.msk [vmem:[#allocation2 + $0xc8] sm:$0xff] %vm201_vm1, %v2402_v15 }
 0x18c   : > { %3222 = vst.msk [vmem:[#allocation2 + $0xb8] sm:$0xff] %vm201_vm1, %v3190_v47 }
 0x18d   : > { %v6654_v25 = vpop.f32.mrb[72].mxu0  ;;  %3220 = vst.msk [vmem:[#allocation2 + $0xa8] sm:$0xff] %vm201_vm1, %v3188_v10  ;;  %v6624_v62 = vpop.f32.mrb[76].mxu1 }
 0x18e   : > { %v3136_v21 = vpop.f32.mrb[73].mxu0  ;;  %v2407_v53 = vadd.f32 %v6624_v62, %v2081_v1  ;;  %v2362_v7 = vpop.f32.mrb[77].mxu1 }
 0x18f   : > { %v6655_v27 = vpop.f32.mrb[74].mxu0  ;;  %v2899_v42 = vld [vmem:[#allocation2 + $0xd0] sm:$0xff]  ;;  %v2405_v4 = vadd.f32 %v2362_v7, %v2079_v55  ;;  %v6625_v44 = vpop.f32.mrb[78].mxu1 }
 0x190   : > { %v3139_v50 = vpop.f32.mrb[75].mxu0  ;;  %v3193_v63 = vadd.f32 %v6654_v25, %v2899_v42  ;;  %2439 = vst.msk [vmem:[#allocation2 + $0xf0] sm:$0xff] %vm201_vm1, %v2407_v53  ;;  %v2897_v0 = vld [vmem:[#allocation2 + $0xc0] sm:$0xff]  ;;  %v2408_v49 = vadd.f32 %v6625_v44, %v2082_v30  ;;  %v2365_v32 = vpop.f32.mrb[79].mxu1  ;;  %v3444_v25 = vld [vmem:[#allocation2 + $0x28] sm:$0xff]  ;;  %v3449_v30 = vld [vmem:[#allocation2 + $0x50] sm:$0xff] }
 0x191   : > { %v3191_v48 = vadd.f32 %v3136_v21, %v2897_v0  ;;  %2437 = vst.msk [vmem:[#allocation2 + $0xe0] sm:$0xff] %vm201_vm1, %v2405_v4  ;;  %v2900_v43 = vld [vmem:[#allocation2 + $0xd8] sm:$0xff]  ;;  %v2406_v19 = vadd.f32 %v2365_v32, %v2080_v16  ;;  %v3447_v0 = vld [vmem:[#allocation2 + $0x40] sm:$0xff] }
 0x192   : > { %3225 = vst.msk [vmem:[#allocation2 + $0xd0] sm:$0xff] %vm201_vm1, %v3193_v63  ;;  %v3194_v36 = vadd.f32 %v6655_v27, %v2900_v43  ;;  %2440 = vst.msk [vmem:[#allocation2 + $0xf8] sm:$0xff] %vm201_vm1, %v2408_v49  ;;  %v2898_v8 = vld [vmem:[#allocation2 + $0xc8] sm:$0xff]  ;;  %v3450_v43 = vld [vmem:[#allocation2 + $0x58] sm:$0xff] }
 0x193   : > { %3223 = vst.msk [vmem:[#allocation2 + $0xc0] sm:$0xff] %vm201_vm1, %v3191_v48  ;;  %v3192_v23 = vadd.f32 %v3139_v50, %v2898_v8  ;;  %2438 = vst.msk [vmem:[#allocation2 + $0xe8] sm:$0xff] %vm201_vm1, %v2406_v19 }
 0x194   : > { %3226 = vst.msk [vmem:[#allocation2 + $0xd8] sm:$0xff] %vm201_vm1, %v3194_v36 }
 0x195   : > { %v6658_v58 = vpop.f32.mrb[76].mxu0  ;;  %3224 = vst.msk [vmem:[#allocation2 + $0xc8] sm:$0xff] %vm201_vm1, %v3192_v23 }
 0x196   : > { %v3152_v60 = vpop.f32.mrb[77].mxu0  ;;  %v6664_v57 = vpop.f32.mrb[80].mxu1 }
 0x197   : > { %v6659_v45 = vpop.f32.mrb[78].mxu0  ;;  %v2903_v9 = vld [vmem:[#allocation2 + $0xf0] sm:$0xff]  ;;  %v3735_v29 = vadd.f32 %v6664_v57, %v3441_v52  ;;  %v3606_v6 = vpop.f32.mrb[81].mxu1 }
 0x198   : > { %v3155_v14 = vpop.f32.mrb[79].mxu0  ;;  %v3197_v28 = vadd.f32 %v6658_v58, %v2903_v9  ;;  %v2901_v13 = vld [vmem:[#allocation2 + $0xe0] sm:$0xff]  ;;  %v3733_v11 = vadd.f32 %v3606_v6, %v3439_v39  ;;  %v6665_v59 = vpop.f32.mrb[82].mxu1  ;;  %v3448_v58 = vld [vmem:[#allocation2 + $0x48] sm:$0xff] }
 0x199   : > { %v3195_v34 = vadd.f32 %v3152_v60, %v2901_v13  ;;  %3767 = vst.msk [vmem:[#allocation2 + $0x10] sm:$0xff] %vm201_vm1, %v3735_v29  ;;  %v2904_v51 = vld [vmem:[#allocation2 + $0xf8] sm:$0xff]  ;;  %v3736_v33 = vadd.f32 %v6665_v59, %v3442_v24  ;;  %v3609_v38 = vpop.f32.mrb[83].mxu1  ;;  %v3451_v59 = vld [vmem:[#allocation2 + $0x60] sm:$0xff] }
 0x19a   : > { %3229 = vst.msk [vmem:[#allocation2 + $0xf0] sm:$0xff] %vm201_vm1, %v3197_v28  ;;  %v3198_v40 = vadd.f32 %v6659_v45, %v2904_v51  ;;  %3765 = vst.msk [vmem:[#allocation2] sm:$0xff] %vm201_vm1, %v3733_v11  ;;  %v2902_v26 = vld [vmem:[#allocation2 + $0xe8] sm:$0xff]  ;;  %v3734_v17 = vadd.f32 %v3609_v38, %v3440_v18  ;;  %v3453_v28 = vld [vmem:[#allocation2 + $0x70] sm:$0xff] }
 0x19b   : > { %3227 = vst.msk [vmem:[#allocation2 + $0xe0] sm:$0xff] %vm201_vm1, %v3195_v34  ;;  %v3196_v61 = vadd.f32 %v3155_v14, %v2902_v26  ;;  %3768 = vst.msk [vmem:[#allocation2 + $0x18] sm:$0xff] %vm201_vm1, %v3736_v33  ;;  %v3454_v38 = vld [vmem:[#allocation2 + $0x78] sm:$0xff] }
 0x19c   : > { %3230 = vst.msk [vmem:[#allocation2 + $0xf8] sm:$0xff] %vm201_vm1, %v3198_v40  ;;  %3766 = vst.msk [vmem:[#allocation2 + $0x8] sm:$0xff] %vm201_vm1, %v3734_v17 }
 0x19d   : > { %v6698_v20 = vpop.f32.mrb[80].mxu0  ;;  %3228 = vst.msk [vmem:[#allocation2 + $0xe8] sm:$0xff] %vm201_vm1, %v3196_v61 }
 0x19e   : > { %v4029_v35 = vpop.f32.mrb[81].mxu0 }
 0x19f   : > { %v6668_v12 = vpop.f32.mrb[84].mxu1  ;;  %v6699_v41 = vpop.f32.mrb[82].mxu0 }
 0x1a0   : > { %v3739_v46 = vadd.f32 %v6668_v12, %v3445_v31  ;;  %v3622_v54 = vpop.f32.mrb[85].mxu1  ;;  %v4032_v2 = vpop.f32.mrb[83].mxu0  ;;  %v3832_v3 = vld [vmem:[#allocation2 + $0x10] sm:$0xff] }
 0x1a1   : > { %v3737_v37 = vadd.f32 %v3622_v54, %v3443_v5  ;;  %v6669_v15 = vpop.f32.mrb[86].mxu1  ;;  %v4158_v47 = vadd.f32 %v6698_v20, %v3832_v3  ;;  %v3830_v22 = vld [vmem:[#allocation2] sm:$0xff]  ;;  %v3452_v20 = vld [vmem:[#allocation2 + $0x68] sm:$0xff] }
 0x1a2   : > { %3771 = vst.msk [vmem:[#allocation2 + $0x30] sm:$0xff] %vm201_vm1, %v3739_v46  ;;  %v3740_v10 = vadd.f32 %v6669_v15, %v3446_v56  ;;  %v3625_v1 = vpop.f32.mrb[87].mxu1  ;;  %v4156_v62 = vadd.f32 %v4029_v35, %v3830_v22  ;;  %v3833_v21 = vld [vmem:[#allocation2 + $0x18] sm:$0xff]  ;;  %v3455_v22 = vld [vmem:[#allocation2 + $0x80] sm:$0xff] }
 0x1a3   : > { %3769 = vst.msk [vmem:[#allocation2 + $0x20] sm:$0xff] %vm201_vm1, %v3737_v37  ;;  %v3738_v53 = vadd.f32 %v3625_v1, %v3444_v25  ;;  %4190 = vst.msk [vmem:[#allocation2 + $0x10] sm:$0xff] %vm201_vm1, %v4158_v47  ;;  %v4159_v55 = vadd.f32 %v6699_v41, %v3833_v21  ;;  %v3831_v7 = vld [vmem:[#allocation2 + $0x8] sm:$0xff]  ;;  %v3457_v37 = vld [vmem:[#allocation2 + $0x90] sm:$0xff] }
 0x1a4   : > { %3772 = vst.msk [vmem:[#allocation2 + $0x38] sm:$0xff] %vm201_vm1, %v3740_v10  ;;  %4188 = vst.msk [vmem:[#allocation2] sm:$0xff] %vm201_vm1, %v4156_v62  ;;  %v4157_v27 = vadd.f32 %v4032_v2, %v3831_v7  ;;  %v3458_v21 = vld [vmem:[#allocation2 + $0x98] sm:$0xff] }
 0x1a5   : > { %3770 = vst.msk [vmem:[#allocation2 + $0x28] sm:$0xff] %vm201_vm1, %v3738_v53  ;;  %v6702_v42 = vpop.f32.mrb[84].mxu0  ;;  %4191 = vst.msk [vmem:[#allocation2 + $0x18] sm:$0xff] %vm201_vm1, %v4159_v55 }
 0x1a6   : > { %v4045_v4 = vpop.f32.mrb[85].mxu0  ;;  %4189 = vst.msk [vmem:[#allocation2 + $0x8] sm:$0xff] %vm201_vm1, %v4157_v27 }
 0x1a7   : > { %v6672_v44 = vpop.f32.mrb[88].mxu1  ;;  %v6703_v50 = vpop.f32.mrb[86].mxu0 }
 0x1a8   : > { %v3743_v63 = vadd.f32 %v6672_v44, %v3449_v30  ;;  %v3638_v49 = vpop.f32.mrb[89].mxu1  ;;  %v4048_v16 = vpop.f32.mrb[87].mxu0 }
 0x1a9   : > { %v3836_v32 = vld [vmem:[#allocation2 + $0x30] sm:$0xff]  ;;  %v3741_v48 = vadd.f32 %v3638_v49, %v3447_v0  ;;  %v6673_v19 = vpop.f32.mrb[90].mxu1 }
 0x1aa   : > { %v4162_v36 = vadd.f32 %v6702_v42, %v3836_v32  ;;  %3775 = vst.msk [vmem:[#allocation2 + $0x50] sm:$0xff] %vm201_vm1, %v3743_v63  ;;  %v3834_v8 = vld [vmem:[#allocation2 + $0x20] sm:$0xff]  ;;  %v3744_v23 = vadd.f32 %v6673_v19, %v3450_v43  ;;  %v3641_v60 = vpop.f32.mrb[91].mxu1  ;;  %v3456_v42 = vld [vmem:[#allocation2 + $0x88] sm:$0xff] }
 0x1ab   : > { %v4160_v52 = vadd.f32 %v4045_v4, %v3834_v8  ;;  %3773 = vst.msk [vmem:[#allocation2 + $0x40] sm:$0xff] %vm201_vm1, %v3741_v48  ;;  %v3837_v57 = vld [vmem:[#allocation2 + $0x38] sm:$0xff]  ;;  %v3742_v45 = vadd.f32 %v3641_v60, %v3448_v58  ;;  %v3461_v48 = vld [vmem:[#allocation2 + $0xb0] sm:$0xff]  ;;  %v3459_v8 = vld [vmem:[#allocation2 + $0xa0] sm:$0xff] }
 0x1ac   : > { %4194 = vst.msk [vmem:[#allocation2 + $0x30] sm:$0xff] %vm201_vm1, %v4162_v36  ;;  %v4163_v9 = vadd.f32 %v6703_v50, %v3837_v57  ;;  %3776 = vst.msk [vmem:[#allocation2 + $0x58] sm:$0xff] %vm201_vm1, %v3744_v23  ;;  %v3835_v29 = vld [vmem:[#allocation2 + $0x28] sm:$0xff]  ;;  %v3462_v57 = vld [vmem:[#allocation2 + $0xb8] sm:$0xff] }
 0x1ad   : > { %4192 = vst.msk [vmem:[#allocation2 + $0x20] sm:$0xff] %vm201_vm1, %v4160_v52  ;;  %v4161_v39 = vadd.f32 %v4048_v16, %v3835_v29  ;;  %3774 = vst.msk [vmem:[#allocation2 + $0x48] sm:$0xff] %vm201_vm1, %v3742_v45  ;;  %v6706_v6 = vpop.f32.mrb[88].mxu0 }
 0x1ae   : > { %4195 = vst.msk [vmem:[#allocation2 + $0x38] sm:$0xff] %vm201_vm1, %v4163_v9  ;;  %v4061_v14 = vpop.f32.mrb[89].mxu0 }
 0x1af   : > { %4193 = vst.msk [vmem:[#allocation2 + $0x28] sm:$0xff] %vm201_vm1, %v4161_v39  ;;  %v6676_v13 = vpop.f32.mrb[92].mxu1  ;;  %v6707_v11 = vpop.f32.mrb[90].mxu0 }
 0x1b0   : > { %v3747_v24 = vadd.f32 %v6676_v13, %v3453_v28  ;;  %v3654_v34 = vpop.f32.mrb[93].mxu1  ;;  %v4064_v51 = vpop.f32.mrb[91].mxu0 }
 0x1b1   : > { %v3840_v33 = vld [vmem:[#allocation2 + $0x50] sm:$0xff]  ;;  %v3745_v18 = vadd.f32 %v3654_v34, %v3451_v59  ;;  %v6677_v40 = vpop.f32.mrb[94].mxu1 }
 0x1b2   : > { %v4166_v26 = vadd.f32 %v6706_v6, %v3840_v33  ;;  %3779 = vst.msk [vmem:[#allocation2 + $0x70] sm:$0xff] %vm201_vm1, %v3747_v24  ;;  %v3838_v17 = vld [vmem:[#allocation2 + $0x40] sm:$0xff]  ;;  %v3748_v61 = vadd.f32 %v6677_v40, %v3454_v38  ;;  %v3657_v35 = vpop.f32.mrb[95].mxu1  ;;  %v3460_v6 = vld [vmem:[#allocation2 + $0xa8] sm:$0xff] }
 0x1b3   : > { %v4164_v31 = vadd.f32 %v4061_v14, %v3838_v17  ;;  %3777 = vst.msk [vmem:[#allocation2 + $0x60] sm:$0xff] %vm201_vm1, %v3745_v18  ;;  %v3841_v12 = vld [vmem:[#allocation2 + $0x58] sm:$0xff]  ;;  %v3746_v41 = vadd.f32 %v3657_v35, %v3452_v20  ;;  %v3465_v18 = vld [vmem:[#allocation2 + $0xd0] sm:$0xff]  ;;  %v3463_v17 = vld [vmem:[#allocation2 + $0xc0] sm:$0xff] }
 0x1b4   : > { %4198 = vst.msk [vmem:[#allocation2 + $0x50] sm:$0xff] %vm201_vm1, %v4166_v26  ;;  %v4167_v46 = vadd.f32 %v6707_v11, %v3841_v12  ;;  %3780 = vst.msk [vmem:[#allocation2 + $0x78] sm:$0xff] %vm201_vm1, %v3748_v61  ;;  %v3839_v5 = vld [vmem:[#allocation2 + $0x48] sm:$0xff]  ;;  %v3466_v12 = vld [vmem:[#allocation2 + $0xd8] sm:$0xff] }
 0x1b5   : > { %4196 = vst.msk [vmem:[#allocation2 + $0x40] sm:$0xff] %vm201_vm1, %v4164_v31  ;;  %v4165_v54 = vadd.f32 %v4064_v51, %v3839_v5  ;;  %3778 = vst.msk [vmem:[#allocation2 + $0x68] sm:$0xff] %vm201_vm1, %v3746_v41  ;;  %v6710_v2 = vpop.f32.mrb[92].mxu0 }
 0x1b6   : > { %4199 = vst.msk [vmem:[#allocation2 + $0x58] sm:$0xff] %vm201_vm1, %v4167_v46  ;;  %v4077_v3 = vpop.f32.mrb[93].mxu0 }
 0x1b7   : > { %4197 = vst.msk [vmem:[#allocation2 + $0x48] sm:$0xff] %vm201_vm1, %v4165_v54  ;;  %v6680_v56 = vpop.f32.mrb[96].mxu1  ;;  %v6711_v15 = vpop.f32.mrb[94].mxu0 }
 0x1b8   : > { %v3751_v47 = vadd.f32 %v6680_v56, %v3457_v37  ;;  %v3670_v10 = vpop.f32.mrb[97].mxu1  ;;  %v4080_v25 = vpop.f32.mrb[95].mxu0 }
 0x1b9   : > { %v3844_v1 = vld [vmem:[#allocation2 + $0x70] sm:$0xff]  ;;  %v3749_v62 = vadd.f32 %v3670_v10, %v3455_v22  ;;  %v6681_v53 = vpop.f32.mrb[98].mxu1 }
 0x1ba   : > { %v4170_v55 = vadd.f32 %v6710_v2, %v3844_v1  ;;  %3783 = vst.msk [vmem:[#allocation2 + $0x90] sm:$0xff] %vm201_vm1, %v3751_v47  ;;  %v3842_v7 = vld [vmem:[#allocation2 + $0x60] sm:$0xff]  ;;  %v3752_v27 = vadd.f32 %v6681_v53, %v3458_v21  ;;  %v3673_v4 = vpop.f32.mrb[99].mxu1  ;;  %v3464_v2 = vld [vmem:[#allocation2 + $0xc8] sm:$0xff] }
 0x1bb   : > { %v4168_v30 = vadd.f32 %v4077_v3, %v3842_v7  ;;  %3781 = vst.msk [vmem:[#allocation2 + $0x80] sm:$0xff] %vm201_vm1, %v3749_v62  ;;  %v3845_v44 = vld [vmem:[#allocation2 + $0x78] sm:$0xff]  ;;  %v3750_v50 = vadd.f32 %v3673_v4, %v3456_v42  ;;  %v3469_v62 = vld [vmem:[#allocation2 + $0xf0] sm:$0xff]  ;;  %v3467_v7 = vld [vmem:[#allocation2 + $0xe0] sm:$0xff] }
 0x1bc   : > { %4202 = vst.msk [vmem:[#allocation2 + $0x70] sm:$0xff] %vm201_vm1, %v4170_v55  ;;  %v4171_v63 = vadd.f32 %v6711_v15, %v3845_v44  ;;  %3784 = vst.msk [vmem:[#allocation2 + $0x98] sm:$0xff] %vm201_vm1, %v3752_v27  ;;  %v3843_v0 = vld [vmem:[#allocation2 + $0x68] sm:$0xff]  ;;  %v3470_v44 = vld [vmem:[#allocation2 + $0xf8] sm:$0xff] }
 0x1bd   : > { %4200 = vst.msk [vmem:[#allocation2 + $0x60] sm:$0xff] %vm201_vm1, %v4168_v30  ;;  %v4169_v49 = vadd.f32 %v4080_v25, %v3843_v0  ;;  %3782 = vst.msk [vmem:[#allocation2 + $0x88] sm:$0xff] %vm201_vm1, %v3750_v50  ;;  %v6714_v16 = vpop.f32.mrb[96].mxu0 }
 0x1be   : > { %4203 = vst.msk [vmem:[#allocation2 + $0x78] sm:$0xff] %vm201_vm1, %v4171_v63  ;;  %v4093_v32 = vpop.f32.mrb[97].mxu0 }
 0x1bf   : > { %4201 = vst.msk [vmem:[#allocation2 + $0x68] sm:$0xff] %vm201_vm1, %v4169_v49  ;;  %v6684_v43 = vpop.f32.mrb[100].mxu1  ;;  %v6715_v19 = vpop.f32.mrb[98].mxu0 }
 0x1c0   : > { %v3755_v36 = vadd.f32 %v6684_v43, %v3461_v48  ;;  %v3686_v23 = vpop.f32.mrb[101].mxu1  ;;  %v4096_v58 = vpop.f32.mrb[99].mxu0 }
 0x1c1   : > { %v3848_v60 = vld [vmem:[#allocation2 + $0x90] sm:$0xff]  ;;  %v3753_v52 = vadd.f32 %v3686_v23, %v3459_v8  ;;  %v6685_v45 = vpop.f32.mrb[102].mxu1 }
 0x1c2   : > { %v4174_v9 = vadd.f32 %v6714_v16, %v3848_v60  ;;  %3787 = vst.msk [vmem:[#allocation2 + $0xb0] sm:$0xff] %vm201_vm1, %v3755_v36  ;;  %v3846_v29 = vld [vmem:[#allocation2 + $0x80] sm:$0xff]  ;;  %v3756_v39 = vadd.f32 %v6685_v45, %v3462_v57  ;;  %v3689_v14 = vpop.f32.mrb[103].mxu1  ;;  %v3468_v16 = vld [vmem:[#allocation2 + $0xe8] sm:$0xff] }
 0x1c3   : > { %v4172_v28 = vadd.f32 %v4093_v32, %v3846_v29  ;;  %3785 = vst.msk [vmem:[#allocation2 + $0xa0] sm:$0xff] %vm201_vm1, %v3753_v52  ;;  %v3849_v13 = vld [vmem:[#allocation2 + $0x98] sm:$0xff]  ;;  %v3754_v11 = vadd.f32 %v3689_v14, %v3460_v6  ;;  %v4654_v52 = vld [vmem:[#allocation2 + $0x10] sm:$0xff]  ;;  %v4652_v29 = vld [vmem:[#allocation2] sm:$0xff] }
 0x1c4   : > { %4206 = vst.msk [vmem:[#allocation2 + $0x90] sm:$0xff] %vm201_vm1, %v4174_v9  ;;  %v4175_v24 = vadd.f32 %v6715_v19, %v3849_v13  ;;  %3788 = vst.msk [vmem:[#allocation2 + $0xb8] sm:$0xff] %vm201_vm1, %v3756_v39  ;;  %v3847_v59 = vld [vmem:[#allocation2 + $0x88] sm:$0xff]  ;;  %v4655_v13 = vld [vmem:[#allocation2 + $0x18] sm:$0xff] }
 0x1c5   : > { %4204 = vst.msk [vmem:[#allocation2 + $0x80] sm:$0xff] %vm201_vm1, %v4172_v28  ;;  %v4173_v34 = vadd.f32 %v4096_v58, %v3847_v59  ;;  %3786 = vst.msk [vmem:[#allocation2 + $0xa8] sm:$0xff] %vm201_vm1, %v3754_v11  ;;  %v6718_v51 = vpop.f32.mrb[100].mxu0 }
 0x1c6   : > { %4207 = vst.msk [vmem:[#allocation2 + $0x98] sm:$0xff] %vm201_vm1, %v4175_v24  ;;  %v4109_v33 = vpop.f32.mrb[101].mxu0 }
 0x1c7   : > { %4205 = vst.msk [vmem:[#allocation2 + $0x88] sm:$0xff] %vm201_vm1, %v4173_v34  ;;  %v6719_v40 = vpop.f32.mrb[102].mxu0 }
 0x1c8   : > { %v6688_v38 = vpop.f32.mrb[104].mxu1  ;;  %v4112_v20 = vpop.f32.mrb[103].mxu0 }
 0x1c9   : > { %v3759_v26 = vadd.f32 %v6688_v38, %v3465_v18  ;;  %v3702_v61 = vpop.f32.mrb[105].mxu1  ;;  %v3852_v35 = vld [vmem:[#allocation2 + $0xb0] sm:$0xff] }
 0x1ca   : > { %v3757_v31 = vadd.f32 %v3702_v61, %v3463_v17  ;;  %v6689_v41 = vpop.f32.mrb[106].mxu1  ;;  %v4178_v46 = vadd.f32 %v6718_v51, %v3852_v35  ;;  %v3850_v5 = vld [vmem:[#allocation2 + $0xa0] sm:$0xff]  ;;  %v4653_v51 = vld [vmem:[#allocation2 + $0x8] sm:$0xff] }
 0x1cb   : > { %3791 = vst.msk [vmem:[#allocation2 + $0xd0] sm:$0xff] %vm201_vm1, %v3759_v26  ;;  %v3760_v54 = vadd.f32 %v6689_v41, %v3466_v12  ;;  %v3705_v3 = vpop.f32.mrb[107].mxu1  ;;  %v4176_v37 = vadd.f32 %v4109_v33, %v3850_v5  ;;  %v3853_v56 = vld [vmem:[#allocation2 + $0xb8] sm:$0xff]  ;;  %v4656_v5 = vld [vmem:[#allocation2 + $0x20] sm:$0xff] }
 0x1cc   : > { %3789 = vst.msk [vmem:[#allocation2 + $0xc0] sm:$0xff] %vm201_vm1, %v3757_v31  ;;  %v3758_v15 = vadd.f32 %v3705_v3, %v3464_v2  ;;  %4210 = vst.msk [vmem:[#allocation2 + $0xb0] sm:$0xff] %vm201_vm1, %v4178_v46  ;;  %v4179_v47 = vadd.f32 %v6719_v40, %v3853_v56  ;;  %v3851_v22 = vld [vmem:[#allocation2 + $0xa8] sm:$0xff]  ;;  %v4658_v31 = vld [vmem:[#allocation2 + $0x30] sm:$0xff] }
 0x1cd   : > { %3792 = vst.msk [vmem:[#allocation2 + $0xd8] sm:$0xff] %vm201_vm1, %v3760_v54  ;;  %4208 = vst.msk [vmem:[#allocation2 + $0xa0] sm:$0xff] %vm201_vm1, %v4176_v37  ;;  %v4177_v10 = vadd.f32 %v4112_v20, %v3851_v22  ;;  %v4659_v56 = vld [vmem:[#allocation2 + $0x38] sm:$0xff] }
 0x1ce   : > { %3790 = vst.msk [vmem:[#allocation2 + $0xc8] sm:$0xff] %vm201_vm1, %v3758_v15  ;;  %4211 = vst.msk [vmem:[#allocation2 + $0xb8] sm:$0xff] %vm201_vm1, %v4179_v47 }
 0x1cf   : > { %v6722_v25 = vpop.f32.mrb[104].mxu0  ;;  %4209 = vst.msk [vmem:[#allocation2 + $0xa8] sm:$0xff] %vm201_vm1, %v4177_v10 }
 0x1d0   : > { %v4125_v1 = vpop.f32.mrb[105].mxu0  ;;  %v6692_v21 = vpop.f32.mrb[108].mxu1 }
 0x1d1   : > { %v6723_v53 = vpop.f32.mrb[106].mxu0  ;;  %v3763_v55 = vadd.f32 %v6692_v21, %v3469_v62  ;;  %v3718_v27 = vpop.f32.mrb[109].mxu1 }
 0x1d2   : > { %v4128_v42 = vpop.f32.mrb[107].mxu0  ;;  %v3856_v4 = vld [vmem:[#allocation2 + $0xd0] sm:$0xff]  ;;  %v3761_v30 = vadd.f32 %v3718_v27, %v3467_v7  ;;  %v6693_v50 = vpop.f32.mrb[110].mxu1 }
 0x1d3   : > { %v4182_v63 = vadd.f32 %v6722_v25, %v3856_v4  ;;  %3795 = vst.msk [vmem:[#allocation2 + $0xf0] sm:$0xff] %vm201_vm1, %v3763_v55  ;;  %v3854_v0 = vld [vmem:[#allocation2 + $0xc0] sm:$0xff]  ;;  %v3764_v49 = vadd.f32 %v6693_v50, %v3470_v44  ;;  %v3721_v32 = vpop.f32.mrb[111].mxu1  ;;  %v4657_v25 = vld [vmem:[#allocation2 + $0x28] sm:$0xff] }
 0x1d4   : > { %v4180_v48 = vadd.f32 %v4125_v1, %v3854_v0  ;;  %3793 = vst.msk [vmem:[#allocation2 + $0xe0] sm:$0xff] %vm201_vm1, %v3761_v30  ;;  %v3857_v43 = vld [vmem:[#allocation2 + $0xd8] sm:$0xff]  ;;  %v3762_v19 = vadd.f32 %v3721_v32, %v3468_v16  ;;  %v4662_v30 = vld [vmem:[#allocation2 + $0x50] sm:$0xff]  ;;  %v4660_v0 = vld [vmem:[#allocation2 + $0x40] sm:$0xff] }
 0x1d5   : > { %4214 = vst.msk [vmem:[#allocation2 + $0xd0] sm:$0xff] %vm201_vm1, %v4182_v63  ;;  %v4183_v36 = vadd.f32 %v6723_v53, %v3857_v43  ;;  %3796 = vst.msk [vmem:[#allocation2 + $0xf8] sm:$0xff] %vm201_vm1, %v3764_v49  ;;  %v3855_v8 = vld [vmem:[#allocation2 + $0xc8] sm:$0xff]  ;;  %v4663_v43 = vld [vmem:[#allocation2 + $0x58] sm:$0xff] }
 0x1d6   : > { %4212 = vst.msk [vmem:[#allocation2 + $0xc0] sm:$0xff] %vm201_vm1, %v4180_v48  ;;  %v4181_v23 = vadd.f32 %v4128_v42, %v3855_v8  ;;  %3794 = vst.msk [vmem:[#allocation2 + $0xe8] sm:$0xff] %vm201_vm1, %v3762_v19 }
 0x1d7   : > { %v6726_v58 = vpop.f32.mrb[108].mxu0  ;;  %4215 = vst.msk [vmem:[#allocation2 + $0xd8] sm:$0xff] %vm201_vm1, %v4183_v36 }
 0x1d8   : > { %v4141_v60 = vpop.f32.mrb[109].mxu0  ;;  %4213 = vst.msk [vmem:[#allocation2 + $0xc8] sm:$0xff] %vm201_vm1, %v4181_v23  ;;  %v6732_v57 = vpop.f32.mrb[112].mxu1 }
 0x1d9   : > { %v6727_v45 = vpop.f32.mrb[110].mxu0  ;;  %v4948_v9 = vadd.f32 %v6732_v57, %v4654_v52  ;;  %v4819_v39 = vpop.f32.mrb[113].mxu1 }
 0x1da   : > { %v4144_v6 = vpop.f32.mrb[111].mxu0  ;;  %v3860_v14 = vld [vmem:[#allocation2 + $0xf0] sm:$0xff]  ;;  %v4946_v28 = vadd.f32 %v4819_v39, %v4652_v29  ;;  %v6733_v11 = vpop.f32.mrb[114].mxu1 }
 0x1db   : > { %v4186_v24 = vadd.f32 %v6726_v58, %v3860_v14  ;;  %v3858_v59 = vld [vmem:[#allocation2 + $0xe0] sm:$0xff]  ;;  %4980 = vst.msk [vmem:[#allocation2 + $0x10] sm:$0xff] %vm201_vm1, %v4948_v9  ;;  %v4949_v34 = vadd.f32 %v6733_v11, %v4655_v13  ;;  %v4822_v33 = vpop.f32.mrb[115].mxu1  ;;  %v4661_v58 = vld [vmem:[#allocation2 + $0x48] sm:$0xff] }
 0x1dc   : > { %v4184_v18 = vadd.f32 %v4141_v60, %v3858_v59  ;;  %v3861_v38 = vld [vmem:[#allocation2 + $0xf8] sm:$0xff]  ;;  %4978 = vst.msk [vmem:[#allocation2] sm:$0xff] %vm201_vm1, %v4946_v28  ;;  %v4947_v40 = vadd.f32 %v4822_v33, %v4653_v51  ;;  %v4666_v59 = vld [vmem:[#allocation2 + $0x70] sm:$0xff] }
 0x1dd   : > { %4218 = vst.msk [vmem:[#allocation2 + $0xf0] sm:$0xff] %vm201_vm1, %v4186_v24  ;;  %v4187_v26 = vadd.f32 %v6727_v45, %v3861_v38  ;;  %v3859_v17 = vld [vmem:[#allocation2 + $0xe8] sm:$0xff]  ;;  %4981 = vst.msk [vmem:[#allocation2 + $0x18] sm:$0xff] %vm201_vm1, %v4949_v34 }
 0x1de   : > { %4216 = vst.msk [vmem:[#allocation2 + $0xe0] sm:$0xff] %vm201_vm1, %v4184_v18  ;;  %v4185_v61 = vadd.f32 %v4144_v6, %v3859_v17  ;;  %4979 = vst.msk [vmem:[#allocation2 + $0x8] sm:$0xff] %vm201_vm1, %v4947_v40  ;;  %v4664_v18 = vld [vmem:[#allocation2 + $0x60] sm:$0xff] }
 0x1df   : > { %v6766_v20 = vpop.f32.mrb[112].mxu0  ;;  %4219 = vst.msk [vmem:[#allocation2 + $0xf8] sm:$0xff] %vm201_vm1, %v4187_v26 }
 0x1e0   : > { %v5385_v35 = vpop.f32.mrb[113].mxu0  ;;  %4217 = vst.msk [vmem:[#allocation2 + $0xe8] sm:$0xff] %vm201_vm1, %v4185_v61  ;;  %v6736_v12 = vpop.f32.mrb[116].mxu1  ;;  %v4667_v61 = vld [vmem:[#allocation2 + $0x78] sm:$0xff] }
 0x1e1   : > { %v6767_v41 = vpop.f32.mrb[114].mxu0  ;;  %v4952_v46 = vadd.f32 %v6736_v12, %v4658_v31  ;;  %v4835_v54 = vpop.f32.mrb[117].mxu1 }
 0x1e2   : > { %v5388_v2 = vpop.f32.mrb[115].mxu0  ;;  %v5220_v3 = vld [vmem:[#allocation2 + $0x10] sm:$0xff]  ;;  %v4950_v37 = vadd.f32 %v4835_v54, %v4656_v5  ;;  %v6737_v15 = vpop.f32.mrb[118].mxu1 }
 0x1e3   : > { %v5514_v47 = vadd.f32 %v6766_v20, %v5220_v3  ;;  %4984 = vst.msk [vmem:[#allocation2 + $0x30] sm:$0xff] %vm201_vm1, %v4952_v46  ;;  %v5218_v22 = vld [vmem:[#allocation2] sm:$0xff]  ;;  %v4953_v10 = vadd.f32 %v6737_v15, %v4659_v56  ;;  %v4838_v1 = vpop.f32.mrb[119].mxu1 }
 0x1e4   : > { %v5512_v62 = vadd.f32 %v5385_v35, %v5218_v22  ;;  %4982 = vst.msk [vmem:[#allocation2 + $0x20] sm:$0xff] %vm201_vm1, %v4950_v37  ;;  %v5221_v21 = vld [vmem:[#allocation2 + $0x18] sm:$0xff]  ;;  %v4951_v53 = vadd.f32 %v4838_v1, %v4657_v25 }
 0x1e5   : > { %5546 = vst.msk [vmem:[#allocation2 + $0x10] sm:$0xff] %vm201_vm1, %v5514_v47  ;;  %v5515_v55 = vadd.f32 %v6767_v41, %v5221_v21  ;;  %4985 = vst.msk [vmem:[#allocation2 + $0x38] sm:$0xff] %vm201_vm1, %v4953_v10  ;;  %v5219_v7 = vld [vmem:[#allocation2 + $0x8] sm:$0xff] }
 0x1e6   : > { %5544 = vst.msk [vmem:[#allocation2] sm:$0xff] %vm201_vm1, %v5512_v62  ;;  %v5513_v27 = vadd.f32 %v5388_v2, %v5219_v7  ;;  %4983 = vst.msk [vmem:[#allocation2 + $0x28] sm:$0xff] %vm201_vm1, %v4951_v53  ;;  %v4665_v41 = vld [vmem:[#allocation2 + $0x68] sm:$0xff]  ;;  %v4670_v62 = vld [vmem:[#allocation2 + $0x90] sm:$0xff] }
 0x1e7   : > { %v6770_v42 = vpop.f32.mrb[116].mxu0  ;;  %5547 = vst.msk [vmem:[#allocation2 + $0x18] sm:$0xff] %vm201_vm1, %v5515_v55  ;;  %v4668_v7 = vld [vmem:[#allocation2 + $0x80] sm:$0xff] }
 0x1e8   : > { %v5401_v4 = vpop.f32.mrb[117].mxu0  ;;  %5545 = vst.msk [vmem:[#allocation2 + $0x8] sm:$0xff] %vm201_vm1, %v5513_v27  ;;  %v6740_v44 = vpop.f32.mrb[120].mxu1 }
 0x1e9   : > { %v6771_v50 = vpop.f32.mrb[118].mxu0  ;;  %v4956_v63 = vadd.f32 %v6740_v44, %v4662_v30  ;;  %v4851_v49 = vpop.f32.mrb[121].mxu1  ;;  %v4671_v44 = vld [vmem:[#allocation2 + $0x98] sm:$0xff] }
 0x1ea   : > { %v5404_v16 = vpop.f32.mrb[119].mxu0  ;;  %v5224_v32 = vld [vmem:[#allocation2 + $0x30] sm:$0xff]  ;;  %v4954_v48 = vadd.f32 %v4851_v49, %v4660_v0  ;;  %v6741_v19 = vpop.f32.mrb[122].mxu1 }
 0x1eb   : > { %v5518_v36 = vadd.f32 %v6770_v42, %v5224_v32  ;;  %4988 = vst.msk [vmem:[#allocation2 + $0x50] sm:$0xff] %vm201_vm1, %v4956_v63  ;;  %v5222_v8 = vld [vmem:[#allocation2 + $0x20] sm:$0xff]  ;;  %v4957_v23 = vadd.f32 %v6741_v19, %v4663_v43  ;;  %v4854_v60 = vpop.f32.mrb[123].mxu1 }
 0x1ec   : > { %v5578_v52 = vld [vmem:[#allocation2 + $0x10] sm:$0xff]  ;;  %v5516_v57 = vadd.f32 %v5401_v4, %v5222_v8  ;;  %4986 = vst.msk [vmem:[#allocation2 + $0x40] sm:$0xff] %vm201_vm1, %v4954_v48  ;;  %v5225_v45 = vld [vmem:[#allocation2 + $0x38] sm:$0xff]  ;;  %v4955_v9 = vadd.f32 %v4854_v60, %v4661_v58 }
 0x1ed   : > { %5610 = vst.msk [vmem:[%s8549_s14 + $0x10] sm:$0xff] %vm201_vm1, %v5578_v52  ;;  %v5576_v29 = vld [vmem:[#allocation2] sm:$0xff]  ;;  %5550 = vst.msk [vmem:[#allocation2 + $0x30] sm:$0xff] %vm201_vm1, %v5518_v36  ;;  %v5519_v39 = vadd.f32 %v6771_v50, %v5225_v45  ;;  %v5223_v6 = vld [vmem:[#allocation2 + $0x28] sm:$0xff] }
 0x1ee   : > { %4989 = vst.msk [vmem:[#allocation2 + $0x58] sm:$0xff] %vm201_vm1, %v4957_v23  ;;  %5608 = vst.msk [vmem:[%s8549_s14] sm:$0xff] %vm201_vm1, %v5576_v29  ;;  %v5579_v14 = vld [vmem:[#allocation2 + $0x18] sm:$0xff]  ;;  %v5517_v28 = vadd.f32 %v5404_v16, %v5223_v6  ;;  %v4669_v16 = vld [vmem:[#allocation2 + $0x88] sm:$0xff] }
 0x1ef   : > { %5548 = vst.msk [vmem:[#allocation2 + $0x20] sm:$0xff] %vm201_vm1, %v5516_v57  ;;  %4987 = vst.msk [vmem:[#allocation2 + $0x48] sm:$0xff] %vm201_vm1, %v4955_v9  ;;  %v6774_v13 = vpop.f32.mrb[120].mxu0  ;;  %v5577_v11 = vld [vmem:[#allocation2 + $0x8] sm:$0xff] }
 0x1f0   : > { %5611 = vst.msk [vmem:[%s8549_s14 + $0x18] sm:$0xff] %vm201_vm1, %v5579_v14  ;;  %5551 = vst.msk [vmem:[#allocation2 + $0x38] sm:$0xff] %vm201_vm1, %v5519_v39  ;;  %v5417_v24 = vpop.f32.mrb[121].mxu0 }
 0x1f1   : > { %5609 = vst.msk [vmem:[%s8549_s14 + $0x8] sm:$0xff] %vm201_vm1, %v5577_v11  ;;  %5549 = vst.msk [vmem:[#allocation2 + $0x28] sm:$0xff] %vm201_vm1, %v5517_v28  ;;  %v6775_v51 = vpop.f32.mrb[122].mxu0 }
 0x1f2   : > { %v6744_v34 = vpop.f32.mrb[124].mxu1  ;;  %v5420_v40 = vpop.f32.mrb[123].mxu0  ;;  %v5228_v26 = vld [vmem:[#allocation2 + $0x50] sm:$0xff] }
 0x1f3   : > { %v4960_v33 = vadd.f32 %v6744_v34, %v4666_v59  ;;  %v4867_v38 = vpop.f32.mrb[125].mxu1  ;;  %v5522_v35 = vadd.f32 %v6774_v13, %v5228_v26  ;;  %v5226_v31 = vld [vmem:[#allocation2 + $0x40] sm:$0xff] }
 0x1f4   : > { %v4958_v17 = vadd.f32 %v4867_v38, %v4664_v18  ;;  %v6745_v20 = vpop.f32.mrb[126].mxu1  ;;  %v5582_v5 = vld [vmem:[#allocation2 + $0x30] sm:$0xff]  ;;  %v5520_v54 = vadd.f32 %v5417_v24, %v5226_v31  ;;  %v4675_v31 = vld [vmem:[#allocation2 + $0xb8] sm:$0xff] }
 0x1f5   : > { %4992 = vst.msk [vmem:[#allocation2 + $0x70] sm:$0xff] %vm201_vm1, %v4960_v33  ;;  %v4961_v12 = vadd.f32 %v6745_v20, %v4667_v61  ;;  %v4870_v46 = vpop.f32.mrb[127].mxu1  ;;  %v5229_v2 = vld [vmem:[#allocation2 + $0x58] sm:$0xff]  ;;  %5614 = vst.msk [vmem:[%s8549_s14 + $0x30] sm:$0xff] %vm201_vm1, %v5582_v5  ;;  %v4674_v18 = vld [vmem:[#allocation2 + $0xb0] sm:$0xff] }
 0x1f6   : > { %4990 = vst.msk [vmem:[#allocation2 + $0x60] sm:$0xff] %vm201_vm1, %v4958_v17  ;;  %v4959_v3 = vadd.f32 %v4870_v46, %v4665_v41  ;;  %v5580_v37 = vld [vmem:[#allocation2 + $0x20] sm:$0xff]  ;;  %5554 = vst.msk [vmem:[#allocation2 + $0x50] sm:$0xff] %vm201_vm1, %v5522_v35  ;;  %v5523_v56 = vadd.f32 %v6775_v51, %v5229_v2  ;;  %v5227_v15 = vld [vmem:[#allocation2 + $0x48] sm:$0xff] }
 0x1f7   : > { %4993 = vst.msk [vmem:[#allocation2 + $0x78] sm:$0xff] %vm201_vm1, %v4961_v12  ;;  %5612 = vst.msk [vmem:[%s8549_s14 + $0x20] sm:$0xff] %vm201_vm1, %v5580_v37  ;;  %v5583_v47 = vld [vmem:[#allocation2 + $0x38] sm:$0xff]  ;;  %v5521_v22 = vadd.f32 %v5420_v40, %v5227_v15  ;;  %v4672_v61 = vld [vmem:[#allocation2 + $0xa0] sm:$0xff] }
 0x1f8   : > { %5552 = vst.msk [vmem:[#allocation2 + $0x40] sm:$0xff] %vm201_vm1, %v5520_v54  ;;  %4991 = vst.msk [vmem:[#allocation2 + $0x68] sm:$0xff] %vm201_vm1, %v4959_v3  ;;  %v5581_v25 = vld [vmem:[#allocation2 + $0x28] sm:$0xff] }
 0x1f9   : > { %v6778_v10 = vpop.f32.mrb[124].mxu0  ;;  %5615 = vst.msk [vmem:[%s8549_s14 + $0x38] sm:$0xff] %vm201_vm1, %v5583_v47  ;;  %5555 = vst.msk [vmem:[#allocation2 + $0x58] sm:$0xff] %vm201_vm1, %v5523_v56  ;;  %v4673_v46 = vld [vmem:[#allocation2 + $0xa8] sm:$0xff] }
 0x1fa   : > { %v5433_v1 = vpop.f32.mrb[125].mxu0  ;;  %5613 = vst.msk [vmem:[%s8549_s14 + $0x28] sm:$0xff] %vm201_vm1, %v5581_v25  ;;  %5553 = vst.msk [vmem:[#allocation2 + $0x48] sm:$0xff] %vm201_vm1, %v5521_v22 }
 0x1fb   : > { %v6779_v53 = vpop.f32.mrb[126].mxu0 }
 0x1fc   : > { %v5436_v42 = vpop.f32.mrb[127].mxu0  ;;  %v5232_v4 = vld [vmem:[#allocation2 + $0x70] sm:$0xff] }
 0x1fd   : > { %v5526_v63 = vadd.f32 %v6778_v10, %v5232_v4  ;;  %v5230_v0 = vld [vmem:[#allocation2 + $0x60] sm:$0xff]  ;;  %v5586_v48 = vld [vmem:[#allocation2 + $0x50] sm:$0xff] }
 0x1fe   : > { %v5524_v43 = vadd.f32 %v5433_v1, %v5230_v0  ;;  %v5233_v19 = vld [vmem:[#allocation2 + $0x78] sm:$0xff]  ;;  %5618 = vst.msk [vmem:[%s8549_s14 + $0x50] sm:$0xff] %vm201_vm1, %v5586_v48 }
 0x1ff   : > { %v5584_v8 = vld [vmem:[#allocation2 + $0x40] sm:$0xff]  ;;  %5558 = vst.msk [vmem:[#allocation2 + $0x70] sm:$0xff] %vm201_vm1, %v5526_v63  ;;  %v5527_v23 = vadd.f32 %v6779_v53, %v5233_v19  ;;  %v5231_v58 = vld [vmem:[#allocation2 + $0x68] sm:$0xff]  ;;  %v4679_v0 = vld [vmem:[#allocation2 + $0xd8] sm:$0xff] }
 0x200   : > { %v6748_v21 = vpop.f32.mrb[128].mxu1  ;;  %5616 = vst.msk [vmem:[%s8549_s14 + $0x40] sm:$0xff] %vm201_vm1, %v5584_v8  ;;  %v5587_v60 = vld [vmem:[#allocation2 + $0x58] sm:$0xff]  ;;  %5556 = vst.msk [vmem:[#allocation2 + $0x60] sm:$0xff] %vm201_vm1, %v5524_v43  ;;  %v5525_v52 = vadd.f32 %v5436_v42, %v5231_v58 }
 0x201   : > { %v4964_v55 = vadd.f32 %v6748_v21, %v4670_v62  ;;  %v4883_v27 = vpop.f32.mrb[129].mxu1  ;;  %5619 = vst.msk [vmem:[%s8549_s14 + $0x58] sm:$0xff] %vm201_vm1, %v5587_v60  ;;  %v5585_v57 = vld [vmem:[#allocation2 + $0x48] sm:$0xff]  ;;  %5559 = vst.msk [vmem:[#allocation2 + $0x78] sm:$0xff] %vm201_vm1, %v5527_v23 }
 0x202   : > { %v4962_v30 = vadd.f32 %v4883_v27, %v4668_v7  ;;  %v6749_v50 = vpop.f32.mrb[130].mxu1  ;;  %5617 = vst.msk [vmem:[%s8549_s14 + $0x48] sm:$0xff] %vm201_vm1, %v5585_v57  ;;  %5557 = vst.msk [vmem:[#allocation2 + $0x68] sm:$0xff] %vm201_vm1, %v5525_v52  ;;  %v4678_v27 = vld [vmem:[#allocation2 + $0xd0] sm:$0xff] }
 0x203   : > { %4996 = vst.msk [vmem:[#allocation2 + $0x90] sm:$0xff] %vm201_vm1, %v4964_v55  ;;  %v4965_v49 = vadd.f32 %v6749_v50, %v4671_v44  ;;  %v4886_v32 = vpop.f32.mrb[131].mxu1  ;;  %v4676_v44 = vld [vmem:[#allocation2 + $0xc0] sm:$0xff] }
 0x204   : > { %4994 = vst.msk [vmem:[#allocation2 + $0x80] sm:$0xff] %vm201_vm1, %v4962_v30  ;;  %v4963_v36 = vadd.f32 %v4886_v32, %v4669_v16  ;;  %v4677_v32 = vld [vmem:[#allocation2 + $0xc8] sm:$0xff] }
 0x205   : > { %4997 = vst.msk [vmem:[#allocation2 + $0x98] sm:$0xff] %vm201_vm1, %v4965_v49 }
 0x206   : > { %4995 = vst.msk [vmem:[#allocation2 + $0x88] sm:$0xff] %vm201_vm1, %v4963_v36  ;;  %v5590_v13 = vld [vmem:[#allocation2 + $0x70] sm:$0xff] }
 0x207   : > { %v6782_v45 = vpop.f32.mrb[128].mxu0  ;;  %5622 = vst.msk [vmem:[%s8549_s14 + $0x70] sm:$0xff] %vm201_vm1, %v5590_v13  ;;  %v5588_v59 = vld [vmem:[#allocation2 + $0x60] sm:$0xff]  ;;  %v4682_v13 = vld [vmem:[#allocation2 + $0xf0] sm:$0xff] }
 0x208   : > { %v5449_v9 = vpop.f32.mrb[129].mxu0  ;;  %5620 = vst.msk [vmem:[%s8549_s14 + $0x60] sm:$0xff] %vm201_vm1, %v5588_v59  ;;  %v5591_v33 = vld [vmem:[#allocation2 + $0x78] sm:$0xff] }
 0x209   : > { %v6783_v29 = vpop.f32.mrb[130].mxu0  ;;  %5623 = vst.msk [vmem:[%s8549_s14 + $0x78] sm:$0xff] %vm201_vm1, %v5591_v33  ;;  %v5589_v26 = vld [vmem:[#allocation2 + $0x68] sm:$0xff] }
 0x20a   : > { %v5236_v39 = vld [vmem:[#allocation2 + $0x90] sm:$0xff]  ;;  %v5452_v6 = vpop.f32.mrb[131].mxu0  ;;  %5621 = vst.msk [vmem:[%s8549_s14 + $0x68] sm:$0xff] %vm201_vm1, %v5589_v26  ;;  %v4681_v26 = vld [vmem:[#allocation2 + $0xe8] sm:$0xff] }
 0x20b   : > { %v5530_v14 = vadd.f32 %v6782_v45, %v5236_v39  ;;  %v5234_v28 = vld [vmem:[#allocation2 + $0x80] sm:$0xff] }
 0x20c   : > { %v5528_v11 = vadd.f32 %v5449_v9, %v5234_v28  ;;  %v5237_v24 = vld [vmem:[#allocation2 + $0x98] sm:$0xff] }
 0x20d   : > { %5562 = vst.msk [vmem:[#allocation2 + $0x90] sm:$0xff] %vm201_vm1, %v5530_v14  ;;  %v5531_v34 = vadd.f32 %v6783_v29, %v5237_v24  ;;  %v5235_v51 = vld [vmem:[#allocation2 + $0x88] sm:$0xff] }
 0x20e   : > { %v6752_v38 = vpop.f32.mrb[132].mxu1  ;;  %5560 = vst.msk [vmem:[#allocation2 + $0x80] sm:$0xff] %vm201_vm1, %v5528_v11  ;;  %v5529_v40 = vadd.f32 %v5452_v6, %v5235_v51 }
 0x20f   : > { %v4968_v17 = vadd.f32 %v6752_v38, %v4674_v18  ;;  %v4899_v20 = vpop.f32.mrb[133].mxu1  ;;  %5563 = vst.msk [vmem:[#allocation2 + $0x98] sm:$0xff] %vm201_vm1, %v5531_v34  ;;  %v4680_v34 = vld [vmem:[#allocation2 + $0xe0] sm:$0xff]  ;;  %v4683_v18 = vld [vmem:[#allocation2 + $0xf8] sm:$0xff] }
 0x210   : > { %v4966_v35 = vadd.f32 %v4899_v20, %v4672_v61  ;;  %v6753_v12 = vpop.f32.mrb[134].mxu1  ;;  %5561 = vst.msk [vmem:[#allocation2 + $0x88] sm:$0xff] %vm201_vm1, %v5529_v40 }
 0x211   : > { %5000 = vst.msk [vmem:[#allocation2 + $0xb0] sm:$0xff] %vm201_vm1, %v4968_v17  ;;  %v4969_v41 = vadd.f32 %v6753_v12, %v4675_v31  ;;  %v4902_v5 = vpop.f32.mrb[135].mxu1 }
 0x212   : > { %4998 = vst.msk [vmem:[#allocation2 + $0xa0] sm:$0xff] %vm201_vm1, %v4966_v35  ;;  %v4967_v54 = vadd.f32 %v4902_v5, %v4673_v46 }
 0x213   : > { %5001 = vst.msk [vmem:[#allocation2 + $0xb8] sm:$0xff] %vm201_vm1, %v4969_v41 }
 0x214   : > { %v5594_v2 = vld [vmem:[#allocation2 + $0x90] sm:$0xff]  ;;  %4999 = vst.msk [vmem:[#allocation2 + $0xa8] sm:$0xff] %vm201_vm1, %v4967_v54 }
 0x215   : > { %5626 = vst.msk [vmem:[%s8549_s14 + $0x90] sm:$0xff] %vm201_vm1, %v5594_v2  ;;  %v5592_v3 = vld [vmem:[#allocation2 + $0x80] sm:$0xff]  ;;  %v6786_v37 = vpop.f32.mrb[132].mxu0 }
 0x216   : > { %5624 = vst.msk [vmem:[%s8549_s14 + $0x80] sm:$0xff] %vm201_vm1, %v5592_v3  ;;  %v5595_v56 = vld [vmem:[#allocation2 + $0x98] sm:$0xff]  ;;  %v5465_v15 = vpop.f32.mrb[133].mxu0 }
 0x217   : > { %5627 = vst.msk [vmem:[%s8549_s14 + $0x98] sm:$0xff] %vm201_vm1, %v5595_v56  ;;  %v5593_v47 = vld [vmem:[#allocation2 + $0x88] sm:$0xff]  ;;  %v6787_v22 = vpop.f32.mrb[134].mxu0 }
 0x218   : > { %5625 = vst.msk [vmem:[%s8549_s14 + $0x88] sm:$0xff] %vm201_vm1, %v5593_v47  ;;  %v5240_v10 = vld [vmem:[#allocation2 + $0xb0] sm:$0xff]  ;;  %v5468_v25 = vpop.f32.mrb[135].mxu0 }
 0x219   : > { %v5534_v1 = vadd.f32 %v6786_v37, %v5240_v10  ;;  %v5238_v62 = vld [vmem:[#allocation2 + $0xa0] sm:$0xff] }
 0x21a   : > { %v5532_v21 = vadd.f32 %v5465_v15, %v5238_v62  ;;  %v5241_v53 = vld [vmem:[#allocation2 + $0xb8] sm:$0xff] }
 0x21b   : > { %5566 = vst.msk [vmem:[#allocation2 + $0xb0] sm:$0xff] %vm201_vm1, %v5534_v1  ;;  %v5535_v55 = vadd.f32 %v6787_v22, %v5241_v53  ;;  %v5239_v7 = vld [vmem:[#allocation2 + $0xa8] sm:$0xff] }
 0x21c   : > { %v6756_v42 = vpop.f32.mrb[136].mxu1  ;;  %5564 = vst.msk [vmem:[#allocation2 + $0xa0] sm:$0xff] %vm201_vm1, %v5532_v21  ;;  %v5533_v4 = vadd.f32 %v5468_v25, %v5239_v7 }
 0x21d   : > { %v4972_v30 = vadd.f32 %v6756_v42, %v4678_v27  ;;  %v4915_v50 = vpop.f32.mrb[137].mxu1  ;;  %5567 = vst.msk [vmem:[#allocation2 + $0xb8] sm:$0xff] %vm201_vm1, %v5535_v55 }
 0x21e   : > { %v4970_v63 = vadd.f32 %v4915_v50, %v4676_v44  ;;  %v6757_v49 = vpop.f32.mrb[138].mxu1  ;;  %5565 = vst.msk [vmem:[#allocation2 + $0xa8] sm:$0xff] %vm201_vm1, %v5533_v4 }
 0x21f   : > { %5004 = vst.msk [vmem:[#allocation2 + $0xd0] sm:$0xff] %vm201_vm1, %v4972_v30  ;;  %v4973_v16 = vadd.f32 %v6757_v49, %v4679_v0  ;;  %v4918_v48 = vpop.f32.mrb[139].mxu1 }
 0x220   : > { %5002 = vst.msk [vmem:[#allocation2 + $0xc0] sm:$0xff] %vm201_vm1, %v4970_v63  ;;  %v4971_v43 = vadd.f32 %v4918_v48, %v4677_v32 }
 0x221   : > { %5005 = vst.msk [vmem:[#allocation2 + $0xd8] sm:$0xff] %vm201_vm1, %v4973_v16 }
 0x222   : > { %v5598_v19 = vld [vmem:[#allocation2 + $0xb0] sm:$0xff]  ;;  %5003 = vst.msk [vmem:[#allocation2 + $0xc8] sm:$0xff] %vm201_vm1, %v4971_v43 }
 0x223   : > { %5630 = vst.msk [vmem:[%s8549_s14 + $0xb0] sm:$0xff] %vm201_vm1, %v5598_v19  ;;  %v5596_v36 = vld [vmem:[#allocation2 + $0xa0] sm:$0xff]  ;;  %v6790_v8 = vpop.f32.mrb[136].mxu0 }
 0x224   : > { %5628 = vst.msk [vmem:[%s8549_s14 + $0xa0] sm:$0xff] %vm201_vm1, %v5596_v36  ;;  %v5599_v23 = vld [vmem:[#allocation2 + $0xb8] sm:$0xff]  ;;  %v5481_v58 = vpop.f32.mrb[137].mxu0 }
 0x225   : > { %5631 = vst.msk [vmem:[%s8549_s14 + $0xb8] sm:$0xff] %vm201_vm1, %v5599_v23  ;;  %v5597_v60 = vld [vmem:[#allocation2 + $0xa8] sm:$0xff]  ;;  %v6791_v52 = vpop.f32.mrb[138].mxu0 }
 0x226   : > { %5629 = vst.msk [vmem:[%s8549_s14 + $0xa8] sm:$0xff] %vm201_vm1, %v5597_v60  ;;  %v5244_v57 = vld [vmem:[#allocation2 + $0xd0] sm:$0xff]  ;;  %v5484_v45 = vpop.f32.mrb[139].mxu0 }
 0x227   : > { %v5538_v9 = vadd.f32 %v6790_v8, %v5244_v57  ;;  %v5242_v29 = vld [vmem:[#allocation2 + $0xc0] sm:$0xff] }
 0x228   : > { %v5536_v39 = vadd.f32 %v5481_v58, %v5242_v29  ;;  %v5245_v6 = vld [vmem:[#allocation2 + $0xd8] sm:$0xff] }
 0x229   : > { %5570 = vst.msk [vmem:[#allocation2 + $0xd0] sm:$0xff] %vm201_vm1, %v5538_v9  ;;  %v5539_v14 = vadd.f32 %v6791_v52, %v5245_v6  ;;  %v5243_v28 = vld [vmem:[#allocation2 + $0xc8] sm:$0xff] }
 0x22a   : > { %v6760_v11 = vpop.f32.mrb[140].mxu1  ;;  %5568 = vst.msk [vmem:[#allocation2 + $0xc0] sm:$0xff] %vm201_vm1, %v5536_v39  ;;  %v5537_v24 = vadd.f32 %v5484_v45, %v5243_v28 }
 0x22b   : > { %v4976_v59 = vadd.f32 %v6760_v11, %v4682_v13  ;;  %v4931_v51 = vpop.f32.mrb[141].mxu1  ;;  %5571 = vst.msk [vmem:[#allocation2 + $0xd8] sm:$0xff] %vm201_vm1, %v5539_v14 }
 0x22c   : > { %v4974_v33 = vadd.f32 %v4931_v51, %v4680_v34  ;;  %v6761_v38 = vpop.f32.mrb[142].mxu1  ;;  %5569 = vst.msk [vmem:[#allocation2 + $0xc8] sm:$0xff] %vm201_vm1, %v5537_v24 }
 0x22d   : > { %5008 = vst.msk [vmem:[#allocation2 + $0xf0] sm:$0xff] %vm201_vm1, %v4976_v59  ;;  %v4977_v40 = vadd.f32 %v6761_v38, %v4683_v18  ;;  %v4934_v17 = vpop.f32.mrb[143].mxu1  ;;  %v6794_v61 = vpop.f32.mrb[140].mxu0 }
 0x22e   : > { %5006 = vst.msk [vmem:[#allocation2 + $0xe0] sm:$0xff] %vm201_vm1, %v4974_v33  ;;  %v4975_v20 = vadd.f32 %v4934_v17, %v4681_v26  ;;  %v5497_v35 = vpop.f32.mrb[141].mxu0 }
 0x22f   : > { %5009 = vst.msk [vmem:[#allocation2 + $0xf8] sm:$0xff] %vm201_vm1, %v4977_v40  ;;  %v6795_v31 = vpop.f32.mrb[142].mxu0 }
 0x230   : > { %v5602_v12 = vld [vmem:[#allocation2 + $0xd0] sm:$0xff]  ;;  %5007 = vst.msk [vmem:[#allocation2 + $0xe8] sm:$0xff] %vm201_vm1, %v4975_v20  ;;  %v5500_v41 = vpop.f32.mrb[143].mxu0 }
 0x231   : > { %5634 = vst.msk [vmem:[%s8549_s14 + $0xd0] sm:$0xff] %vm201_vm1, %v5602_v12  ;;  %v5600_v46 = vld [vmem:[#allocation2 + $0xc0] sm:$0xff] }
 0x232   : > { %5632 = vst.msk [vmem:[%s8549_s14 + $0xc0] sm:$0xff] %vm201_vm1, %v5600_v46  ;;  %v5603_v5 = vld [vmem:[#allocation2 + $0xd8] sm:$0xff] }
 0x233   : > { %5635 = vst.msk [vmem:[%s8549_s14 + $0xd8] sm:$0xff] %vm201_vm1, %v5603_v5  ;;  %v5601_v54 = vld [vmem:[#allocation2 + $0xc8] sm:$0xff] }
 0x234   : > { %5633 = vst.msk [vmem:[%s8549_s14 + $0xc8] sm:$0xff] %vm201_vm1, %v5601_v54  ;;  %v5248_v2 = vld [vmem:[#allocation2 + $0xf0] sm:$0xff] }
 0x235   : > { %v5542_v3 = vadd.f32 %v6794_v61, %v5248_v2  ;;  %v5246_v37 = vld [vmem:[#allocation2 + $0xe0] sm:$0xff] }
 0x236   : > { %v5540_v56 = vadd.f32 %v5497_v35, %v5246_v37  ;;  %v5249_v15 = vld [vmem:[#allocation2 + $0xf8] sm:$0xff] }
 0x237   : > { %5574 = vst.msk [vmem:[#allocation2 + $0xf0] sm:$0xff] %vm201_vm1, %v5542_v3  ;;  %v5543_v47 = vadd.f32 %v6795_v31, %v5249_v15  ;;  %v5247_v22 = vld [vmem:[#allocation2 + $0xe8] sm:$0xff] }
 0x238   : > { %5572 = vst.msk [vmem:[#allocation2 + $0xe0] sm:$0xff] %vm201_vm1, %v5540_v56  ;;  %v5541_v10 = vadd.f32 %v5500_v41, %v5247_v22 }
 0x239   : > { %5575 = vst.msk [vmem:[#allocation2 + $0xf8] sm:$0xff] %vm201_vm1, %v5543_v47 }
 0x23a   : > { %5573 = vst.msk [vmem:[#allocation2 + $0xe8] sm:$0xff] %vm201_vm1, %v5541_v10 }
 0x23e   : > { %v5606_v25 = vld [vmem:[#allocation2 + $0xf0] sm:$0xff] }
 0x23f   : > { %5638 = vst.msk [vmem:[%s8549_s14 + $0xf0] sm:$0xff] %vm201_vm1, %v5606_v25  ;;  %v5604_v1 = vld [vmem:[#allocation2 + $0xe0] sm:$0xff] }
 0x240   : > { %5636 = vst.msk [vmem:[%s8549_s14 + $0xe0] sm:$0xff] %vm201_vm1, %v5604_v1  ;;  %v5607_v62 = vld [vmem:[#allocation2 + $0xf8] sm:$0xff] }
 0x241   : > { %5639 = vst.msk [vmem:[%s8549_s14 + $0xf8] sm:$0xff] %vm201_vm1, %v5607_v62  ;;  %v5605_v21 = vld [vmem:[#allocation2 + $0xe8] sm:$0xff] }
 0x242   : > { %5637 = vst.msk [vmem:[%s8549_s14 + $0xe8] sm:$0xff] %vm201_vm1, %v5605_v21 }
 0x243 PF: > { %s12_s11 = sadd.s32 1, %s6904_s11   ;;  %s8683_s9 = smov %s6900_s10 }
 0x244   : > { %p9_p5 = scmp.ge.s32.totalorder %s12_s11, 4   ;;  %s8684_s10 = smov %s8686_s12 }
 0x246   :  { %11 = sbr.rel (!%p9_p5) target bundleno = 2 (0x2), region = 71 }

</bundles_post_ra>
